<compile_context>
chip_gen: v5e
topology: v5e:2x2
jax: 0.10.0
libtpu: 0.0.40
codegen_flags: <defaults>
</compile_context>

<pallas_src>
import jax
import jax.numpy as jnp
from jax.experimental import pallas as pl
from jax.experimental.pallas import tpu as pltpu


def _resolve_heads(band_dim: int, heads: int) -> int:
    # mirrors the head-adjustment logic from the PyTorch __init__
    if heads > band_dim or band_dim % heads != 0:
        heads = max(d for d in range(band_dim, 0, -1)
                    if band_dim % d == 0 and d <= heads)
    return heads


def _vmem_capacity_bytes() -> int:
    try:
        return int(pltpu.get_tpu_info().vmem_capacity_bytes)
    except Exception:
        return 128 * 1024 * 1024          # v5e / v6e default


def _per_column_bytes(bd: int, bdp: int) -> int:
    # rough f32 rows alive per lane column:
    #   2x double-buffered in + out blocks (4 * 3bd) and ~56*bdp rows of
    #   intermediates (fused qkv 21*bdp, q*k 9*bdp, logits 9*bdp, softmax
    #   transients, y scratch 3*bdp, headroom)
    return 4 * (4 * (3 * bd) + 56 * bdp)


def _pick_tile(hw: int, bd: int, bdp: int, nt_target: int) -> int:
    budget = int(_vmem_capacity_bytes() * 0.45)        # 64 MiB VMEM on v7x -> smaller
    nt = min(nt_target, budget // _per_column_bytes(bd, bdp))
    nt = max(128, (nt // 128) * 128)
    if hw <= nt:
        return hw                                      # single full-width tile
    return nt


def _make_kernel(bd: int, bdp: int):
    nine = 9 * bdp
    prec = jax.lax.Precision.HIGHEST

    def kernel(wbig_ref, pool9_ref, wproj_ref, bias_ref, x_ref, o_ref, y_ref):
        # wbig_ref  : (21*bdp, 3bd)  fused qkv weight -> [q rep x3 | k tiled x3 | v]
        # pool9_ref : (9*bdp, 9*bdp) kron(eye(9), within-head pool), attn scale folded
        # wproj_ref : (3bd, 3*bdp)   block-diag proj weight, pre-scaled by res_scale
        # bias_ref  : (3bd, 1)       stacked proj bias, pre-scaled by res_scale
        # x_ref/o_ref: (3bd, nt)     tile; rows [t*bd:(t+1)*bd] = band token t
        # y_ref     : (3*bdp, nt)    VMEM scratch for the attention output
        x = x_ref[...]

        # single fused MXU stream: (21*bdp, 3bd) @ (3bd, nt)
        big = jnp.dot(wbig_ref[...], x,
                      preferred_element_type=jnp.float32, precision=prec)
        qrep = big[0:nine]                       # q[a] repeated 3x  (9*bdp, nt)
        ktil = big[nine:2 * nine]                # [k0,k1,k2] tiled 3x
        vtok = big[2 * nine:2 * nine + 3 * bdp]  # v tokens          (3*bdp, nt)

        # all nine per-(a,b) head-pooled logits with ONE block-diag matmul
        s_all = jnp.dot(pool9_ref[...], qrep * ktil,
                        preferred_element_type=jnp.float32, precision=prec)

        # softmax over the 3 band tokens + weighted sum of v, per query token a
        for a in range(3):
            s0 = s_all[(3 * a + 0) * bdp:(3 * a + 1) * bdp]
            s1 = s_all[(3 * a + 1) * bdp:(3 * a + 2) * bdp]
            s2 = s_all[(3 * a + 2) * bdp:(3 * a + 3) * bdp]
            m = jnp.maximum(jnp.maximum(s0, s1), s2)
            e0 = jnp.exp(s0 - m)
            e1 = jnp.exp(s1 - m)
            e2 = jnp.exp(s2 - m)
            d = e0 + e1 + e2
            inv = pl.reciprocal(d, approx=True)
            inv = inv * (2.0 - d * inv)          # one Newton step -> ~1e-7 rel err
            y_ref[a * bdp:(a + 1) * bdp, :] = (
                e0 * vtok[0:bdp]
                + e1 * vtok[bdp:2 * bdp]
                + e2 * vtok[2 * bdp:3 * bdp]
            ) * inv

        # fused proj + residual; res_scale already folded into weights/bias
        out = jnp.dot(wproj_ref[...], y_ref[...],
                      preferred_element_type=jnp.float32, precision=prec)
        o_ref[...] = x + out + bias_ref[...]

    return kernel


def cross_band_attn(x, wqkv, wproj, bproj, res_scale, heads, nt_target=8192):
    """x: (B, Ctot, H, W) float32 with Ctot = 3 * band_dim."""
    B, Ctot, H, W = x.shape
    assert Ctot % 3 == 0
    bd = Ctot // 3
    bdp = -(-bd // 8) * 8                      # sublane-aligned band width
    heads = _resolve_heads(bd, heads)
    head_dim = bd // heads
    scale = float(head_dim) ** -0.5
    hw = H * W

    nt = _pick_tile(hw, bd, bdp, nt_target)
    n_tiles = pl.cdiv(hw, nt)
    if B * n_tiles < 2 and hw > 256:
        # keep both TensorCores busy on v7x: split the single tile in two
        nt = max(128, ((-(-hw // 2)) + 127) // 128 * 128)
        n_tiles = pl.cdiv(hw, nt)

    # NCHW stays put in HBM: only a free reshape to (B, Ctot, H*W);
    # ragged pixel tails are handled by Pallas block masking (no pad / slice).
    x_flat = x.reshape(B, Ctot, hw)

    # -------- tiny host-side weight prep (O(bd^2), done once) --------
    f32 = jnp.float32
    rs = jnp.asarray(res_scale, f32)
    Wq = wqkv[0 * bd:1 * bd].astype(f32)
    Wk = wqkv[1 * bd:2 * bd].astype(f32)
    Wv = wqkv[2 * bd:3 * bd].astype(f32)

    # fused (21*bdp, 3bd) weight: rows [r*bdp] r=3a+b give q of token a (rep x3),
    # rows [9*bdp + r*bdp] give k of token b (tiled x3), rows [18*bdp + t*bdp] give v.
    wbig = jnp.zeros((21 * bdp, 3 * bd), f32)
    for a in range(3):
        for b in range(3):
            r = 3 * a + b
            wbig = wbig.at[r * bdp:r * bdp + bd, a * bd:(a + 1) * bd].set(Wq)
            wbig = wbig.at[9 * bdp + r * bdp:9 * bdp + r * bdp + bd,
                           b * bd:(b + 1) * bd].set(Wk)
    for t in range(3):
        wbig = wbig.at[18 * bdp + t * bdp:18 * bdp + t * bdp + bd,
                       t * bd:(t + 1) * bd].set(Wv)

    # within-head pooling matrix (attn scale folded in), padded to bdp, kron'd x9
    idx = jnp.arange(bdp)
    valid = idx < bd
    hid = idx // head_dim
    poolp = jnp.where((hid[:, None] == hid[None, :])
                      & valid[:, None] & valid[None, :],
                      jnp.asarray(scale, f32), jnp.asarray(0.0, f32))
    pool9 = jnp.kron(jnp.eye(9, dtype=f32), poolp)               # (9*bdp, 9*bdp)

    # block-diag proj (res_scale folded), mapping padded y rows -> Ctot rows
    wproj3 = jnp.zeros((3 * bd, 3 * bdp), f32)
    for t in range(3):
        wproj3 = wproj3.at[t * bd:(t + 1) * bd,
                           t * bdp:t * bdp + bd].set(rs * wproj.astype(f32))
    bproj3 = (rs * jnp.tile(bproj.astype(f32), 3)).reshape(3 * bd, 1)

    # VMEM limit from the actual per-tile footprint (+ slack for weights/consts)
    vmem_cap = _vmem_capacity_bytes()
    vmem_limit = _per_column_bytes(bd, bdp) * nt + (4 << 20)
    vmem_limit = max(vmem_limit, 16 << 20)
    vmem_limit = min(vmem_limit, int(vmem_cap * 0.9))

    kernel = _make_kernel(bd, bdp)
    grid = (B, n_tiles)

    out_flat = pl.pallas_call(
        kernel,
        out_shape=jax.ShapeDtypeStruct((B, Ctot, hw), x.dtype),
        grid=grid,
        in_specs=[
            pl.BlockSpec((21 * bdp, 3 * bd), lambda b, i: (0, 0)),    # fused qkv weight
            pl.BlockSpec((9 * bdp, 9 * bdp), lambda b, i: (0, 0)),    # block-diag pool
            pl.BlockSpec((3 * bd, 3 * bdp), lambda b, i: (0, 0)),     # proj (res-scaled)
            pl.BlockSpec((3 * bd, 1), lambda b, i: (0, 0)),           # bias (res-scaled)
            pl.BlockSpec((None, Ctot, nt), lambda b, i: (b, 0, i)),   # x tile
        ],
        out_specs=pl.BlockSpec((None, Ctot, nt), lambda b, i: (b, 0, i)),
        scratch_shapes=[pltpu.VMEM((3 * bdp, nt), jnp.float32)],      # y slab
        compiler_params=pltpu.CompilerParams(
            dimension_semantics=("parallel", "parallel"),
            vmem_limit_bytes=int(vmem_limit),
        ),
    )(wbig, pool9, wproj3, bproj3, x_flat)

    return out_flat.reshape(B, Ctot, H, W)


def ref_forward(x, wqkv, wproj, bproj, res_scale, heads):
    """Pure-JAX reference mirroring the PyTorch module exactly."""
    B, Ctot, H, W = x.shape
    bd = Ctot // 3
    heads = _resolve_heads(bd, heads)
    hd = bd // heads
    scale = float(hd) ** -0.5
    x_ = x.reshape(B, 3, bd, H, W).transpose(0, 3, 4, 1, 2).reshape(-1, 3, bd)
    qkv = x_ @ wqkv.T
    q, k, v = jnp.split(qkv, 3, axis=-1)
    sp = lambda t: t.reshape(-1, 3, heads, hd).transpose(0, 2, 1, 3)
    q, k, v = sp(q), sp(k), sp(v)
    attn = (q @ jnp.swapaxes(k, -1, -2)) * scale
    attn = jax.nn.softmax(attn, axis=-1)
    y = (attn @ v).transpose(0, 2, 1, 3).reshape(-1, 3, bd)
    y = y @ wproj.T + bproj
    y = y.reshape(B, H, W, 3, bd).transpose(0, 3, 4, 1, 2).reshape(B, Ctot, H, W)
    return x + res_scale * y


if __name__ == "__main__":
    # small shapes: B=2, in_channels=24 (band_dim=8), H=W=16, heads=4 (head_dim=2)
    B, in_channels, H, W = 2, 24, 16, 16
    heads = 4
    bd = in_channels // 3

    key = jax.random.PRNGKey(0)
    k1, k2, k3, k4 = jax.random.split(key, 4)
    wqkv = jax.random.normal(k1, (3 * bd, bd), jnp.float32) * 0.2
    wproj = jax.random.normal(k2, (bd, bd), jnp.float32) * 0.2
    bproj = jax.random.normal(k3, (bd,), jnp.float32) * 0.1
    res_scale = jnp.float32(0.5)
    x = jax.random.normal(k4, (B, in_channels, H, W), jnp.float32)

    out = cross_band_attn(x, wqkv, wproj, bproj, res_scale, heads)
    out = jax.block_until_ready(out)

    ref = ref_forward(x, wqkv, wproj, bproj, res_scale, heads)
    assert out.shape == (B, in_channels, H, W)
    err = jnp.max(jnp.abs(out - ref))
    assert jnp.allclose(out, ref, rtol=1e-5, atol=1e-5), f"max abs err = {err}"

    print("KERNEL_OK")
</pallas_src>

<mosaic_0001>
module attributes {stable_mosaic.version = 11 : i64} {
  func.func @kernel(%arg0: i32, %arg1: i32, %arg2: memref<168x24xf32, #tpu.memory_space<vmem>>, %arg3: memref<72x72xf32, #tpu.memory_space<vmem>>, %arg4: memref<24x24xf32, #tpu.memory_space<vmem>>, %arg5: memref<24x1xf32, #tpu.memory_space<vmem>>, %arg6: memref<1x24x256xf32, #tpu.memory_space<vmem>>, %arg7: memref<1x24x256xf32, #tpu.memory_space<vmem>>, %arg8: memref<24x256xf32, #tpu.memory_space<vmem>>) attributes {dimension_semantics = [#tpu.dimension_semantics<parallel>, #tpu.dimension_semantics<parallel>], iteration_bounds = array<i64: 2, 1>, scalar_prefetch = 0 : i64, scratch_operands = 1 : i64, tpu.core_type = #tpu.core_type<tc>, window_params = [{pipeline_mode = #tpu.pipeline_mode<synchronous>, transform_indices = @transform_0, window_bounds = array<i64: 168, 24>}, {pipeline_mode = #tpu.pipeline_mode<synchronous>, transform_indices = @transform_1, window_bounds = array<i64: 72, 72>}, {pipeline_mode = #tpu.pipeline_mode<synchronous>, transform_indices = @transform_2, window_bounds = array<i64: 24, 24>}, {pipeline_mode = #tpu.pipeline_mode<synchronous>, transform_indices = @transform_3, window_bounds = array<i64: 24, 1>}, {transform_indices = @transform_4, window_bounds = array<i64: 1, 24, 256>}, {transform_indices = @transform_5, window_bounds = array<i64: 1, 24, 256>}]} {
    %c0 = arith.constant 0 : index
    %c0_0 = arith.constant 0 : index
    %c0_1 = arith.constant 0 : index
    %0 = vector.load %arg6[%c0, %c0_0, %c0_1] : memref<1x24x256xf32, #tpu.memory_space<vmem>>, vector<1x24x256xf32>
    %1 = vector.shape_cast %0 : vector<1x24x256xf32> to vector<24x256xf32>
    %c0_2 = arith.constant 0 : index
    %c0_3 = arith.constant 0 : index
    %2 = vector.load %arg2[%c0_2, %c0_3] : memref<168x24xf32, #tpu.memory_space<vmem>>, vector<168x24xf32>
    %cst = arith.constant dense<0.000000e+00> : vector<168x256xf32>
    %3 = tpu.matmul %2, %1, %cst {dimension_numbers = #tpu.dot_dimension_numbers<[1], [0], [0], [1], [0, 0, 1, 1], [], []>, precision = #tpu.contract_precision<fp32>} : vector<168x24xf32>, vector<24x256xf32>, vector<168x256xf32> -> vector<168x256xf32>
    %4 = vector.extract_strided_slice %3 {offsets = [0, 0], sizes = [72, 256], strides = [1, 1]} : vector<168x256xf32> to vector<72x256xf32>
    %5 = vector.extract_strided_slice %3 {offsets = [72, 0], sizes = [72, 256], strides = [1, 1]} : vector<168x256xf32> to vector<72x256xf32>
    %6 = vector.extract_strided_slice %3 {offsets = [144, 0], sizes = [24, 256], strides = [1, 1]} : vector<168x256xf32> to vector<24x256xf32>
    %c0_4 = arith.constant 0 : index
    %c0_5 = arith.constant 0 : index
    %7 = vector.load %arg3[%c0_4, %c0_5] : memref<72x72xf32, #tpu.memory_space<vmem>>, vector<72x72xf32>
    %8 = arith.mulf %4, %5 : vector<72x256xf32>
    %cst_6 = arith.constant dense<0.000000e+00> : vector<72x256xf32>
    %9 = tpu.matmul %7, %8, %cst_6 {dimension_numbers = #tpu.dot_dimension_numbers<[1], [0], [0], [1], [0, 0, 1, 1], [], []>, precision = #tpu.contract_precision<fp32>} : vector<72x72xf32>, vector<72x256xf32>, vector<72x256xf32> -> vector<72x256xf32>
    %10 = vector.extract_strided_slice %9 {offsets = [0, 0], sizes = [8, 256], strides = [1, 1]} : vector<72x256xf32> to vector<8x256xf32>
    %11 = vector.extract_strided_slice %9 {offsets = [8, 0], sizes = [8, 256], strides = [1, 1]} : vector<72x256xf32> to vector<8x256xf32>
    %12 = vector.extract_strided_slice %9 {offsets = [16, 0], sizes = [8, 256], strides = [1, 1]} : vector<72x256xf32> to vector<8x256xf32>
    %13 = arith.maximumf %10, %11 : vector<8x256xf32>
    %14 = arith.maximumf %13, %12 : vector<8x256xf32>
    %15 = arith.subf %10, %14 : vector<8x256xf32>
    %16 = math.exp %15 : vector<8x256xf32>
    %17 = arith.subf %11, %14 : vector<8x256xf32>
    %18 = math.exp %17 : vector<8x256xf32>
    %19 = arith.subf %12, %14 : vector<8x256xf32>
    %20 = math.exp %19 : vector<8x256xf32>
    %21 = arith.addf %16, %18 : vector<8x256xf32>
    %22 = arith.addf %21, %20 : vector<8x256xf32>
    %23 = tpu.reciprocal %22 {approx = true} : vector<8x256xf32> -> vector<8x256xf32>
    %24 = arith.mulf %22, %23 : vector<8x256xf32>
    %cst_7 = arith.constant 2.000000e+00 : f32
    %25 = vector.broadcast %cst_7 : f32 to vector<8x256xf32>
    %26 = arith.subf %25, %24 : vector<8x256xf32>
    %27 = arith.mulf %23, %26 : vector<8x256xf32>
    %28 = vector.extract_strided_slice %6 {offsets = [0, 0], sizes = [8, 256], strides = [1, 1]} : vector<24x256xf32> to vector<8x256xf32>
    %29 = arith.mulf %16, %28 : vector<8x256xf32>
    %30 = vector.extract_strided_slice %6 {offsets = [8, 0], sizes = [8, 256], strides = [1, 1]} : vector<24x256xf32> to vector<8x256xf32>
    %31 = arith.mulf %18, %30 : vector<8x256xf32>
    %32 = arith.addf %29, %31 : vector<8x256xf32>
    %33 = vector.extract_strided_slice %6 {offsets = [16, 0], sizes = [8, 256], strides = [1, 1]} : vector<24x256xf32> to vector<8x256xf32>
    %34 = arith.mulf %20, %33 : vector<8x256xf32>
    %35 = arith.addf %32, %34 : vector<8x256xf32>
    %36 = arith.mulf %35, %27 : vector<8x256xf32>
    %c0_8 = arith.constant 0 : index
    %c0_9 = arith.constant 0 : index
    %37 = vector.load %arg8[%c0_8, %c0_9] : memref<24x256xf32, #tpu.memory_space<vmem>>, vector<8x256xf32>
    tpu.vector_store %arg8[%c0_8, %c0_9], %36 {strides = array<i32>} : memref<24x256xf32, #tpu.memory_space<vmem>>, vector<8x256xf32>,
    %38 = vector.extract_strided_slice %9 {offsets = [24, 0], sizes = [8, 256], strides = [1, 1]} : vector<72x256xf32> to vector<8x256xf32>
    %39 = vector.extract_strided_slice %9 {offsets = [32, 0], sizes = [8, 256], strides = [1, 1]} : vector<72x256xf32> to vector<8x256xf32>
    %40 = vector.extract_strided_slice %9 {offsets = [40, 0], sizes = [8, 256], strides = [1, 1]} : vector<72x256xf32> to vector<8x256xf32>
    %41 = arith.maximumf %38, %39 : vector<8x256xf32>
    %42 = arith.maximumf %41, %40 : vector<8x256xf32>
    %43 = arith.subf %38, %42 : vector<8x256xf32>
    %44 = math.exp %43 : vector<8x256xf32>
    %45 = arith.subf %39, %42 : vector<8x256xf32>
    %46 = math.exp %45 : vector<8x256xf32>
    %47 = arith.subf %40, %42 : vector<8x256xf32>
    %48 = math.exp %47 : vector<8x256xf32>
    %49 = arith.addf %44, %46 : vector<8x256xf32>
    %50 = arith.addf %49, %48 : vector<8x256xf32>
    %51 = tpu.reciprocal %50 {approx = true} : vector<8x256xf32> -> vector<8x256xf32>
    %52 = arith.mulf %50, %51 : vector<8x256xf32>
    %cst_10 = arith.constant 2.000000e+00 : f32
    %53 = vector.broadcast %cst_10 : f32 to vector<8x256xf32>
    %54 = arith.subf %53, %52 : vector<8x256xf32>
    %55 = arith.mulf %51, %54 : vector<8x256xf32>
    %56 = vector.extract_strided_slice %6 {offsets = [0, 0], sizes = [8, 256], strides = [1, 1]} : vector<24x256xf32> to vector<8x256xf32>
    %57 = arith.mulf %44, %56 : vector<8x256xf32>
    %58 = vector.extract_strided_slice %6 {offsets = [8, 0], sizes = [8, 256], strides = [1, 1]} : vector<24x256xf32> to vector<8x256xf32>
    %59 = arith.mulf %46, %58 : vector<8x256xf32>
    %60 = arith.addf %57, %59 : vector<8x256xf32>
    %61 = vector.extract_strided_slice %6 {offsets = [16, 0], sizes = [8, 256], strides = [1, 1]} : vector<24x256xf32> to vector<8x256xf32>
    %62 = arith.mulf %48, %61 : vector<8x256xf32>
    %63 = arith.addf %60, %62 : vector<8x256xf32>
    %64 = arith.mulf %63, %55 : vector<8x256xf32>
    %c8 = arith.constant 8 : index
    %c0_11 = arith.constant 0 : index
    %65 = vector.load %arg8[%c8, %c0_11] : memref<24x256xf32, #tpu.memory_space<vmem>>, vector<8x256xf32>
    tpu.vector_store %arg8[%c8, %c0_11], %64 {strides = array<i32>} : memref<24x256xf32, #tpu.memory_space<vmem>>, vector<8x256xf32>,
    %66 = vector.extract_strided_slice %9 {offsets = [48, 0], sizes = [8, 256], strides = [1, 1]} : vector<72x256xf32> to vector<8x256xf32>
    %67 = vector.extract_strided_slice %9 {offsets = [56, 0], sizes = [8, 256], strides = [1, 1]} : vector<72x256xf32> to vector<8x256xf32>
    %68 = vector.extract_strided_slice %9 {offsets = [64, 0], sizes = [8, 256], strides = [1, 1]} : vector<72x256xf32> to vector<8x256xf32>
    %69 = arith.maximumf %66, %67 : vector<8x256xf32>
    %70 = arith.maximumf %69, %68 : vector<8x256xf32>
    %71 = arith.subf %66, %70 : vector<8x256xf32>
    %72 = math.exp %71 : vector<8x256xf32>
    %73 = arith.subf %67, %70 : vector<8x256xf32>
    %74 = math.exp %73 : vector<8x256xf32>
    %75 = arith.subf %68, %70 : vector<8x256xf32>
    %76 = math.exp %75 : vector<8x256xf32>
    %77 = arith.addf %72, %74 : vector<8x256xf32>
    %78 = arith.addf %77, %76 : vector<8x256xf32>
    %79 = tpu.reciprocal %78 {approx = true} : vector<8x256xf32> -> vector<8x256xf32>
    %80 = arith.mulf %78, %79 : vector<8x256xf32>
    %cst_12 = arith.constant 2.000000e+00 : f32
    %81 = vector.broadcast %cst_12 : f32 to vector<8x256xf32>
    %82 = arith.subf %81, %80 : vector<8x256xf32>
    %83 = arith.mulf %79, %82 : vector<8x256xf32>
    %84 = vector.extract_strided_slice %6 {offsets = [0, 0], sizes = [8, 256], strides = [1, 1]} : vector<24x256xf32> to vector<8x256xf32>
    %85 = arith.mulf %72, %84 : vector<8x256xf32>
    %86 = vector.extract_strided_slice %6 {offsets = [8, 0], sizes = [8, 256], strides = [1, 1]} : vector<24x256xf32> to vector<8x256xf32>
    %87 = arith.mulf %74, %86 : vector<8x256xf32>
    %88 = arith.addf %85, %87 : vector<8x256xf32>
    %89 = vector.extract_strided_slice %6 {offsets = [16, 0], sizes = [8, 256], strides = [1, 1]} : vector<24x256xf32> to vector<8x256xf32>
    %90 = arith.mulf %76, %89 : vector<8x256xf32>
    %91 = arith.addf %88, %90 : vector<8x256xf32>
    %92 = arith.mulf %91, %83 : vector<8x256xf32>
    %c16 = arith.constant 16 : index
    %c0_13 = arith.constant 0 : index
    %93 = vector.load %arg8[%c16, %c0_13] : memref<24x256xf32, #tpu.memory_space<vmem>>, vector<8x256xf32>
    tpu.vector_store %arg8[%c16, %c0_13], %92 {strides = array<i32>} : memref<24x256xf32, #tpu.memory_space<vmem>>, vector<8x256xf32>,
    %c0_14 = arith.constant 0 : index
    %c0_15 = arith.constant 0 : index
    %94 = vector.load %arg4[%c0_14, %c0_15] : memref<24x24xf32, #tpu.memory_space<vmem>>, vector<24x24xf32>
    %c0_16 = arith.constant 0 : index
    %c0_17 = arith.constant 0 : index
    %95 = vector.load %arg8[%c0_16, %c0_17] : memref<24x256xf32, #tpu.memory_space<vmem>>, vector<24x256xf32>
    %cst_18 = arith.constant dense<0.000000e+00> : vector<24x256xf32>
    %96 = tpu.matmul %94, %95, %cst_18 {dimension_numbers = #tpu.dot_dimension_numbers<[1], [0], [0], [1], [0, 0, 1, 1], [], []>, precision = #tpu.contract_precision<fp32>} : vector<24x24xf32>, vector<24x256xf32>, vector<24x256xf32> -> vector<24x256xf32>
    %97 = arith.addf %1, %96 : vector<24x256xf32>
    %c0_19 = arith.constant 0 : index
    %c0_20 = arith.constant 0 : index
    %98 = vector.load %arg5[%c0_19, %c0_20] : memref<24x1xf32, #tpu.memory_space<vmem>>, vector<24x1xf32>
    %99 = vector.broadcast %98 : vector<24x1xf32> to vector<24x256xf32>
    %100 = arith.addf %97, %99 : vector<24x256xf32>
    %c0_21 = arith.constant 0 : index
    %c0_22 = arith.constant 0 : index
    %c0_23 = arith.constant 0 : index
    %101 = vector.load %arg7[%c0_21, %c0_22, %c0_23] : memref<1x24x256xf32, #tpu.memory_space<vmem>>, vector<1x24x256xf32>
    %102 = vector.shape_cast %101 : vector<1x24x256xf32> to vector<24x256xf32>
    %103 = vector.shape_cast %100 : vector<24x256xf32> to vector<1x24x256xf32>
    tpu.vector_store %arg7[%c0_21, %c0_22, %c0_23], %103 {strides = array<i32>} : memref<1x24x256xf32, #tpu.memory_space<vmem>>, vector<1x24x256xf32>,
    return
  }
  func.func @transform_0(%arg0: i32, %arg1: i32) -> (i32, i32) {
    %c0_i32 = arith.constant 0 : i32
    %c0_i32_0 = arith.constant 0 : i32
    %c0_i32_1 = arith.constant 0 : i32
    return %c0_i32, %c0_i32_0 : i32, i32
  }
  func.func @transform_1(%arg0: i32, %arg1: i32) -> (i32, i32) {
    %c0_i32 = arith.constant 0 : i32
    %c0_i32_0 = arith.constant 0 : i32
    %c0_i32_1 = arith.constant 0 : i32
    return %c0_i32, %c0_i32_0 : i32, i32
  }
  func.func @transform_2(%arg0: i32, %arg1: i32) -> (i32, i32) {
    %c0_i32 = arith.constant 0 : i32
    %c0_i32_0 = arith.constant 0 : i32
    %c0_i32_1 = arith.constant 0 : i32
    return %c0_i32, %c0_i32_0 : i32, i32
  }
  func.func @transform_3(%arg0: i32, %arg1: i32) -> (i32, i32) {
    %c0_i32 = arith.constant 0 : i32
    %c0_i32_0 = arith.constant 0 : i32
    %c0_i32_1 = arith.constant 0 : i32
    return %c0_i32, %c0_i32_0 : i32, i32
  }
  func.func @transform_4(%arg0: i32, %arg1: i32) -> (i32, i32, i32) {
    %c0_i32 = arith.constant 0 : i32
    %c0_i32_0 = arith.constant 0 : i32
    return %arg0, %c0_i32, %arg1 : i32, i32, i32
  }
  func.func @transform_5(%arg0: i32, %arg1: i32) -> (i32, i32, i32) {
    %c0_i32 = arith.constant 0 : i32
    %c0_i32_0 = arith.constant 0 : i32
    return %arg0, %c0_i32, %arg1 : i32, i32, i32
  }
}

</mosaic_0001>

<bundles_post_ra>
// kernel: tpu_custom_call.1
= control target key start
LH: loop header
LB: loop body
LE: loop exit
PB: predicated region body
PF: predicated region fallthrough
CT: control target
= control target key end

     0   :  { %10 = vsyncpa [#allocation4], 0  ;;  %s5784_s0 = inlined_call_operand.vmem [shape: f32[168,24], index: 0, kind: input, shape index: {}]   ;;  %s5785_s1 = inlined_call_operand.vmem [shape: f32[72,72], index: 1, kind: input, shape index: {}]   ;;  %s5786_s2 = inlined_call_operand.vmem [shape: f32[24,24], index: 2, kind: input, shape index: {}]   ;;  %s5787_s3 = inlined_call_operand.vmem [shape: f32[24,1], index: 3, kind: input, shape index: {}]   ;;  %s5788_s4 = inlined_call_operand.vmem [shape: f32[2,24,256], index: 4, kind: input, shape index: {}]   ;;  %s5789_s5 = inlined_call_operand.hbm [shape: f32[2,24,256], index: 5, kind: output, shape index: {}]  }
   0x1   :  { %12 = vsyncpa [#allocation4 + $0x1], 0  ;;  %s3982_s18 = smov 0   ;;  %s3984_s19 = smov 0  }
   0x2   :  { %s3986_s20 = smov 0   ;;  %s3988_s21 = smov 0  }
   0x3   :  { %s3990_s22 = smov 0   ;;  %s3992_s23 = smov 0  }
   0x4 LB: > { %s3743_s24 = sadd.s32 4294967295, %s3947_s23   ;;  %s3744_s25 = sadd.s32 4294967294, %s3947_s23   ;;  %s3947_s23 = sphi %s3992_s23, %s18_s23   ;;  %s3943_s22 = sphi %s3990_s22, %s6022_s22   ;;  %s3939_s21 = sphi %s3988_s21, %s6021_s21   ;;  %s3935_s20 = sphi %s3986_s20, %s6020_s20   ;;  %s3931_s19 = sphi %s3984_s19, %s6019_s19   ;;  %s3927_s18 = sphi %s3982_s18, %s6018_s18  }
   0x5   : > { %s30_s26 = sadd.s32 1, %s3943_s22  ;;  %s151_s27 = sadd.s32 1, %s3935_s20 }
   0x6   : > { %p32_p0 = scmp.ge.s32.totalorder %s30_s26, 2  ;;  %p161_p1 = scmp.ne.s32.totalorder %s3935_s20, %s3931_s19 }
   0x7   : > { %p162_p2 = scmp.eq.s32.totalorder %s3743_s24, 1  ;;  %p167_p3 = scmp.ne.s32.totalorder %s3931_s19, %s3927_s18 }
   0x8   : > { %s6024_s26 = smov (%p32_p0, %s30_s26), 0  ;;  %p168_p5 = scmp.eq.s32.totalorder %s3744_s25, 1 }
   0x9   : > { %p4022_p4 = por %p162_p2, %p161_p1  ;;  %s146_s29 = ssub.s32 %s3943_s22, %s6024_s26 }
   0xa   : > { %p3747_p6 = scmp.ge.s32.totalorder %s3947_s23, 1  ;;  %p149_p7 = scmp.eq.s32.totalorder %s146_s29, 0 }
   0xb   : > { %p4029_p8 = por %p168_p5, %p167_p3  ;;  %p211_p9 = scmp.lt.s32.totalorder %s3947_s23, 3 }
   0xc   : > { %s4035_s6 = scalar_select %p149_p7, %s3935_s20, %s151_s27  }
   0xd   : > { %p212_p10 = pnand %p3747_p6, %p211_p9 }
   0xf   : > { %215 = sbr.rel (%p212_p10) target bundleno = 1181 (0x49d), region = 40 }
  0x14   : > { %p244_p11 = scmp.lt.s32.totalorder %s3939_s21, 1  ;;  %v260_v0 = vld [vmem:[%s5784_s0] sm:$0xff]  ;;  %vm281_vm0 = vcmask 195584   ;;  %v261_v1 = vld [vmem:[%s5784_s0 + $0x8] sm:$0xff]  ;;  %v262_v7 = vld [vmem:[%s5784_s0 + $0x10] sm:$0xff]  ;;  %vm1956_vm1 = vcmask 588800  }
  0x15   : > { %v283_v2 = vsel %vm281_vm0, %v260_v0, 0  ;;  %v286_v3 = vsel %vm281_vm0, %v261_v1, 0  ;;  %v289_v13 = vsel %vm281_vm0, %v262_v7, 0  ;;  %v263_v27 = vld [vmem:[%s5784_s0 + $0x18] sm:$0xff]  ;;  %v264_v40 = vld [vmem:[%s5784_s0 + $0x20] sm:$0xff]  ;;  %v265_v47 = vld [vmem:[%s5784_s0 + $0x28] sm:$0xff] }
  0x16   : > { %s245_s11 = scalar_select %p244_p11, %s3939_s21, 1  ;;  %v4047_v4 = vand.u32 4294901760, %v283_v2  ;;  %v4049_v5 = vand.u32 4294901760, %v286_v3  ;;  %v4079_v23 = vand.u32 4294901760, %v289_v13  ;;  %v292_v35 = vsel %vm281_vm0, %v263_v27, 0  ;;  %v266_v54 = vld [vmem:[%s5784_s0 + $0x30] sm:$0xff] }
  0x17   : > { %v4098_v39 = vand.u32 4294901760, %v292_v35  ;;  %v295_v43 = vsel %vm281_vm0, %v264_v40, 0  ;;  %v298_v50 = vsel %vm281_vm0, %v265_v47, 0  ;;  %v301_v58 = vsel %vm281_vm0, %v266_v54, 0  ;;  %v267_v1 = vld [vmem:[%s5784_s0 + $0x38] sm:$0xff]  ;;  %s240_s13 = sand.u32 1, %s3931_s19  }
  0x18   : > { %s3753_s12 = smul.u32 48, %s245_s11  ;;  %v4052_v6 = vsub.f32 %v283_v2, %v4047_v4  ;;  %v4069_v12 = vsub.f32 %v286_v3, %v4049_v5  ;;  %v4088_v32 = vsub.f32 %v289_v13, %v4079_v23  ;;  %v4118_v46 = vand.u32 4294901760, %v295_v43  ;;  %v271_v47 = vld [vmem:[%s5784_s0 + $0x58] sm:$0xff] }
  0x19   : > { %v4108_v42 = vsub.f32 %v292_v35, %v4098_v39  ;;  %v4138_v53 = vand.u32 4294901760, %v298_v50  ;;  %v4166_v63 = vand.u32 4294901760, %v301_v58  ;;  %v316_v54 = vsel %vm281_vm0, %v271_v47, 0  ;;  %s3752_s14 = smul.u32 48, %s240_s13 }
  0x1a   : > { %s4060_s17 = scalar_lea.vmem %s5788_s4, %s3753_s12  ;;  %v4063_v8 = vand.u32 4294901760, %v4052_v6  ;;  %v4077_v22 = vand.u32 4294901760, %v4069_v12  ;;  %5857 = vst [vmem:[#allocation7_spill] sm:$0xff] %v4088_v32  ;;  %v4096_v38 = vand.u32 4294901760, %v4088_v32  ;;  %v4128_v49 = vsub.f32 %v295_v43, %v4118_v46  ;;  %s3754_s16 = smul.u32 48, %s3939_s21 }
  0x1b   : > { %v258_v9 = vld [vmem:[%s4060_s17 + $0x20] sm:$0xff]  ;;  %v256_v10 = vld [vmem:[%s4060_s17 + $0x10] sm:$0xff]  ;;  %5859 = vst [vmem:[#allocation9_spill] sm:$0xff] %v4108_v42  ;;  %v4116_v45 = vand.u32 4294901760, %v4108_v42  ;;  %v4148_v56 = vsub.f32 %v298_v50, %v4138_v53  ;;  %v259_v57 = vld [vmem:[%s4060_s17 + $0x28] sm:$0xff]  ;;  %v4181_v7 = vsub.f32 %v301_v58, %v4166_v63  ;;  %v4271_v58 = vand.u32 4294901760, %v316_v54 }
  0x1c   : > { %v254_v11 = vld [vmem:[%s4060_s17] sm:$0xff]  ;;  %v358_v14 = vand.u32 4294901760, %v258_v9  ;;  %v360_v15 = vand.u32 4294901760, %v256_v10  ;;  %v367_v17 = vsub.f32 %v4052_v6, %v4063_v8  ;;  %5856 = vst [vmem:[#allocation6_spill] sm:$0xff] %v4077_v22  ;;  %v375_v31 = vsub.f32 %v4069_v12, %v4077_v22  ;;  %s5732_s15 = scalar_lea.vmem [#allocation3], %s3752_s14  ;;  %s3660_s27 = scalar_lea.hbm %s5789_s5, %s3754_s16 }
  0x1d   : > { %v362_v16 = vand.u32 4294901760, %v254_v11  ;;  %5858 = vst [vmem:[#allocation8_spill] sm:$0xff] %v4096_v38  ;;  %v383_v41 = vsub.f32 %v4088_v32, %v4096_v38  ;;  %v391_v48 = vsub.f32 %v4108_v42, %v4116_v45  ;;  %v4136_v52 = vand.u32 4294901760, %v4128_v49  ;;  %s3661_s29 = sshll.u32 %s5732_s15, 4  ;;  %s3663_s7 = sshll.u32 %s3660_s27, 4  ;;  %s3662_s29 = int_to_ptr.vmem [resolvable:$true] %s3661_s29  ;;  %s3664_s7 = int_to_ptr.hbm [resolvable:$true] %s3663_s7 }
  0x1e   : > { %359 = vmatpush.msra.mxu0 %v358_v14  ;;  %v547_v18 = vsub.f32 %v258_v9, %v358_v14  ;;  %791 = vmatpush.msra.mxu3 %v358_v14  ;;  %v553_v19 = vsub.f32 %v256_v10, %v360_v15  ;;  %v4074_v21 = vand.u32 4294901760, %v367_v17  ;;  %v4093_v37 = vand.u32 4294901760, %v375_v31  ;;  %5860 = vst [vmem:[#allocation10_spill] sm:$0xff] %v4116_v45  ;;  %s3647_s21 = scalar_lea.sflag [#allocation4], %s240_s13  ;;  %s3883_s8 = sshra.s32 %s3664_s7, 4  ;;  %s3884_s8 = int_to_ptr.hbm [resolvable:$true] %s3883_s8 }
  0x1f   : > { %v559_v20 = vsub.f32 %v254_v11, %v362_v16  ;;  %v4113_v44 = vand.u32 4294901760, %v383_v41  ;;  %5861 = vst [vmem:[#allocation11_spill] sm:$0xff] %v4128_v49  ;;  %v4133_v51 = vand.u32 4294901760, %v391_v48  ;;  %v399_v55 = vsub.f32 %v4128_v49, %v4136_v52  ;;  %s3885_s9 = scalar_lea.hbm %s3884_s8, 48  ;;  %s3889_s12 = scalar_lea.hbm %s5789_s5, 96 }
  0x20   : > { %361 = vmatpush.msra.mxu0 %v360_v15  ;;  %664 = vmatpush.msra.mxu2 %v547_v18  ;;  %v548_v24 = vand.u32 4294901760, %v547_v18  ;;  %v554_v25 = vand.u32 4294901760, %v553_v19  ;;  %5862 = vst [vmem:[#allocation12_spill] sm:$0xff] %v4136_v52  ;;  %v4153_v59 = vand.u32 4294901760, %v259_v57  ;;  %v4164_v62 = vand.u32 4294901760, %v4148_v56  ;;  %p3886_p12 = scmp.ne.s32.totalorder %s3884_s8, %s3885_s9  ;;  %p3890_p1 = scmp.lt.s32.totalorder %s3884_s8, %s5789_s5 }
  0x21   : > { %v560_v26 = vand.u32 4294901760, %v559_v20  ;;  %793 = vmatpush.msra.mxu3 %v360_v15  ;;  %5863 = vst [vmem:[#allocation13_spill] sm:$0xff] %v4148_v56  ;;  %v4161_v61 = vand.u32 4294901760, %v399_v55  ;;  %v304_v9 = vsel %vm281_vm0, %v267_v1, 0  ;;  %v4189_v13 = vand.u32 4294901760, %v4181_v7  ;;  %v272_v1 = vld [vmem:[%s5784_s0 + $0x60] sm:$0xff]  ;;  %p3891_p2 = scmp.lt.s32.totalorder %s3889_s12, %s3885_s9 }
  0x22   : > { %363 = vmatpush.msra.mxu0 %v362_v16  ;;  %667 = vmatpush.msra.mxu2 %v553_v19  ;;  %v549_v28 = vsub.f32 %v547_v18, %v548_v24  ;;  %v555_v29 = vsub.f32 %v553_v19, %v554_v25  ;;  %v4158_v60 = vsub.f32 %v259_v57, %v4153_v59  ;;  %p3887_p13 = pnand %p3886_p12, %p4022_p4 }
  0x23   : > { %v561_v30 = vsub.f32 %v559_v20, %v560_v26  ;;  %369 = vmatmul.f32.vlgmr.msra.gmra.mxu0 %v4074_v21  ;;  %795 = vmatpush.msra.mxu3 %v362_v16  ;;  %5864 = vst [vmem:[#allocation14_spill] sm:$0xff] %v4164_v62  ;;  %v407_v3 = vsub.f32 %v4148_v56, %v4164_v62  ;;  %p3892_p3 = por %p3891_p2, %p3890_p1 }
  0x24   : > { %v550_v33 = vand.u32 4294901760, %v549_v28  ;;  %670 = vmatpush.msra.mxu2 %v559_v20  ;;  %799 = vmatmul.f32.vlgmr.msra.gmra.mxu3 %v4063_v8  ;;  %v556_v34 = vand.u32 4294901760, %v555_v29  ;;  %v5790_v0 = vand.u32 4294901760, %v4158_v60  ;;  %5865 = vst [vmem:[#allocation15_spill] sm:$0xff] %v4181_v7  ;;  %p3888_p0 = pneg %p3887_p13 }
  0x25   : > { %673 = vmatmul.f32.vlgmr.msra.gmra.mxu2 %v4052_v6  ;;  %939 = vmatpush.msrb.mxu0 %v548_v24  ;;  %v562_v36 = vand.u32 4294901760, %v561_v30  ;;  %v4186_v11 = vand.u32 4294901760, %v407_v3  ;;  %5866 = vst [vmem:[#allocation16_spill] sm:$0xff] %v4189_v13  ;;  %v4281_v3 = vsub.f32 %v316_v54, %v4271_v58 }
  0x26   : > { %551 = vmatpush.msra.mxu1 %v550_v33  ;;  %1151 = vmatpush.msrb.mxu2 %v4153_v59  ;;  %v1341_v2 = vsub.f32 %v4158_v60, %v5790_v0  ;;  %v270_v33 = vld [vmem:[%s5784_s0 + $0x50] sm:$0xff]  ;;  %p3893_p5 = pnand %p3892_p3, %p3888_p0 }
  0x27   : > { %943 = vmatpush.msrb.mxu0 %v554_v25  ;;  %v269_v25 = vld [vmem:[%s5784_s0 + $0x48] sm:$0xff]  ;;  %5875 = vst [vmem:[#allocation25_spill] sm:$0xff] %v4281_v3 }
  0x28   : > { %557 = vmatpush.msra.mxu1 %v556_v34  ;;  %v1342_v10 = vand.u32 4294901760, %v1341_v2  ;;  %v310_v28 = vsel %vm281_vm0, %v269_v25, 0 }
  0x29   : > { %947 = vmatpush.msrb.mxu0 %v560_v26  ;;  %v4231_v31 = vand.u32 4294901760, %v310_v28 }
  0x2a   : > { %563 = vmatpush.msra.mxu1 %v562_v36  ;;  %1343 = vmatpush.msrb.mxu3 %v1342_v10  ;;  %v313_v36 = vsel %vm281_vm0, %v270_v33, 0 }
  0x2b   : > { %377 = vmatmul.f32.gmra.mxu0 %v4093_v37  ;;  %565 = vmatmul.f32.vlgmr.msra.gmra.mxu1 %v4047_v4  ;;  %v4241_v35 = vsub.f32 %v310_v28, %v4231_v31  ;;  %v4251_v43 = vand.u32 4294901760, %v313_v36  ;;  %v257_v28 = vld [vmem:[%s4060_s17 + $0x18] sm:$0xff] }
  0x2c   : > { %805 = vmatmul.f32.gmra.mxu3 %v4077_v22  ;;  %1047 = vmatpush.msrb.mxu1 %v358_v14  ;;  %v4191_v14 = vand.u32 4294901760, %v304_v9 }
  0x2d   : > { %678 = vmatmul.f32.gmra.mxu2 %v4069_v12  ;;  %1456 = vmatpush.msra.mxu0 %v4158_v60  ;;  %5871 = vst [vmem:[#allocation21_spill] sm:$0xff] %v4241_v35  ;;  %v4249_v41 = vand.u32 4294901760, %v4241_v35  ;;  %v4261_v50 = vsub.f32 %v313_v36, %v4251_v43 }
  0x2e   : > { %1049 = vmatpush.msrb.mxu1 %v360_v15  ;;  %v268_v15 = vld [vmem:[%s5784_s0 + $0x40] sm:$0xff]  ;;  %v4201_v17 = vsub.f32 %v304_v9, %v4191_v14  ;;  %v319_v9 = vsel %vm281_vm0, %v272_v1, 0 }
  0x2f   : > { %v307_v18 = vsel %vm281_vm0, %v268_v15, 0  ;;  %5872 = vst [vmem:[#allocation22_spill] sm:$0xff] %v4249_v41  ;;  %v439_v48 = vsub.f32 %v4241_v35, %v4249_v41  ;;  %v4269_v57 = vand.u32 4294901760, %v4261_v50  ;;  %v4289_v15 = vand.u32 4294901760, %v4281_v3 }
  0x30   : > { %1051 = vmatpush.msrb.mxu1 %v362_v16  ;;  %v415_v16 = vsub.f32 %v4181_v7, %v4189_v13  ;;  %5867 = vst [vmem:[#allocation17_spill] sm:$0xff] %v4201_v17  ;;  %v4209_v20 = vand.u32 4294901760, %v4201_v17  ;;  %v4211_v24 = vand.u32 4294901760, %v307_v18 }
  0x31   : > { %5873 = vst [vmem:[#allocation23_spill] sm:$0xff] %v4261_v50  ;;  %v4266_v55 = vand.u32 4294901760, %v439_v48  ;;  %v447_v2 = vsub.f32 %v4261_v50, %v4269_v57  ;;  %v455_v25 = vsub.f32 %v4281_v3, %v4289_v15 }
  0x32   : > { %1583 = vmatpush.msra.mxu1 %v4153_v59  ;;  %v4206_v19 = vand.u32 4294901760, %v415_v16  ;;  %5868 = vst [vmem:[#allocation18_spill] sm:$0xff] %v4209_v20  ;;  %v423_v26 = vsub.f32 %v4201_v17, %v4209_v20  ;;  %v4221_v27 = vsub.f32 %v307_v18, %v4211_v24  ;;  %v4291_v16 = vand.u32 4294901760, %v319_v9  ;;  %v273_v18 = vld [vmem:[%s5784_s0 + $0x68] sm:$0xff] }
  0x33   : > { %385 = vmatmul.f32.gmra.mxu0 %v4113_v44  ;;  %569 = vmatmul.f32.gmra.mxu1 %v4049_v5  ;;  %5874 = vst [vmem:[#allocation24_spill] sm:$0xff] %v4269_v57  ;;  %v4286_v10 = vand.u32 4294901760, %v447_v2  ;;  %v322_v33 = vsel %vm281_vm0, %v273_v18, 0  ;;  %v4314_v47 = vand.u32 4294901760, %v455_v25  ;;  %v274_v2 = vld [vmem:[%s5784_s0 + $0x70] sm:$0xff] }
  0x34   : > { %811 = vmatmul.f32.gmra.mxu3 %v4096_v38  ;;  %5869 = vst [vmem:[#allocation19_spill] sm:$0xff] %v4221_v27  ;;  %v4226_v29 = vand.u32 4294901760, %v423_v26  ;;  %v4229_v30 = vand.u32 4294901760, %v4221_v27  ;;  %v4301_v26 = vsub.f32 %v319_v9, %v4291_v16  ;;  %v4319_v54 = vand.u32 4294901760, %v322_v33 }
  0x35   : > { %683 = vmatmul.f32.gmra.mxu2 %v4088_v32  ;;  %5876 = vst [vmem:[#allocation26_spill] sm:$0xff] %v4289_v15 }
  0x36   : > { %5870 = vst [vmem:[#allocation20_spill] sm:$0xff] %v4229_v30  ;;  %v431_v34 = vsub.f32 %v4221_v27, %v4229_v30  ;;  %v4317_v48 = vand.u32 4294901760, %v4301_v26  ;;  %v4334_v25 = vsub.f32 %v322_v33, %v4319_v54  ;;  %v275_v33 = vld [vmem:[%s5784_s0 + $0x78] sm:$0xff] }
  0x37   : > { %5877 = vst [vmem:[#allocation27_spill] sm:$0xff] %v4301_v26 }
  0x38   : > { %v4246_v40 = vand.u32 4294901760, %v431_v34  ;;  %v4306_v34 = vand.u32 4294901760, %v257_v28  ;;  %5878 = vst [vmem:[#allocation28_spill] sm:$0xff] %v4317_v48  ;;  %v463_v18 = vsub.f32 %v4301_v26, %v4317_v48 }
  0x39   : > { %5879 = vst [vmem:[#allocation29_spill] sm:$0xff] %v4334_v25 }
  0x3a   : > { %1153 = vmatpush.msrb.mxu2 %v4306_v34  ;;  %v4311_v36 = vsub.f32 %v257_v28, %v4306_v34  ;;  %1585 = vmatpush.msra.mxu1 %v4306_v34  ;;  %v325_v28 = vsel %vm281_vm0, %v274_v2, 0 }
  0x3b   : > { %393 = vmatmul.f32.gmra.mxu0 %v4133_v51  ;;  %573 = vmatmul.f32.gmra.mxu1 %v4079_v23 }
  0x3c   : > { %817 = vmatmul.f32.gmra.mxu3 %v4116_v45  ;;  %v5792_v1 = vand.u32 4294901760, %v4311_v36  ;;  %1459 = vmatpush.msra.mxu0 %v4311_v36 }
  0x3d   : > { %688 = vmatmul.f32.gmra.mxu2 %v4108_v42 }
  0x3e   : > { %v1347_v9 = vsub.f32 %v4311_v36, %v5792_v1  ;;  %v4342_v1 = vand.u32 4294901760, %v4334_v25 }
  0x40   : > { %v1348_v0 = vand.u32 4294901760, %v1347_v9  ;;  %5880 = vst [vmem:[#allocation30_spill] sm:$0xff] %v4342_v1  ;;  %v471_v2 = vsub.f32 %v4334_v25, %v4342_v1  ;;  %v328_v9 = vsel %vm281_vm0, %v275_v33, 0 }
  0x42   : > { %1349 = vmatpush.msrb.mxu3 %v1348_v0 }
  0x43   : > { %401 = vmatmul.f32.gmra.mxu0 %v4161_v61  ;;  %577 = vmatmul.f32.gmra.mxu1 %v4098_v39 }
  0x44   : > { %823 = vmatmul.f32.gmra.mxu3 %v4136_v52 }
  0x45   : > { %693 = vmatmul.f32.gmra.mxu2 %v4128_v49 }
  0x4b   : > { %409 = vmatmul.f32.gmra.mxu0 %v4186_v11  ;;  %581 = vmatmul.f32.gmra.mxu1 %v4118_v46 }
  0x4c   : > { %829 = vmatmul.f32.gmra.mxu3 %v4164_v62  ;;  %v279_v62 = vld [vmem:[%s5784_s0 + $0x98] sm:$0xff] }
  0x4d   : > { %698 = vmatmul.f32.gmra.mxu2 %v4148_v56 }
  0x53   : > { %417 = vmatmul.f32.gmra.mxu0 %v4206_v19  ;;  %585 = vmatmul.f32.gmra.mxu1 %v4138_v53 }
  0x54   : > { %835 = vmatmul.f32.gmra.mxu3 %v4189_v13 }
  0x55   : > { %703 = vmatmul.f32.gmra.mxu2 %v4181_v7 }
  0x5b   : > { %425 = vmatmul.f32.gmra.mxu0 %v4226_v29  ;;  %589 = vmatmul.f32.gmra.mxu1 %v4166_v63 }
  0x5c   : > { %841 = vmatmul.f32.gmra.mxu3 %v4209_v20 }
  0x5d   : > { %708 = vmatmul.f32.gmra.mxu2 %v4201_v17 }
  0x63   : > { %433 = vmatmul.f32.gmra.mxu0 %v4246_v40  ;;  %593 = vmatmul.f32.gmra.mxu1 %v4191_v14 }
  0x64   : > { %847 = vmatmul.f32.gmra.mxu3 %v4229_v30 }
  0x65   : > { %713 = vmatmul.f32.gmra.mxu2 %v4221_v27  ;;  %v278_v27 = vld [vmem:[%s5784_s0 + $0x90] sm:$0xff] }
  0x6b   : > { %441 = vmatmul.f32.gmra.mxu0 %v4266_v55  ;;  %597 = vmatmul.f32.gmra.mxu1 %v4211_v24 }
  0x6c   : > { %853 = vmatmul.f32.gmra.mxu3 %v4249_v41  ;;  %v4344_v41 = vand.u32 4294901760, %v325_v28 }
  0x6d   : > { %718 = vmatmul.f32.gmra.mxu2 %v4241_v35  ;;  %v277_v35 = vld [vmem:[%s5784_s0 + $0x88] sm:$0xff] }
  0x6e   : > { %v4354_v0 = vsub.f32 %v325_v28, %v4344_v41 }
  0x70   : > { %5881 = vst [vmem:[#allocation31_spill] sm:$0xff] %v4354_v0 }
  0x73   : > { %449 = vmatmul.f32.gmra.mxu0 %v4286_v10  ;;  %601 = vmatmul.f32.gmra.mxu1 %v4231_v31 }
  0x74   : > { %859 = vmatmul.f32.gmra.mxu3 %v4269_v57  ;;  %v4339_v57 = vand.u32 4294901760, %v463_v18  ;;  %v4359_v18 = vand.u32 4294901760, %v471_v2 }
  0x75   : > { %723 = vmatmul.f32.gmra.mxu2 %v4261_v50  ;;  %v276_v50 = vld [vmem:[%s5784_s0 + $0x80] sm:$0xff] }
  0x76   : > { %v331_v2 = vsel %vm281_vm0, %v276_v50, 0 }
  0x77   : > { %v4384_v30 = vand.u32 4294901760, %v331_v2 }
  0x7b   : > { %457 = vmatmul.f32.gmra.mxu0 %v4314_v47  ;;  %605 = vmatmul.f32.gmra.mxu1 %v4251_v43 }
  0x7c   : > { %865 = vmatmul.f32.gmra.mxu3 %v4289_v15  ;;  %v4362_v15 = vand.u32 4294901760, %v4354_v0 }
  0x7d   : > { %728 = vmatmul.f32.gmra.mxu2 %v4281_v3  ;;  %v4364_v3 = vand.u32 4294901760, %v328_v9 }
  0x7e   : > { %5882 = vst [vmem:[#allocation32_spill] sm:$0xff] %v4362_v15  ;;  %v479_v28 = vsub.f32 %v4354_v0, %v4362_v15 }
  0x7f   : > { %v4374_v33 = vsub.f32 %v328_v9, %v4364_v3  ;;  %v4394_v9 = vsub.f32 %v331_v2, %v4384_v30 }
  0x81   : > { %5883 = vst [vmem:[#allocation33_spill] sm:$0xff] %v4374_v33 }
  0x82   : > { %5885 = vst [vmem:[#allocation35_spill] sm:$0xff] %v4394_v9 }
  0x83   : > { %465 = vmatmul.f32.gmra.mxu0 %v4339_v57  ;;  %609 = vmatmul.f32.gmra.mxu1 %v4271_v58 }
  0x84   : > { %871 = vmatmul.f32.gmra.mxu3 %v4317_v48  ;;  %v4379_v48 = vand.u32 4294901760, %v479_v28  ;;  %v334_v28 = vsel %vm281_vm0, %v277_v35, 0 }
  0x85   : > { %733 = vmatmul.f32.gmra.mxu2 %v4301_v26  ;;  %v4382_v26 = vand.u32 4294901760, %v4374_v33  ;;  %v4404_v20 = vand.u32 4294901760, %v334_v28 }
  0x87   : > { %5884 = vst [vmem:[#allocation34_spill] sm:$0xff] %v4382_v26  ;;  %v487_v50 = vsub.f32 %v4374_v33, %v4382_v26  ;;  %v4414_v2 = vsub.f32 %v334_v28, %v4404_v20 }
  0x88   : > { %5887 = vst [vmem:[#allocation37_spill] sm:$0xff] %v4404_v20 }
  0x89   : > { %5888 = vst [vmem:[#allocation38_spill] sm:$0xff] %v4414_v2 }
  0x8b   : > { %473 = vmatmul.f32.gmra.mxu0 %v4359_v18  ;;  %613 = vmatmul.f32.gmra.mxu1 %v4291_v16 }
  0x8c   : > { %877 = vmatmul.f32.gmra.mxu3 %v4342_v1  ;;  %v4399_v1 = vand.u32 4294901760, %v487_v50  ;;  %v337_v50 = vsel %vm281_vm0, %v278_v27, 0 }
  0x8d   : > { %738 = vmatmul.f32.gmra.mxu2 %v4334_v25  ;;  %v4402_v25 = vand.u32 4294901760, %v4394_v9  ;;  %v4424_v13 = vand.u32 4294901760, %v337_v50 }
  0x8f   : > { %5886 = vst [vmem:[#allocation36_spill] sm:$0xff] %v4402_v25  ;;  %v495_v35 = vsub.f32 %v4394_v9, %v4402_v25  ;;  %v4434_v28 = vsub.f32 %v337_v50, %v4424_v13  ;;  %v5894_v50 = vand.u32 4294901760, %v4158_v60 }
  0x90   : > { %5890 = vst [vmem:[#allocation40_spill] sm:$0xff] %v4424_v13 }
  0x91   : > { %5891 = vst [vmem:[#allocation41_spill] sm:$0xff] %v4434_v28  ;;  %v4443_v45 = vand.u32 4294901760, %v4434_v28 }
  0x93   : > { %481 = vmatmul.f32.gmra.mxu0 %v4379_v48  ;;  %617 = vmatmul.f32.gmra.mxu1 %v4319_v54  ;;  %5892 = vst [vmem:[#allocation42_spill] sm:$0xff] %v4443_v45  ;;  %v511_v60 = vsub.f32 %v4434_v28, %v4443_v45 }
  0x94   : > { %883 = vmatmul.f32.gmra.mxu3 %v4362_v15  ;;  %v4419_v15 = vand.u32 4294901760, %v495_v35  ;;  %v255_v35 = vld [vmem:[%s4060_s17 + $0x8] sm:$0xff] }
  0x95   : > { %743 = vmatmul.f32.gmra.mxu2 %v4354_v0  ;;  %v4422_v0 = vand.u32 4294901760, %v4414_v2 }
  0x97   : > { %5889 = vst [vmem:[#allocation39_spill] sm:$0xff] %v4422_v0  ;;  %v503_v27 = vsub.f32 %v4414_v2, %v4422_v0 }
  0x99   : > { %v4440_v56 = vand.u32 4294901760, %v503_v27  ;;  %v5895_v27 = vand.u32 4294901760, %v4311_v36 }
  0x9b   : > { %489 = vmatmul.f32.gmra.mxu0 %v4399_v1  ;;  %621 = vmatmul.f32.gmra.mxu1 %v4344_v41 }
  0x9c   : > { %889 = vmatmul.f32.gmra.mxu3 %v4382_v26  ;;  %v340_v26 = vsel %vm281_vm0, %v279_v62, 0 }
  0x9d   : > { %748 = vmatmul.f32.gmra.mxu2 %v4374_v33  ;;  %v1154_v33 = vand.u32 4294901760, %v255_v35  ;;  %v4445_v49 = vand.u32 4294901760, %v340_v26 }
  0x9f   : > { %1155 = vmatpush.msrb.mxu2 %v1154_v33  ;;  %v1351_v7 = vsub.f32 %v255_v35, %v1154_v33  ;;  %1587 = vmatpush.msra.mxu1 %v1154_v33  ;;  %5893 = vst [vmem:[#allocation43_spill] sm:$0xff] %v4445_v49  ;;  %v280_v35 = vld [vmem:[%s5784_s0 + $0xa0] sm:$0xff] }
  0xa0   : > { %v370_v17 = vpop.f32.mrf.mxu0 }
  0xa1   : > { %1731 = vmatpush.msra.mxu2 %v5894_v50  ;;  %v1352_v62 = vand.u32 4294901760, %v1351_v7  ;;  %1462 = vmatpush.msra.mxu0 %v1351_v7  ;;  %v4459_v50 = vsub.f32 %v340_v26, %v4445_v49 }
  0xa3   : > { %497 = vmatmul.f32.gmra.mxu0 %v4419_v15  ;;  %625 = vmatmul.f32.gmra.mxu1 %v4364_v3  ;;  %v1353_v22 = vsub.f32 %v1351_v7, %v1352_v62  ;;  %5896 = vst [vmem:[#allocation44_spill] sm:$0xff] %v4459_v50  ;;  %v4466_v7 = vand.u32 4294901760, %v511_v60 }
  0xa4   : > { %895 = vmatmul.f32.gmra.mxu3 %v4402_v25  ;;  %1735 = vmatpush.msra.mxu2 %v5895_v27 }
  0xa5   : > { %753 = vmatmul.f32.gmra.mxu2 %v4394_v9 }
  0xa6   : > { %1739 = vmatpush.msra.mxu2 %v1352_v62 }
  0xa7   : > { %v800_v52 = vpop.f32.mrf.mxu3 }
  0xa8   : > { %v378_v25 = vpop.f32.mrf.mxu0  ;;  %v566_v38 = vpop.f32.mrf.mxu1 }
  0xa9   : > { %v567_v42 = vadd.f32 %v566_v38, %v370_v17  ;;  %v674_v9 = vpop.f32.mrf.mxu2  ;;  %v343_v38 = vsel %vm281_vm0, %v280_v35, 0  ;;  %v1354_v17 = vand.u32 4294901760, %v1353_v22 }
  0xaa   : > { %v4471_v27 = vand.u32 4294901760, %v343_v38 }
  0xab   : > { %v675_v32 = vadd.f32 %v674_v9, %v567_v42  ;;  %505 = vmatmul.f32.gmra.mxu0 %v4440_v56  ;;  %629 = vmatmul.f32.gmra.mxu1 %v4384_v30  ;;  %v4469_v9 = vand.u32 4294901760, %v4459_v50 }
  0xac   : > { %901 = vmatmul.f32.gmra.mxu3 %v4422_v0  ;;  %5898 = vst [vmem:[#allocation46_spill] sm:$0xff] %v4471_v27  ;;  %v4480_v62 = vsub.f32 %v343_v38, %v4471_v27 }
  0xad   : > { %v4463_v36 = vadd.f32 %v800_v52, %v675_v32  ;;  %758 = vmatmul.f32.gmra.mxu2 %v4414_v2  ;;  %1355 = vmatpush.msrb.mxu3 %v1354_v17  ;;  %5897 = vst [vmem:[#allocation45_spill] sm:$0xff] %v4469_v9  ;;  %v519_v52 = vsub.f32 %v4459_v50, %v4469_v9 }
  0xae   : > { %5899 = vst [vmem:[#allocation47_spill] sm:$0xff] %v4480_v62 }
  0xaf   : > { %v806_v42 = vpop.f32.mrf.mxu3  ;;  %1839 = vmatpush.msra.mxu3 %v4153_v59 }
  0xb0   : > { %v386_v26 = vpop.f32.mrf.mxu0  ;;  %v570_v0 = vpop.f32.mrf.mxu1 }
  0xb1   : > { %v571_v35 = vadd.f32 %v570_v0, %v378_v25  ;;  %v679_v22 = vpop.f32.mrf.mxu2  ;;  %1841 = vmatpush.msra.mxu3 %v4306_v34  ;;  %v4486_v34 = vand.u32 4294901760, %v519_v52  ;;  %v4489_v0 = vand.u32 4294901760, %v4480_v62 }
  0xb3   : > { %v680_v32 = vadd.f32 %v679_v22, %v571_v35  ;;  %513 = vmatmul.f32.gmra.mxu0 %v4466_v7  ;;  %633 = vmatmul.f32.gmra.mxu1 %v4404_v20  ;;  %5900 = vst [vmem:[#allocation48_spill] sm:$0xff] %v4489_v0  ;;  %v527_v38 = vsub.f32 %v4480_v62, %v4489_v0 }
  0xb4   : > { %907 = vmatmul.f32.gmra.mxu3 %v4443_v45 }
  0xb5   : > { %v4483_v59 = vadd.f32 %v806_v42, %v680_v32  ;;  %763 = vmatmul.f32.gmra.mxu2 %v4434_v28  ;;  %1843 = vmatpush.msra.mxu3 %v1154_v33  ;;  %v4499_v32 = vand.u32 4294901760, %v527_v38 }
  0xb7   : > { %v812_v25 = vpop.f32.mrf.mxu3 }
  0xb8   : > { %v394_v60 = vpop.f32.mrf.mxu0  ;;  %v574_v17 = vpop.f32.mrf.mxu1 }
  0xb9   : > { %v575_v35 = vadd.f32 %v574_v17, %v386_v26  ;;  %v684_v22 = vpop.f32.mrf.mxu2 }
  0xbb   : > { %v685_v2 = vadd.f32 %v684_v22, %v575_v35  ;;  %521 = vmatmul.f32.gmra.mxu0 %v4486_v34  ;;  %637 = vmatmul.f32.gmra.mxu1 %v4424_v13 }
  0xbc   : > { %913 = vmatmul.f32.gmra.mxu3 %v4469_v9 }
  0xbd   : > { %v4496_v33 = vadd.f32 %v812_v25, %v685_v2  ;;  %768 = vmatmul.f32.gmra.mxu2 %v4459_v50 }
  0xbf   : > { %v818_v42 = vpop.f32.mrf.mxu3 }
  0xc0   : > { %v402_v52 = vpop.f32.mrf.mxu0  ;;  %v578_v26 = vpop.f32.mrf.mxu1 }
  0xc1   : > { %v579_v17 = vadd.f32 %v578_v26, %v394_v60  ;;  %v689_v35 = vpop.f32.mrf.mxu2 }
  0xc3   : > { %v690_v22 = vadd.f32 %v689_v35, %v579_v17  ;;  %529 = vmatmul.f32.gmra.mxu0 %v4499_v32  ;;  %641 = vmatmul.f32.gmra.mxu1 %v4445_v49 }
  0xc4   : > { %919 = vmatmul.f32.gmra.mxu3 %v4489_v0 }
  0xc5   : > { %v4504_v45 = vadd.f32 %v818_v42, %v690_v22  ;;  %773 = vmatmul.f32.gmra.mxu2 %v4480_v62 }
  0xc7   : > { %v824_v2 = vpop.f32.mrf.mxu3 }
  0xc8   : > { %v410_v25 = vpop.f32.mrf.mxu0  ;;  %v582_v9 = vpop.f32.mrf.mxu1 }
  0xc9   : > { %v583_v38 = vadd.f32 %v582_v9, %v402_v52  ;;  %v694_v50 = vpop.f32.mrf.mxu2 }
  0xcb   : > { %v695_v28 = vadd.f32 %v694_v50, %v583_v38  ;;  %645 = vmatmul.f32.gmra.mxu1 %v4471_v27  ;;  %949 = vmatmul.f32.vlgmr.msrb.gmra.mxu0 %v4047_v4 }
  0xcc   : > { %1357 = vmatmul.f32.vlgmr.msrb.gmra.mxu3 %v4047_v4 }
  0xcd   : > { %v4510_v60 = vadd.f32 %v824_v2, %v695_v28  ;;  %1161 = vmatmul.f32.vlgmr.msrb.gmra.mxu2 %v4074_v21 }
  0xcf   : > { %v830_v42 = vpop.f32.mrf.mxu3 }
  0xd0   : > { %v418_v26 = vpop.f32.mrf.mxu0  ;;  %v586_v17 = vpop.f32.mrf.mxu1 }
  0xd1   : > { %v587_v35 = vadd.f32 %v586_v17, %v410_v25  ;;  %v699_v22 = vpop.f32.mrf.mxu2 }
  0xd3   : > { %v700_v0 = vadd.f32 %v699_v22, %v587_v35  ;;  %953 = vmatmul.f32.gmra.mxu0 %v4049_v5  ;;  %1053 = vmatmul.f32.vlgmr.msrb.gmra.mxu1 %v4047_v4 }
  0xd4   : > { %1361 = vmatmul.f32.gmra.mxu3 %v4049_v5 }
  0xd5   : > { %v4516_v50 = vadd.f32 %v830_v42, %v700_v0  ;;  %1169 = vmatmul.f32.gmra.mxu2 %v4093_v37 }
  0xd7   : > { %v836_v28 = vpop.f32.mrf.mxu3 }
  0xd8   : > { %v426_v9 = vpop.f32.mrf.mxu0  ;;  %v590_v52 = vpop.f32.mrf.mxu1 }
  0xd9   : > { %v591_v21 = vadd.f32 %v590_v52, %v418_v26  ;;  %v704_v2 = vpop.f32.mrf.mxu2 }
  0xdb   : > { %v705_v38 = vadd.f32 %v704_v2, %v591_v21  ;;  %957 = vmatmul.f32.gmra.mxu0 %v4079_v23  ;;  %1057 = vmatmul.f32.gmra.mxu1 %v4049_v5 }
  0xdc   : > { %1365 = vmatmul.f32.gmra.mxu3 %v4079_v23 }
  0xdd   : > { %v4522_v25 = vadd.f32 %v836_v28, %v705_v38  ;;  %1177 = vmatmul.f32.gmra.mxu2 %v4113_v44 }
  0xdf   : > { %v842_v0 = vpop.f32.mrf.mxu3 }
  0xe0   : > { %v434_v42 = vpop.f32.mrf.mxu0  ;;  %v594_v17 = vpop.f32.mrf.mxu1 }
  0xe1   : > { %v595_v37 = vadd.f32 %v594_v17, %v426_v9  ;;  %v709_v35 = vpop.f32.mrf.mxu2 }
  0xe3   : > { %v710_v22 = vadd.f32 %v709_v35, %v595_v37  ;;  %961 = vmatmul.f32.gmra.mxu0 %v4098_v39  ;;  %1061 = vmatmul.f32.gmra.mxu1 %v4079_v23 }
  0xe4   : > { %1369 = vmatmul.f32.gmra.mxu3 %v4098_v39 }
  0xe5   : > { %v4528_v26 = vadd.f32 %v842_v0, %v710_v22  ;;  %1185 = vmatmul.f32.gmra.mxu2 %v4133_v51 }
  0xe7   : > { %v848_v28 = vpop.f32.mrf.mxu3 }
  0xe8   : > { %v442_v52 = vpop.f32.mrf.mxu0  ;;  %v598_v21 = vpop.f32.mrf.mxu1 }
  0xe9   : > { %v599_v44 = vadd.f32 %v598_v21, %v434_v42  ;;  %v714_v2 = vpop.f32.mrf.mxu2 }
  0xeb   : > { %v715_v38 = vadd.f32 %v714_v2, %v599_v44  ;;  %965 = vmatmul.f32.gmra.mxu0 %v4118_v46  ;;  %1065 = vmatmul.f32.gmra.mxu1 %v4098_v39 }
  0xec   : > { %1373 = vmatmul.f32.gmra.mxu3 %v4118_v46 }
  0xed   : > { %v4534_v9 = vadd.f32 %v848_v28, %v715_v38  ;;  %1193 = vmatmul.f32.gmra.mxu2 %v4161_v61 }
  0xef   : > { %v854_v0 = vpop.f32.mrf.mxu3 }
  0xf0   : > { %v450_v17 = vpop.f32.mrf.mxu0  ;;  %v602_v37 = vpop.f32.mrf.mxu1 }
  0xf1   : > { %v603_v51 = vadd.f32 %v602_v37, %v442_v52  ;;  %v719_v35 = vpop.f32.mrf.mxu2 }
  0xf3   : > { %v720_v22 = vadd.f32 %v719_v35, %v603_v51  ;;  %969 = vmatmul.f32.gmra.mxu0 %v4138_v53  ;;  %1069 = vmatmul.f32.gmra.mxu1 %v4118_v46 }
  0xf4   : > { %1377 = vmatmul.f32.gmra.mxu3 %v4138_v53 }
  0xf5   : > { %v4540_v42 = vadd.f32 %v854_v0, %v720_v22  ;;  %1201 = vmatmul.f32.gmra.mxu2 %v4186_v11 }
  0xf7   : > { %v860_v28 = vpop.f32.mrf.mxu3 }
  0xf8   : > { %v458_v21 = vpop.f32.mrf.mxu0  ;;  %v606_v44 = vpop.f32.mrf.mxu1 }
  0xf9   : > { %v607_v61 = vadd.f32 %v606_v44, %v450_v17  ;;  %v724_v2 = vpop.f32.mrf.mxu2 }
  0xfb   : > { %v725_v38 = vadd.f32 %v724_v2, %v607_v61  ;;  %973 = vmatmul.f32.gmra.mxu0 %v4166_v63  ;;  %1073 = vmatmul.f32.gmra.mxu1 %v4138_v53 }
  0xfc   : > { %1381 = vmatmul.f32.gmra.mxu3 %v4166_v63 }
  0xfd   : > { %v4546_v52 = vadd.f32 %v860_v28, %v725_v38  ;;  %1209 = vmatmul.f32.gmra.mxu2 %v4206_v19 }
  0xff   : > { %v866_v0 = vpop.f32.mrf.mxu3 }
 0x100   : > { %v466_v37 = vpop.f32.mrf.mxu0  ;;  %v610_v51 = vpop.f32.mrf.mxu1 }
 0x101   : > { %v611_v11 = vadd.f32 %v610_v51, %v458_v21  ;;  %v729_v35 = vpop.f32.mrf.mxu2 }
 0x103   : > { %v730_v22 = vadd.f32 %v729_v35, %v611_v11  ;;  %977 = vmatmul.f32.gmra.mxu0 %v4191_v14  ;;  %1077 = vmatmul.f32.gmra.mxu1 %v4166_v63 }
 0x104   : > { %1385 = vmatmul.f32.gmra.mxu3 %v4191_v14 }
 0x105   : > { %v4552_v17 = vadd.f32 %v866_v0, %v730_v22  ;;  %1217 = vmatmul.f32.gmra.mxu2 %v4226_v29 }
 0x107   : > { %v872_v28 = vpop.f32.mrf.mxu3 }
 0x108   : > { %v474_v44 = vpop.f32.mrf.mxu0  ;;  %v614_v61 = vpop.f32.mrf.mxu1 }
 0x109   : > { %v615_v19 = vadd.f32 %v614_v61, %v466_v37  ;;  %v734_v2 = vpop.f32.mrf.mxu2 }
 0x10b   : > { %v735_v38 = vadd.f32 %v734_v2, %v615_v19  ;;  %981 = vmatmul.f32.gmra.mxu0 %v4211_v24  ;;  %1081 = vmatmul.f32.gmra.mxu1 %v4191_v14 }
 0x10c   : > { %1389 = vmatmul.f32.gmra.mxu3 %v4211_v24 }
 0x10d   : > { %v4558_v21 = vadd.f32 %v872_v28, %v735_v38  ;;  %1225 = vmatmul.f32.gmra.mxu2 %v4246_v40 }
 0x10f   : > { %v878_v0 = vpop.f32.mrf.mxu3 }
 0x110   : > { %v482_v51 = vpop.f32.mrf.mxu0  ;;  %v618_v11 = vpop.f32.mrf.mxu1 }
 0x111   : > { %v619_v29 = vadd.f32 %v618_v11, %v474_v44  ;;  %v739_v35 = vpop.f32.mrf.mxu2 }
 0x113   : > { %v740_v22 = vadd.f32 %v739_v35, %v619_v29  ;;  %985 = vmatmul.f32.gmra.mxu0 %v4231_v31  ;;  %1085 = vmatmul.f32.gmra.mxu1 %v4211_v24 }
 0x114   : > { %1393 = vmatmul.f32.gmra.mxu3 %v4231_v31 }
 0x115   : > { %v4564_v37 = vadd.f32 %v878_v0, %v740_v22  ;;  %1233 = vmatmul.f32.gmra.mxu2 %v4266_v55 }
 0x117   : > { %v884_v28 = vpop.f32.mrf.mxu3 }
 0x118   : > { %v490_v61 = vpop.f32.mrf.mxu0  ;;  %v622_v19 = vpop.f32.mrf.mxu1 }
 0x119   : > { %v623_v40 = vadd.f32 %v622_v19, %v482_v51  ;;  %v744_v2 = vpop.f32.mrf.mxu2 }
 0x11b   : > { %v745_v38 = vadd.f32 %v744_v2, %v623_v40  ;;  %989 = vmatmul.f32.gmra.mxu0 %v4251_v43  ;;  %1089 = vmatmul.f32.gmra.mxu1 %v4231_v31 }
 0x11c   : > { %1397 = vmatmul.f32.gmra.mxu3 %v4251_v43 }
 0x11d   : > { %v4570_v44 = vadd.f32 %v884_v28, %v745_v38  ;;  %1241 = vmatmul.f32.gmra.mxu2 %v4286_v10 }
 0x11f   : > { %v890_v0 = vpop.f32.mrf.mxu3 }
 0x120   : > { %v498_v11 = vpop.f32.mrf.mxu0  ;;  %v626_v29 = vpop.f32.mrf.mxu1 }
 0x121   : > { %v627_v55 = vadd.f32 %v626_v29, %v490_v61  ;;  %v749_v35 = vpop.f32.mrf.mxu2 }
 0x123   : > { %v750_v22 = vadd.f32 %v749_v35, %v627_v55  ;;  %993 = vmatmul.f32.gmra.mxu0 %v4271_v58  ;;  %1093 = vmatmul.f32.gmra.mxu1 %v4251_v43 }
 0x124   : > { %1401 = vmatmul.f32.gmra.mxu3 %v4271_v58 }
 0x125   : > { %v4576_v51 = vadd.f32 %v890_v0, %v750_v22  ;;  %1249 = vmatmul.f32.gmra.mxu2 %v4314_v47 }
 0x127   : > { %v896_v28 = vpop.f32.mrf.mxu3 }
 0x128   : > { %v506_v19 = vpop.f32.mrf.mxu0  ;;  %v630_v40 = vpop.f32.mrf.mxu1 }
 0x129   : > { %v631_v10 = vadd.f32 %v630_v40, %v498_v11  ;;  %v754_v2 = vpop.f32.mrf.mxu2 }
 0x12b   : > { %v755_v38 = vadd.f32 %v754_v2, %v631_v10  ;;  %997 = vmatmul.f32.gmra.mxu0 %v4291_v16  ;;  %1097 = vmatmul.f32.gmra.mxu1 %v4271_v58 }
 0x12c   : > { %1405 = vmatmul.f32.gmra.mxu3 %v4291_v16 }
 0x12d   : > { %v4582_v61 = vadd.f32 %v896_v28, %v755_v38  ;;  %1257 = vmatmul.f32.gmra.mxu2 %v4339_v57 }
 0x12f   : > { %v902_v0 = vpop.f32.mrf.mxu3 }
 0x130   : > { %v514_v29 = vpop.f32.mrf.mxu0  ;;  %v634_v55 = vpop.f32.mrf.mxu1 }
 0x131   : > { %v635_v47 = vadd.f32 %v634_v55, %v506_v19  ;;  %v759_v35 = vpop.f32.mrf.mxu2 }
 0x133   : > { %v760_v22 = vadd.f32 %v759_v35, %v635_v47  ;;  %1001 = vmatmul.f32.gmra.mxu0 %v4319_v54  ;;  %1101 = vmatmul.f32.gmra.mxu1 %v4291_v16 }
 0x134   : > { %1409 = vmatmul.f32.gmra.mxu3 %v4319_v54 }
 0x135   : > { %v4588_v11 = vadd.f32 %v902_v0, %v760_v22  ;;  %1265 = vmatmul.f32.gmra.mxu2 %v4359_v18 }
 0x137   : > { %v908_v28 = vpop.f32.mrf.mxu3 }
 0x138   : > { %v522_v40 = vpop.f32.mrf.mxu0  ;;  %v638_v10 = vpop.f32.mrf.mxu1 }
 0x139   : > { %v639_v57 = vadd.f32 %v638_v10, %v514_v29  ;;  %v764_v2 = vpop.f32.mrf.mxu2 }
 0x13b   : > { %v765_v38 = vadd.f32 %v764_v2, %v639_v57  ;;  %1005 = vmatmul.f32.gmra.mxu0 %v4344_v41  ;;  %1105 = vmatmul.f32.gmra.mxu1 %v4319_v54 }
 0x13c   : > { %1413 = vmatmul.f32.gmra.mxu3 %v4344_v41 }
 0x13d   : > { %v4594_v19 = vadd.f32 %v908_v28, %v765_v38  ;;  %1273 = vmatmul.f32.gmra.mxu2 %v4379_v48 }
 0x13f   : > { %5901 = vst [vmem:[#allocation49_spill] sm:$0xff] %v4594_v19  ;;  %v914_v0 = vpop.f32.mrf.mxu3 }
 0x140   : > { %v530_v55 = vpop.f32.mrf.mxu0  ;;  %v642_v47 = vpop.f32.mrf.mxu1 }
 0x141   : > { %v643_v18 = vadd.f32 %v642_v47, %v522_v40  ;;  %v769_v35 = vpop.f32.mrf.mxu2 }
 0x143   : > { %v770_v22 = vadd.f32 %v769_v35, %v643_v18  ;;  %1009 = vmatmul.f32.gmra.mxu0 %v4364_v3  ;;  %1109 = vmatmul.f32.gmra.mxu1 %v4344_v41 }
 0x144   : > { %1417 = vmatmul.f32.gmra.mxu3 %v4364_v3 }
 0x145   : > { %v4600_v29 = vadd.f32 %v914_v0, %v770_v22  ;;  %1281 = vmatmul.f32.gmra.mxu2 %v4399_v1 }
 0x147   : > { %5902 = vst [vmem:[#allocation50_spill] sm:$0xff] %v4600_v29  ;;  %v920_v28 = vpop.f32.mrf.mxu3 }
 0x148   : > { %v646_v10 = vpop.f32.mrf.mxu1  ;;  %v4603_v57 = vpop.f32.mrf.mxu0 }
 0x149   : > { %v647_v48 = vadd.f32 %v646_v10, %v530_v55  ;;  %v774_v2 = vpop.f32.mrf.mxu2 }
 0x14b   : > { %v775_v38 = vadd.f32 %v774_v2, %v647_v48  ;;  %1013 = vmatmul.f32.gmra.mxu0 %v4384_v30  ;;  %1113 = vmatmul.f32.gmra.mxu1 %v4364_v3 }
 0x14c   : > { %1421 = vmatmul.f32.gmra.mxu3 %v4384_v30 }
 0x14d   : > { %v4608_v40 = vadd.f32 %v920_v28, %v775_v38  ;;  %1289 = vmatmul.f32.gmra.mxu2 %v4419_v15 }
 0x14f   : > { %5903 = vst [vmem:[#allocation51_spill] sm:$0xff] %v4608_v40  ;;  %v1358_v0 = vpop.f32.mrf.mxu3 }
 0x150   : > { %v4611_v47 = vpop.f32.mrf.mxu0  ;;  %v4613_v1 = vpop.f32.mrf.mxu1 }
 0x151   : > { %v1162_v18 = vpop.f32.mrf.mxu2 }
 0x152   : > { %v4615_v35 = vadd.f32 %v1358_v0, %v1162_v18 }
 0x153   : > { %1017 = vmatmul.f32.gmra.mxu0 %v4404_v20  ;;  %1117 = vmatmul.f32.gmra.mxu1 %v4384_v30 }
 0x154   : > { %1425 = vmatmul.f32.gmra.mxu3 %v4404_v20 }
 0x155   : > { %1297 = vmatmul.f32.gmra.mxu2 %v4440_v56 }
 0x157   : > { %v1362_v55 = vpop.f32.mrf.mxu3 }
 0x158   : > { %v4621_v22 = vpop.f32.mrf.mxu0  ;;  %v4623_v15 = vpop.f32.mrf.mxu1 }
 0x159   : > { %v1170_v28 = vpop.f32.mrf.mxu2 }
 0x15a   : > { %v4625_v10 = vadd.f32 %v1362_v55, %v1170_v28 }
 0x15b   : > { %1021 = vmatmul.f32.gmra.mxu0 %v4424_v13  ;;  %1121 = vmatmul.f32.gmra.mxu1 %v4404_v20  ;;  %v5918_v20 = vld [vmem:[#allocation12_spill] sm:$0xff] }
 0x15c   : > { %1429 = vmatmul.f32.gmra.mxu3 %v4424_v13 }
 0x15d   : > { %1305 = vmatmul.f32.gmra.mxu2 %v4466_v7 }
 0x15f   : > { %v1366_v48 = vpop.f32.mrf.mxu3 }
 0x160   : > { %v4631_v2 = vpop.f32.mrf.mxu0  ;;  %v4633_v56 = vpop.f32.mrf.mxu1 }
 0x161   : > { %v1178_v38 = vpop.f32.mrf.mxu2 }
 0x162   : > { %v4635_v0 = vadd.f32 %v1366_v48, %v1178_v38 }
 0x163   : > { %1025 = vmatmul.f32.gmra.mxu0 %v4445_v49  ;;  %1125 = vmatmul.f32.gmra.mxu1 %v4424_v13  ;;  %v5915_v13 = vld [vmem:[#allocation11_spill] sm:$0xff] }
 0x164   : > { %5904 = vst [vmem:[#allocation52_spill] sm:$0xff] %v4635_v0  ;;  %1433 = vmatmul.f32.gmra.mxu3 %v4445_v49  ;;  %v5916_v0 = vld [vmem:[#allocation10_spill] sm:$0xff] }
 0x165   : > { %1313 = vmatmul.f32.gmra.mxu2 %v4486_v34 }
 0x167   : > { %v1370_v18 = vpop.f32.mrf.mxu3 }
 0x168   : > { %v4641_v55 = vpop.f32.mrf.mxu0  ;;  %v4643_v7 = vpop.f32.mrf.mxu1 }
 0x169   : > { %v1186_v28 = vpop.f32.mrf.mxu2 }
 0x16a   : > { %v4645_v40 = vadd.f32 %v1370_v18, %v1186_v28 }
 0x16b   : > { %1029 = vmatmul.f32.gmra.mxu0 %v4471_v27  ;;  %1129 = vmatmul.f32.gmra.mxu1 %v4445_v49 }
 0x16c   : > { %5905 = vst [vmem:[#allocation53_spill] sm:$0xff] %v4645_v40  ;;  %1437 = vmatmul.f32.gmra.mxu3 %v4471_v27  ;;  %v5912_v40 = vld [vmem:[#allocation9_spill] sm:$0xff] }
 0x16d   : > { %1321 = vmatmul.f32.gmra.mxu2 %v4499_v32 }
 0x16f   : > { %v1374_v48 = vpop.f32.mrf.mxu3 }
 0x170   : > { %v4651_v38 = vpop.f32.mrf.mxu0  ;;  %v4653_v34 = vpop.f32.mrf.mxu1 }
 0x171   : > { %v1194_v29 = vpop.f32.mrf.mxu2 }
 0x172   : > { %v4655_v19 = vadd.f32 %v1374_v48, %v1194_v29 }
 0x173   : > { %1133 = vmatmul.f32.gmra.mxu1 %v4471_v27  ;;  %1465 = vmatmul.f32.vlgmr.msra.gmra.mxu0 %v4052_v6 }
 0x174   : > { %5906 = vst [vmem:[#allocation54_spill] sm:$0xff] %v4655_v19  ;;  %1845 = vmatmul.f32.vlgmr.msra.gmra.mxu3 %v4047_v4  ;;  %v5909_v19 = vld [vmem:[#allocation7_spill] sm:$0xff] }
 0x175   : > { %1741 = vmatmul.f32.vlgmr.msra.gmra.mxu2 %v4047_v4 }
 0x177   : > { %v1378_v18 = vpop.f32.mrf.mxu3 }
 0x178   : > { %v4661_v28 = vpop.f32.mrf.mxu0  ;;  %v4663_v32 = vpop.f32.mrf.mxu1 }
 0x179   : > { %v1202_v62 = vpop.f32.mrf.mxu2 }
 0x17a   : > { %v4665_v49 = vadd.f32 %v1378_v18, %v1202_v62  ;;  %v5910_v62 = vld [vmem:[#allocation6_spill] sm:$0xff] }
 0x17b   : > { %1470 = vmatmul.f32.gmra.mxu0 %v4069_v12  ;;  %1591 = vmatmul.f32.vlgmr.msra.gmra.mxu1 %v4063_v8 }
 0x17c   : > { %5907 = vst [vmem:[#allocation55_spill] sm:$0xff] %v4665_v49  ;;  %1849 = vmatmul.f32.gmra.mxu3 %v4049_v5 }
 0x17d   : > { %1745 = vmatmul.f32.gmra.mxu2 %v4049_v5 }
 0x17f   : > { %v1382_v6 = vpop.f32.mrf.mxu3 }
 0x180   : > { %v4671_v29 = vpop.f32.mrf.mxu0  ;;  %v4673_v4 = vpop.f32.mrf.mxu1 }
 0x181   : > { %v1210_v48 = vpop.f32.mrf.mxu2 }
 0x182   : > { %v4675_v27 = vadd.f32 %v1382_v6, %v1210_v48  ;;  %v5913_v6 = vld [vmem:[#allocation8_spill] sm:$0xff] }
 0x183   : > { %1475 = vmatmul.f32.gmra.mxu0 %v5909_v19  ;;  %1597 = vmatmul.f32.gmra.mxu1 %v5910_v62 }
 0x184   : > { %5908 = vst [vmem:[#allocation56_spill] sm:$0xff] %v4675_v27  ;;  %1853 = vmatmul.f32.gmra.mxu3 %v4079_v23 }
 0x185   : > { %1749 = vmatmul.f32.gmra.mxu2 %v4079_v23 }
 0x187   : > { %v1386_v8 = vpop.f32.mrf.mxu3 }
 0x188   : > { %v4681_v12 = vpop.f32.mrf.mxu0  ;;  %v4683_v5 = vpop.f32.mrf.mxu1 }
 0x189   : > { %v1218_v18 = vpop.f32.mrf.mxu2 }
 0x18a   : > { %v4685_v49 = vadd.f32 %v1386_v8, %v1218_v18 }
 0x18b   : > { %1480 = vmatmul.f32.gmra.mxu0 %v5912_v40  ;;  %1603 = vmatmul.f32.gmra.mxu1 %v5913_v6  ;;  %v951_v40 = vadd.f32 %v4603_v57, %v4463_v36 }
 0x18c   : > { %5911 = vst [vmem:[#allocation7_spill] sm:$0xff] %v4685_v49  ;;  %1857 = vmatmul.f32.gmra.mxu3 %v4098_v39 }
 0x18d   : > { %1753 = vmatmul.f32.gmra.mxu2 %v4098_v39  ;;  %v1055_v49 = vadd.f32 %v4613_v1, %v951_v40 }
 0x18f   : > { %v1390_v19 = vpop.f32.mrf.mxu3 }
 0x190   : > { %v986_v48 = vpop.f32.mrf.mxu0  ;;  %v4691_v62 = vpop.f32.mrf.mxu1 }
 0x191   : > { %v1226_v23 = vpop.f32.mrf.mxu2  ;;  %v987_v39 = vadd.f32 %v986_v48, %v4540_v42 }
 0x192   : > { %v4693_v27 = vadd.f32 %v1390_v19, %v1226_v23 }
 0x193   : > { %1485 = vmatmul.f32.gmra.mxu0 %v5915_v13  ;;  %1609 = vmatmul.f32.gmra.mxu1 %v5916_v0  ;;  %v5917_v0 = vld [vmem:[#allocation13_spill] sm:$0xff] }
 0x194   : > { %5914 = vst [vmem:[#allocation6_spill] sm:$0xff] %v4693_v27  ;;  %1861 = vmatmul.f32.gmra.mxu3 %v4118_v46 }
 0x195   : > { %1757 = vmatmul.f32.gmra.mxu2 %v4118_v46  ;;  %v955_v46 = vadd.f32 %v4611_v47, %v4483_v59 }
 0x197   : > { %v1394_v8 = vpop.f32.mrf.mxu3  ;;  %v1059_v48 = vadd.f32 %v4623_v15, %v955_v46 }
 0x198   : > { %v990_v18 = vpop.f32.mrf.mxu0  ;;  %v1090_v6 = vpop.f32.mrf.mxu1 }
 0x199   : > { %v1091_v19 = vadd.f32 %v1090_v6, %v987_v39  ;;  %v1234_v23 = vpop.f32.mrf.mxu2  ;;  %v991_v36 = vadd.f32 %v990_v18, %v4546_v52  ;;  %v5920_v6 = vld [vmem:[#allocation14_spill] sm:$0xff] }
 0x19a   : > { %v4703_v27 = vadd.f32 %v1394_v8, %v1234_v23 }
 0x19b   : > { %v4705_v13 = vmul.f32 %v1091_v19, %v1055_v49  ;;  %1490 = vmatmul.f32.gmra.mxu0 %v5917_v0  ;;  %1615 = vmatmul.f32.gmra.mxu1 %v5918_v20  ;;  %v5919_v20 = vld [vmem:[#allocation15_spill] sm:$0xff] }
 0x19c   : > { %1865 = vmatmul.f32.gmra.mxu3 %v4138_v53 }
 0x19d   : > { %1761 = vmatmul.f32.gmra.mxu2 %v4138_v53  ;;  %v959_v53 = vadd.f32 %v4621_v22, %v4496_v33 }
 0x19f   : > { %v1398_v42 = vpop.f32.mrf.mxu3  ;;  %v1063_v18 = vadd.f32 %v4633_v56, %v959_v53 }
 0x1a0   : > { %v994_v57 = vpop.f32.mrf.mxu0  ;;  %v1094_v1 = vpop.f32.mrf.mxu1 }
 0x1a1   : > { %v1095_v49 = vadd.f32 %v1094_v1, %v991_v36  ;;  %v1242_v40 = vpop.f32.mrf.mxu2  ;;  %v995_v59 = vadd.f32 %v994_v57, %v4552_v17  ;;  %v5921_v36 = vld [vmem:[#allocation17_spill] sm:$0xff] }
 0x1a2   : > { %v4715_v39 = vadd.f32 %v1398_v42, %v1242_v40  ;;  %v5922_v42 = vld [vmem:[#allocation16_spill] sm:$0xff]  ;;  %v5923_v40 = vld [vmem:[#allocation19_spill] sm:$0xff] }
 0x1a3   : > { %v4717_v8 = vmul.f32 %v1095_v49, %v1059_v48  ;;  %1495 = vmatmul.f32.gmra.mxu0 %v5919_v20  ;;  %1621 = vmatmul.f32.gmra.mxu1 %v5920_v6  ;;  %v5924_v20 = vld [vmem:[#allocation18_spill] sm:$0xff] }
 0x1a4   : > { %1869 = vmatmul.f32.gmra.mxu3 %v4166_v63 }
 0x1a5   : > { %1765 = vmatmul.f32.gmra.mxu2 %v4166_v63  ;;  %v963_v63 = vadd.f32 %v4631_v2, %v4504_v45  ;;  %v967_v45 = vadd.f32 %v4641_v55, %v4510_v60 }
 0x1a7   : > { %v1402_v52 = vpop.f32.mrf.mxu3  ;;  %v1067_v57 = vadd.f32 %v4643_v7, %v963_v63  ;;  %v1071_v6 = vadd.f32 %v4653_v34, %v967_v45  ;;  %v5928_v63 = vld [vmem:[#allocation22_spill] sm:$0xff] }
 0x1a8   : > { %v998_v47 = vpop.f32.mrf.mxu0  ;;  %v1098_v15 = vpop.f32.mrf.mxu1 }
 0x1a9   : > { %v1099_v19 = vadd.f32 %v1098_v15, %v995_v59  ;;  %v1250_v23 = vpop.f32.mrf.mxu2  ;;  %v999_v33 = vadd.f32 %v998_v47, %v4558_v21  ;;  %v5925_v47 = vld [vmem:[#allocation21_spill] sm:$0xff]  ;;  %v5926_v15 = vld [vmem:[#allocation20_spill] sm:$0xff] }
 0x1aa   : > { %v4727_v0 = vadd.f32 %v1402_v52, %v1250_v23 }
 0x1ab   : > { %v4729_v46 = vmul.f32 %v1099_v19, %v1063_v18  ;;  %1500 = vmatmul.f32.gmra.mxu0 %v5921_v36  ;;  %1627 = vmatmul.f32.gmra.mxu1 %v5922_v42  ;;  %v5927_v42 = vld [vmem:[#allocation23_spill] sm:$0xff] }
 0x1ac   : > { %1873 = vmatmul.f32.gmra.mxu3 %v4191_v14 }
 0x1ad   : > { %1769 = vmatmul.f32.gmra.mxu2 %v4191_v14 }
 0x1af   : > { %v4738_v17 = vpop.f32.mrf.mxu3 }
 0x1b0   : > { %v1002_v22 = vpop.f32.mrf.mxu0  ;;  %v1102_v56 = vpop.f32.mrf.mxu1 }
 0x1b1   : > { %v1103_v1 = vadd.f32 %v1102_v56, %v999_v33  ;;  %v4741_v48 = vpop.f32.mrf.mxu2  ;;  %v1003_v14 = vadd.f32 %v1002_v22, %v4564_v37 }
 0x1b3   : > { %v4743_v49 = vmul.f32 %v1103_v1, %v1067_v57  ;;  %1505 = vmatmul.f32.gmra.mxu0 %v5923_v40  ;;  %1633 = vmatmul.f32.gmra.mxu1 %v5924_v20  ;;  %v5929_v1 = vld [vmem:[#allocation25_spill] sm:$0xff]  ;;  %v5930_v40 = vld [vmem:[#allocation24_spill] sm:$0xff] }
 0x1b4   : > { %1877 = vmatmul.f32.gmra.mxu3 %v4211_v24 }
 0x1b5   : > { %1773 = vmatmul.f32.gmra.mxu2 %v4211_v24  ;;  %v971_v24 = vadd.f32 %v4651_v38, %v4516_v50 }
 0x1b7   : > { %v4752_v21 = vpop.f32.mrf.mxu3  ;;  %v1075_v18 = vadd.f32 %v4663_v32, %v971_v24 }
 0x1b8   : > { %v1006_v2 = vpop.f32.mrf.mxu0  ;;  %v1106_v7 = vpop.f32.mrf.mxu1 }
 0x1b9   : > { %v1107_v53 = vadd.f32 %v1106_v7, %v1003_v14  ;;  %v4755_v59 = vpop.f32.mrf.mxu2  ;;  %v1007_v60 = vadd.f32 %v1006_v2, %v4570_v44  ;;  %v5931_v7 = vld [vmem:[#allocation27_spill] sm:$0xff] }
 0x1bb   : > { %v4757_v52 = vmul.f32 %v1107_v53, %v1071_v6  ;;  %1510 = vmatmul.f32.gmra.mxu0 %v5925_v47  ;;  %1639 = vmatmul.f32.gmra.mxu1 %v5926_v15  ;;  %v5932_v6 = vld [vmem:[#allocation26_spill] sm:$0xff] }
 0x1bc   : > { %1881 = vmatmul.f32.gmra.mxu3 %v4231_v31 }
 0x1bd   : > { %1777 = vmatmul.f32.gmra.mxu2 %v4231_v31  ;;  %v975_v31 = vadd.f32 %v4661_v28, %v4522_v25 }
 0x1bf   : > { %v4766_v37 = vpop.f32.mrf.mxu3  ;;  %v1079_v33 = vadd.f32 %v4673_v4, %v975_v31 }
 0x1c0   : > { %v1010_v55 = vpop.f32.mrf.mxu0  ;;  %v1110_v34 = vpop.f32.mrf.mxu1 }
 0x1c1   : > { %v1111_v19 = vadd.f32 %v1110_v34, %v1007_v60  ;;  %v4769_v23 = vpop.f32.mrf.mxu2  ;;  %v1011_v50 = vadd.f32 %v1010_v55, %v4576_v51  ;;  %v5934_v55 = vld [vmem:[#allocation29_spill] sm:$0xff] }
 0x1c3   : > { %v1948_v36 = vmul.f32 %v1111_v19, %v1075_v18  ;;  %1515 = vmatmul.f32.gmra.mxu0 %v5927_v42  ;;  %1645 = vmatmul.f32.gmra.mxu1 %v5928_v63  ;;  %v4836_v63 = vand.u32 4294901760, %v4757_v52 }
 0x1c4   : > { %1885 = vmatmul.f32.gmra.mxu3 %v4251_v43 }
 0x1c5   : > { %1781 = vmatmul.f32.gmra.mxu2 %v4251_v43  ;;  %v979_v43 = vadd.f32 %v4671_v29, %v4528_v26 }
 0x1c7   : > { %v4778_v44 = vpop.f32.mrf.mxu3  ;;  %v1083_v20 = vadd.f32 %v4683_v5, %v979_v43  ;;  %v4867_v43 = vsub.f32 %v4757_v52, %v4836_v63  ;;  %v4882_v52 = vand.u32 4294901760, %v4717_v8 }
 0x1c8   : > { %v1014_v38 = vpop.f32.mrf.mxu0  ;;  %v1114_v32 = vpop.f32.mrf.mxu1 }
 0x1c9   : > { %v1115_v22 = vadd.f32 %v1114_v32, %v1011_v50  ;;  %v4781_v56 = vpop.f32.mrf.mxu2  ;;  %v1015_v25 = vadd.f32 %v1014_v38, %v4582_v61 }
 0x1cb   : > { %v1950_v57 = vmul.f32 %v1115_v22, %v1079_v33  ;;  %1520 = vmatmul.f32.gmra.mxu0 %v5929_v1  ;;  %1651 = vmatmul.f32.gmra.mxu1 %v5930_v40  ;;  %v4851_v33 = vand.u32 4294901760, %v4743_v49  ;;  %v5940_v22 = vld [vmem:[#allocation31_spill] sm:$0xff] }
 0x1cc   : > { %1889 = vmatmul.f32.gmra.mxu3 %v4271_v58 }
 0x1cd   : > { %1785 = vmatmul.f32.gmra.mxu2 %v4271_v58  ;;  %v983_v58 = vadd.f32 %v4681_v12, %v4534_v9  ;;  %v4811_v60 = vand.u32 4294901760, %v1950_v57  ;;  %v5935_v9 = vld [vmem:[#allocation28_spill] sm:$0xff]  ;;  %v4819_v12 = vand.u32 4294901760, %v1948_v36 }
 0x1cf   : > { %v4790_v51 = vpop.f32.mrf.mxu3  ;;  %v1087_v47 = vadd.f32 %v4691_v62, %v983_v58  ;;  %v4832_v19 = vsub.f32 %v1950_v57, %v4811_v60  ;;  %v4848_v32 = vsub.f32 %v1948_v36, %v4819_v12  ;;  %v5941_v57 = vld [vmem:[#allocation30_spill] sm:$0xff]  ;;  %v2115_v58 = vand.u32 4294901760, %v4867_v43 }
 0x1d0   : > { %v1018_v28 = vpop.f32.mrf.mxu0  ;;  %v1118_v4 = vpop.f32.mrf.mxu1 }
 0x1d1   : > { %v1119_v45 = vadd.f32 %v1118_v4, %v1015_v25  ;;  %v4793_v14 = vpop.f32.mrf.mxu2  ;;  %v1019_v26 = vadd.f32 %v1018_v28, %v4588_v11  ;;  %v2103_v36 = vand.u32 4294901760, %v4832_v19  ;;  %v4870_v25 = vand.u32 4294901760, %v4729_v46 }
 0x1d2   : > { %v2109_v4 = vand.u32 4294901760, %v4848_v32 }
 0x1d3   : > { %v1952_v2 = vmul.f32 %v1119_v45, %v1083_v20  ;;  %1525 = vmatmul.f32.gmra.mxu0 %v5931_v7  ;;  %1657 = vmatmul.f32.gmra.mxu1 %v5932_v6  ;;  %v4879_v20 = vsub.f32 %v4743_v49, %v4851_v33  ;;  %v2104_v7 = vsub.f32 %v4832_v19, %v2103_v36 }
 0x1d4   : > { %1893 = vmatmul.f32.gmra.mxu3 %v4291_v16 }
 0x1d5   : > { %1789 = vmatmul.f32.gmra.mxu2 %v4291_v16  ;;  %v4802_v61 = vand.u32 4294901760, %v1952_v2 }
 0x1d7   : > { %v4804_v29 = vpop.f32.mrf.mxu3  ;;  %v4816_v11 = vsub.f32 %v1952_v2, %v4802_v61 }
 0x1d8   : > { %v4806_v5 = vpop.f32.mrf.mxu0  ;;  %v1122_v53 = vpop.f32.mrf.mxu1 }
 0x1d9   : > { %5933 = vst [vmem:[#allocation9_spill] sm:$0xff] %v4806_v5  ;;  %v1123_v15 = vadd.f32 %v1122_v53, %v1019_v26  ;;  %v4809_v24 = vpop.f32.mrf.mxu2  ;;  %v2097_v42 = vand.u32 4294901760, %v4816_v11  ;;  %v4898_v26 = vand.u32 4294901760, %v4705_v13 }
 0x1db   : > { %v1954_v16 = vmul.f32 %v1123_v15, %v1087_v47  ;;  %1530 = vmatmul.f32.gmra.mxu0 %v5934_v55  ;;  %1663 = vmatmul.f32.gmra.mxu1 %v5935_v9  ;;  %v2098_v40 = vsub.f32 %v4816_v11, %v2097_v42  ;;  %v2110_v47 = vsub.f32 %v4848_v32, %v2109_v4  ;;  %v2105_v55 = vand.u32 4294901760, %v2104_v7 }
 0x1dc   : > { %1897 = vmatmul.f32.gmra.mxu3 %v4319_v54  ;;  %v4908_v15 = vsub.f32 %v4729_v46, %v4870_v25  ;;  %v4917_v9 = vsub.f32 %v4717_v8, %v4882_v52 }
 0x1dd   : > { %v4821_v34 = vand.u32 4294901760, %v1954_v16  ;;  %1793 = vmatmul.f32.gmra.mxu2 %v4319_v54  ;;  %v2099_v45 = vand.u32 4294901760, %v2098_v40  ;;  %v2111_v46 = vand.u32 4294901760, %v2110_v47 }
 0x1de   : > { %v2127_v40 = vand.u32 4294901760, %v4908_v15 }
 0x1df   : > { %v4825_v62 = vsub.f32 %v1954_v16, %v4821_v34  ;;  %1992 = vmatpush.msrb.mxu0 %v4821_v34  ;;  %2268 = vmatpush.msrb.mxu3 %v4821_v34  ;;  %v4829_v18 = vpop.f32.mrf.mxu3  ;;  %v2121_v16 = vand.u32 4294901760, %v4879_v20 }
 0x1e0   : > { %5936 = vst [vmem:[#allocation8_spill] sm:$0xff] %v4829_v18  ;;  %v4838_v31 = vpop.f32.mrf.mxu0  ;;  %v4840_v54 = vpop.f32.mrf.mxu1 }
 0x1e1   : > { %5937 = vst [vmem:[#allocation11_spill] sm:$0xff] %v4838_v31  ;;  %1994 = vmatpush.msrb.mxu0 %v4802_v61  ;;  %2189 = vmatpush.msrb.mxu2 %v4825_v62  ;;  %v4844_v50 = vpop.f32.mrf.mxu2  ;;  %v2091_v38 = vand.u32 4294901760, %v4825_v62  ;;  %v2122_v8 = vsub.f32 %v4879_v20, %v2121_v16 }
 0x1e2   : > { %5938 = vst [vmem:[#allocation10_spill] sm:$0xff] %v4840_v54  ;;  %2270 = vmatpush.msrb.mxu3 %v4802_v61 }
 0x1e3   : > { %5939 = vst [vmem:[#allocation13_spill] sm:$0xff] %v4844_v50  ;;  %1535 = vmatmul.f32.gmra.mxu0 %v5940_v22  ;;  %1669 = vmatmul.f32.gmra.mxu1 %v5941_v57  ;;  %v2092_v1 = vsub.f32 %v4825_v62, %v2091_v38  ;;  %v5946_v22 = vld [vmem:[#allocation33_spill] sm:$0xff]  ;;  %v5947_v57 = vld [vmem:[#allocation32_spill] sm:$0xff] }
 0x1e4   : > { %1996 = vmatpush.msrb.mxu0 %v4811_v60  ;;  %2192 = vmatpush.msrb.mxu2 %v4816_v11 }
 0x1e5   : > { %2272 = vmatpush.msrb.mxu3 %v4811_v60  ;;  %1797 = vmatmul.f32.gmra.mxu2 %v4344_v41  ;;  %v2093_v28 = vand.u32 4294901760, %v2092_v1  ;;  %v4927_v1 = vsub.f32 %v4705_v13, %v4898_v26 }
 0x1e6   : > { %1998 = vmatpush.msrb.mxu0 %v4819_v12  ;;  %2195 = vmatpush.msrb.mxu2 %v4832_v19 }
 0x1e7   : > { %2274 = vmatpush.msrb.mxu3 %v4819_v12  ;;  %2094 = vmatpush.msrb.mxu1 %v2093_v28  ;;  %v4885_v2 = vpop.f32.mrf.mxu3 }
 0x1e8   : > { %5942 = vst [vmem:[#allocation12_spill] sm:$0xff] %v4885_v2  ;;  %2000 = vmatpush.msrb.mxu0 %v4836_v63  ;;  %2198 = vmatpush.msrb.mxu2 %v4848_v32  ;;  %v4892_v6 = vpop.f32.mrf.mxu0  ;;  %v4894_v49 = vpop.f32.mrf.mxu1  ;;  %v5953_v32 = vld [vmem:[#allocation38_spill] sm:$0xff] }
 0x1e9   : > { %5943 = vst [vmem:[#allocation15_spill] sm:$0xff] %v4892_v6  ;;  %2276 = vmatpush.msrb.mxu3 %v4836_v63  ;;  %2100 = vmatpush.msrb.mxu1 %v2099_v45  ;;  %v4901_v53 = vpop.f32.mrf.mxu2  ;;  %v2133_v45 = vand.u32 4294901760, %v4917_v9 }
 0x1ea   : > { %5944 = vst [vmem:[#allocation14_spill] sm:$0xff] %v4894_v49  ;;  %1901 = vmatmul.f32.gmra.mxu3 %v4344_v41  ;;  %2002 = vmatpush.msrb.mxu0 %v4851_v33  ;;  %v2116_v41 = vsub.f32 %v4867_v43, %v2115_v58 }
 0x1eb   : > { %5945 = vst [vmem:[#allocation17_spill] sm:$0xff] %v4901_v53  ;;  %2201 = vmatpush.msrb.mxu2 %v4867_v43  ;;  %2278 = vmatpush.msrb.mxu3 %v4851_v33 }
 0x1ec   : > { %1540 = vmatmul.f32.gmra.mxu0 %v5946_v22  ;;  %1675 = vmatmul.f32.gmra.mxu1 %v5947_v57  ;;  %v2117_v13 = vand.u32 4294901760, %v2116_v41  ;;  %v2139_v22 = vand.u32 4294901760, %v4927_v1  ;;  %v2123_v57 = vand.u32 4294901760, %v2122_v8  ;;  %v2134_v41 = vsub.f32 %v4917_v9, %v2133_v45  ;;  %v5952_v8 = vld [vmem:[#allocation34_spill] sm:$0xff] }
 0x1ed   : > { %2004 = vmatpush.msrb.mxu0 %v4870_v25  ;;  %2106 = vmatpush.msrb.mxu1 %v2105_v55  ;;  %v2128_v55 = vsub.f32 %v4908_v15, %v2127_v40 }
 0x1ee   : > { %2204 = vmatpush.msrb.mxu2 %v4879_v20  ;;  %2280 = vmatpush.msrb.mxu3 %v4870_v25 }
 0x1ef   : > { %2006 = vmatpush.msrb.mxu0 %v4882_v52  ;;  %2112 = vmatpush.msrb.mxu1 %v2111_v46  ;;  %v4934_v28 = vpop.f32.mrf.mxu3  ;;  %v2140_v46 = vsub.f32 %v4927_v1, %v2139_v22 }
 0x1f0   : > { %5948 = vst [vmem:[#allocation16_spill] sm:$0xff] %v4934_v28  ;;  %2207 = vmatpush.msrb.mxu2 %v4908_v15  ;;  %2282 = vmatpush.msrb.mxu3 %v4882_v52  ;;  %v4939_v7 = vpop.f32.mrf.mxu1  ;;  %v1466_v47 = vpop.f32.mrf.mxu0  ;;  %v2129_v15 = vand.u32 4294901760, %v2128_v55  ;;  %v5958_v55 = vld [vmem:[#allocation39_spill] sm:$0xff] }
 0x1f1   : > { %5949 = vst [vmem:[#allocation19_spill] sm:$0xff] %v4939_v7  ;;  %1801 = vmatmul.f32.gmra.mxu2 %v4364_v3  ;;  %2008 = vmatpush.msrb.mxu0 %v4898_v26  ;;  %v4943_v20 = vpop.f32.mrf.mxu2  ;;  %v1467_v62 = vadd.f32 %v1466_v47, %v4615_v35  ;;  %v2141_v11 = vand.u32 4294901760, %v2140_v46 }
 0x1f2   : > { %5950 = vst [vmem:[#allocation18_spill] sm:$0xff] %v4943_v20  ;;  %2118 = vmatpush.msrb.mxu1 %v2117_v13  ;;  %2210 = vmatpush.msrb.mxu2 %v4917_v9  ;;  %v5951_v13 = vld [vmem:[#allocation35_spill] sm:$0xff] }
 0x1f3   : > { %2284 = vmatpush.msrb.mxu3 %v4898_v26  ;;  %2350 = vmatpush.msra.mxu0 %v2091_v38 }
 0x1f4   : > { %1905 = vmatmul.f32.gmra.mxu3 %v4364_v3  ;;  %2124 = vmatpush.msrb.mxu1 %v2123_v57  ;;  %v2135_v3 = vand.u32 4294901760, %v2134_v41 }
 0x1f5   : > { %2213 = vmatpush.msrb.mxu2 %v4927_v1  ;;  %2354 = vmatpush.msra.mxu0 %v2097_v42 }
 0x1f6   : > { %1545 = vmatmul.f32.gmra.mxu0 %v5951_v13  ;;  %1681 = vmatmul.f32.gmra.mxu1 %v5952_v8  ;;  %v5959_v8 = vld [vmem:[#allocation40_spill] sm:$0xff] }
 0x1f7   : > { %2130 = vmatpush.msrb.mxu1 %v2129_v15  ;;  %2358 = vmatpush.msra.mxu0 %v2103_v36  ;;  %v1846_v38 = vpop.f32.mrf.mxu3 }
 0x1f8   : > { %v1471_v9 = vpop.f32.mrf.mxu0  ;;  %v1592_v57 = vpop.f32.mrf.mxu1 }
 0x1f9   : > { %2136 = vmatpush.msrb.mxu1 %v2135_v3  ;;  %2362 = vmatpush.msra.mxu0 %v2109_v4  ;;  %v1593_v42 = vadd.f32 %v1592_v57, %v1467_v62  ;;  %v1742_v1 = vpop.f32.mrf.mxu2  ;;  %v1472_v36 = vadd.f32 %v1471_v9, %v4625_v10  ;;  %v5954_v4 = vld [vmem:[#allocation36_spill] sm:$0xff]  ;;  %v1929_v10 = vld [vmem:[%s5785_s1] sm:$0xff]  ;;  %v1930_v3 = vld [vmem:[%s5785_s1 + $0x8] sm:$0xff] }
 0x1fa   : > { %1805 = vmatmul.f32.gmra.mxu2 %v4384_v30 }
 0x1fb   : > { %2142 = vmatpush.msrb.mxu1 %v2141_v11  ;;  %2366 = vmatpush.msra.mxu0 %v2115_v58  ;;  %v1743_v35 = vadd.f32 %v1742_v1, %v1593_v42  ;;  %v5962_v11 = vld [vmem:[#allocation42_spill] sm:$0xff] }
 0x1fc   : > { %1909 = vmatmul.f32.gmra.mxu3 %v4384_v30 }
 0x1fd   : > { %2428 = vmatpush.msra.mxu1 %v4821_v34  ;;  %2370 = vmatpush.msra.mxu0 %v2121_v16  ;;  %v4969_v19 = vadd.f32 %v1846_v38, %v1743_v35  ;;  %v5955_v16 = vld [vmem:[#allocation37_spill] sm:$0xff]  ;;  %v5960_v38 = vld [vmem:[#allocation44_spill] sm:$0xff] }
 0x1fe   : > { %1550 = vmatmul.f32.gmra.mxu0 %v5953_v32  ;;  %1687 = vmatmul.f32.gmra.mxu1 %v5954_v4  ;;  %v5963_v4 = vld [vmem:[#allocation43_spill] sm:$0xff] }
 0x1ff   : > { %2430 = vmatpush.msra.mxu1 %v4802_v61  ;;  %2374 = vmatpush.msra.mxu0 %v2127_v40  ;;  %v1850_v47 = vpop.f32.mrf.mxu3  ;;  %v5956_v40 = vld [vmem:[#allocation41_spill] sm:$0xff] }
 0x200   : > { %v1476_v43 = vpop.f32.mrf.mxu0  ;;  %v1598_v58 = vpop.f32.mrf.mxu1 }
 0x201   : > { %2432 = vmatpush.msra.mxu1 %v4811_v60  ;;  %2378 = vmatpush.msra.mxu0 %v2133_v45  ;;  %v1599_v34 = vadd.f32 %v1598_v58, %v1472_v36  ;;  %v1746_v30 = vpop.f32.mrf.mxu2 }
 0x202   : > { %1809 = vmatmul.f32.gmra.mxu2 %v5955_v16 }
 0x203   : > { %2434 = vmatpush.msra.mxu1 %v4819_v12  ;;  %2382 = vmatpush.msra.mxu0 %v2139_v22  ;;  %v1747_v61 = vadd.f32 %v1746_v30, %v1599_v34  ;;  %v5957_v12 = vld [vmem:[#allocation52_spill] sm:$0xff] }
 0x204   : > { %1913 = vmatmul.f32.gmra.mxu3 %v5955_v16  ;;  %v1477_v45 = vadd.f32 %v1476_v43, %v5957_v12  ;;  %v1931_v34 = vld [vmem:[%s5785_s1 + $0x10] sm:$0xff]  ;;  %v5964_v16 = vld [vmem:[#allocation47_spill] sm:$0xff] }
 0x205   : > { %2436 = vmatpush.msra.mxu1 %v4836_v63  ;;  %v4983_v60 = vadd.f32 %v1850_v47, %v1747_v61  ;;  %v1958_v63 = vsel %vm1956_vm1, %v1929_v10, 0 }
 0x206   : > { %1555 = vmatmul.f32.gmra.mxu0 %v5956_v40  ;;  %1693 = vmatmul.f32.gmra.mxu1 %v5958_v55  ;;  %v5966_v40 = vld [vmem:[#allocation54_spill] sm:$0xff] }
 0x207   : > { %2438 = vmatpush.msra.mxu1 %v4851_v33  ;;  %v1854_v22 = vpop.f32.mrf.mxu3  ;;  %v4993_v33 = vand.u32 4294901760, %v1958_v63 }
 0x208   : > { %v1481_v41 = vpop.f32.mrf.mxu0  ;;  %v1604_v15 = vpop.f32.mrf.mxu1 }
 0x209   : > { %2440 = vmatpush.msra.mxu1 %v4870_v25  ;;  %v1605_v46 = vadd.f32 %v1604_v15, %v1477_v45  ;;  %v1750_v13 = vpop.f32.mrf.mxu2  ;;  %v5004_v9 = vsub.f32 %v1958_v63, %v4993_v33  ;;  %v5967_v45 = vld [vmem:[#allocation45_spill] sm:$0xff] }
 0x20a   : > { %1813 = vmatmul.f32.gmra.mxu2 %v5959_v8 }
 0x20b   : > { %2442 = vmatpush.msra.mxu1 %v4882_v52  ;;  %v1751_v62 = vadd.f32 %v1750_v13, %v1605_v46  ;;  %v5961_v52 = vld [vmem:[#allocation53_spill] sm:$0xff]  ;;  %v5011_v47 = vand.u32 4294901760, %v5004_v9  ;;  %v5968_v13 = vld [vmem:[#allocation46_spill] sm:$0xff] }
 0x20c   : > { %1917 = vmatmul.f32.gmra.mxu3 %v5959_v8  ;;  %v1482_v57 = vadd.f32 %v1481_v41, %v5961_v52  ;;  %v1932_v52 = vld [vmem:[%s5785_s1 + $0x18] sm:$0xff] }
 0x20d   : > { %2444 = vmatpush.msra.mxu1 %v4898_v26  ;;  %v5000_v25 = vadd.f32 %v1854_v22, %v1751_v62  ;;  %v1961_v26 = vsel %vm1956_vm1, %v1930_v3, 0  ;;  %v2012_v61 = vsub.f32 %v5004_v9, %v5011_v47  ;;  %v1964_v22 = vsel %vm1956_vm1, %v1931_v34, 0 }
 0x20e   : > { %1560 = vmatmul.f32.gmra.mxu0 %v5960_v38  ;;  %1699 = vmatmul.f32.gmra.mxu1 %v5962_v11  ;;  %v5013_v43 = vand.u32 4294901760, %v1961_v26  ;;  %v5036_v3 = vand.u32 4294901760, %v1964_v22 }
 0x20f   : > { %v1858_v42 = vpop.f32.mrf.mxu3  ;;  %v5031_v8 = vand.u32 4294901760, %v2012_v61 }
 0x210   : > { %v1486_v1 = vpop.f32.mrf.mxu0  ;;  %v1610_v35 = vpop.f32.mrf.mxu1  ;;  %v5025_v10 = vsub.f32 %v1961_v26, %v5013_v43  ;;  %v5971_v26 = vld [vmem:[#allocation55_spill] sm:$0xff] }
 0x211   : > { %v1611_v32 = vadd.f32 %v1610_v35, %v1482_v57  ;;  %v1754_v36 = vpop.f32.mrf.mxu2  ;;  %v1487_v12 = vadd.f32 %v1486_v1, %v5966_v40  ;;  %v5972_v35 = vld [vmem:[#allocation48_spill] sm:$0xff] }
 0x212   : > { %1817 = vmatmul.f32.gmra.mxu2 %v5963_v4  ;;  %5965 = vst [vmem:[#allocation21_spill] sm:$0xff] %v5025_v10  ;;  %v5034_v62 = vand.u32 4294901760, %v5025_v10 }
 0x213   : > { %v1755_v58 = vadd.f32 %v1754_v36, %v1611_v32  ;;  %v1967_v36 = vsel %vm1956_vm1, %v1932_v52, 0 }
 0x214   : > { %1921 = vmatmul.f32.gmra.mxu3 %v5963_v4  ;;  %5969 = vst [vmem:[#allocation20_spill] sm:$0xff] %v5034_v62  ;;  %v2020_v11 = vsub.f32 %v5025_v10, %v5034_v62 }
 0x215   : > { %v5019_v30 = vadd.f32 %v1858_v42, %v1755_v58  ;;  %v5048_v42 = vsub.f32 %v1964_v22, %v5036_v3 }
 0x216   : > { %1565 = vmatmul.f32.gmra.mxu0 %v5964_v16  ;;  %1705 = vmatmul.f32.gmra.mxu1 %v5967_v45  ;;  %v5055_v61 = vand.u32 4294901760, %v2020_v11 }
 0x217   : > { %v1862_v55 = vpop.f32.mrf.mxu3  ;;  %5970 = vst [vmem:[#allocation23_spill] sm:$0xff] %v5048_v42  ;;  %v5058_v40 = vand.u32 4294901760, %v5048_v42 }
 0x218   : > { %v1491_v63 = vpop.f32.mrf.mxu0  ;;  %v1616_v41 = vpop.f32.mrf.mxu1 }
 0x219   : > { %v1617_v15 = vadd.f32 %v1616_v41, %v1487_v12  ;;  %v1758_v46 = vpop.f32.mrf.mxu2  ;;  %v1492_v1 = vadd.f32 %v1491_v63, %v5971_v26  ;;  %5973 = vst [vmem:[#allocation22_spill] sm:$0xff] %v5058_v40  ;;  %v5060_v12 = vand.u32 4294901760, %v1967_v36  ;;  %v2028_v63 = vsub.f32 %v5048_v42, %v5058_v40 }
 0x21a   : > { %1821 = vmatmul.f32.gmra.mxu2 %v5968_v13 }
 0x21b   : > { %v1759_v38 = vadd.f32 %v1758_v46, %v1617_v15  ;;  %v5073_v41 = vsub.f32 %v1967_v36, %v5060_v12  ;;  %v5085_v11 = vand.u32 4294901760, %v2028_v63 }
 0x21c   : > { %1925 = vmatmul.f32.gmra.mxu3 %v5968_v13 }
 0x21d   : > { %v5042_v57 = vadd.f32 %v1862_v55, %v1759_v38  ;;  %v1933_v55 = vld [vmem:[%s5785_s1 + $0x20] sm:$0xff]  ;;  %5974 = vst [vmem:[#allocation25_spill] sm:$0xff] %v5073_v41  ;;  %v5088_v26 = vand.u32 4294901760, %v5073_v41 }
 0x21e   : > { %2014 = vmatmul.f32.vlgmr.msrb.gmra.mxu0 %v5031_v8  ;;  %1711 = vmatmul.f32.gmra.mxu1 %v5972_v35  ;;  %v1970_v46 = vsel %vm1956_vm1, %v1933_v55, 0  ;;  %v1934_v35 = vld [vmem:[%s5785_s1 + $0x28] sm:$0xff] }
 0x21f   : > { %v1866_v32 = vpop.f32.mrf.mxu3  ;;  %5975 = vst [vmem:[#allocation24_spill] sm:$0xff] %v5088_v26 }
 0x220   : > { %v5053_v4 = vpop.f32.mrf.mxu0  ;;  %v1622_v58 = vpop.f32.mrf.mxu1 }
 0x221   : > { %v1623_v34 = vadd.f32 %v1622_v58, %v1492_v1  ;;  %v1762_v16 = vpop.f32.mrf.mxu2  ;;  %v5090_v1 = vand.u32 4294901760, %v1970_v46 }
 0x222   : > { %2216 = vmatmul.f32.vlgmr.msrb.gmra.mxu2 %v5004_v9 }
 0x223   : > { %v1763_v45 = vadd.f32 %v1762_v16, %v1623_v34  ;;  %v5101_v36 = vsub.f32 %v1970_v46, %v5090_v1  ;;  %v1973_v34 = vsel %vm1956_vm1, %v1934_v35, 0  ;;  %v1935_v46 = vld [vmem:[%s5785_s1 + $0x30] sm:$0xff] }
 0x224   : > { %2288 = vmatmul.f32.vlgmr.msrb.gmra.mxu3 %v5011_v47  ;;  %v5118_v20 = vand.u32 4294901760, %v1973_v34  ;;  %v1976_v53 = vsel %vm1956_vm1, %v1935_v46, 0 }
 0x225   : > { %v5067_v22 = vadd.f32 %v1866_v32, %v1763_v45  ;;  %v2036_v32 = vsub.f32 %v5073_v41, %v5088_v26  ;;  %5976 = vst [vmem:[#allocation27_spill] sm:$0xff] %v5101_v36  ;;  %v5116_v28 = vand.u32 4294901760, %v5101_v36  ;;  %v5144_v54 = vand.u32 4294901760, %v1976_v53 }
 0x226   : > { %2022 = vmatmul.f32.gmra.mxu0 %v5055_v61  ;;  %2144 = vmatmul.f32.vlgmr.msrb.gmra.mxu1 %v4993_v33 }
 0x227   : > { %v5076_v15 = vpop.f32.mrf.mxu3  ;;  %v5113_v63 = vand.u32 4294901760, %v2036_v32  ;;  %5978 = vst [vmem:[#allocation29_spill] sm:$0xff] %v5116_v28  ;;  %v2044_v35 = vsub.f32 %v5101_v36, %v5116_v28  ;;  %v5129_v32 = vsub.f32 %v1973_v34, %v5118_v20  ;;  %v1936_v34 = vld [vmem:[%s5785_s1 + $0x38] sm:$0xff] }
 0x228   : > { %v5079_v13 = vpop.f32.mrf.mxu0  ;;  %v5081_v38 = vpop.f32.mrf.mxu1 }
 0x229   : > { %v5083_v52 = vpop.f32.mrf.mxu2  ;;  %5977 = vst [vmem:[#allocation26_spill] sm:$0xff] %v5113_v63  ;;  %v5139_v49 = vand.u32 4294901760, %v2044_v35  ;;  %v5142_v6 = vand.u32 4294901760, %v5129_v32  ;;  %v5155_v35 = vsub.f32 %v1976_v53, %v5144_v54 }
 0x22a   : > { %2221 = vmatmul.f32.gmra.mxu2 %v5025_v10  ;;  %5979 = vst [vmem:[#allocation28_spill] sm:$0xff] %v5129_v32 }
 0x22b   : > { %5980 = vst [vmem:[#allocation31_spill] sm:$0xff] %v5139_v49  ;;  %v2052_v46 = vsub.f32 %v5129_v32, %v5142_v6 }
 0x22c   : > { %2294 = vmatmul.f32.gmra.mxu3 %v5034_v62  ;;  %5981 = vst [vmem:[#allocation30_spill] sm:$0xff] %v5142_v6 }
 0x22d   : > { %5982 = vst [vmem:[#allocation33_spill] sm:$0xff] %v5155_v35 }
 0x22e   : > { %2030 = vmatmul.f32.gmra.mxu0 %v5085_v11  ;;  %2148 = vmatmul.f32.gmra.mxu1 %v5013_v43 }
 0x22f   : > { %v5104_v58 = vpop.f32.mrf.mxu3 }
 0x230   : > { %v5107_v16 = vpop.f32.mrf.mxu0  ;;  %v5109_v45 = vpop.f32.mrf.mxu1 }
 0x231   : > { %v5111_v55 = vpop.f32.mrf.mxu2 }
 0x232   : > { %2226 = vmatmul.f32.gmra.mxu2 %v5048_v42 }
 0x234   : > { %2300 = vmatmul.f32.gmra.mxu3 %v5058_v40 }
 0x236   : > { %2038 = vmatmul.f32.gmra.mxu0 %v5113_v63  ;;  %2152 = vmatmul.f32.gmra.mxu1 %v5036_v3  ;;  %v5164_v63 = vand.u32 4294901760, %v5155_v35 }
 0x237   : > { %v5132_v2 = vpop.f32.mrf.mxu3 }
 0x238   : > { %v1511_v18 = vpop.f32.mrf.mxu0  ;;  %v5135_v50 = vpop.f32.mrf.mxu1  ;;  %5984 = vst [vmem:[#allocation35_spill] sm:$0xff] %v5164_v63 }
 0x239   : > { %v5137_v7 = vpop.f32.mrf.mxu2  ;;  %v1512_v31 = vadd.f32 %v1511_v18, %v4703_v27  ;;  %v1937_v18 = vld [vmem:[%s5785_s1 + $0x40] sm:$0xff] }
 0x23a   : > { %2231 = vmatmul.f32.gmra.mxu2 %v5073_v41  ;;  %v1979_v41 = vsel %vm1956_vm1, %v1936_v34, 0 }
 0x23b   : > { %v5166_v53 = vand.u32 4294901760, %v1979_v41 }
 0x23c   : > { %2306 = vmatmul.f32.gmra.mxu3 %v5088_v26 }
 0x23e   : > { %2046 = vmatmul.f32.gmra.mxu0 %v5139_v49  ;;  %2156 = vmatmul.f32.gmra.mxu1 %v5060_v12  ;;  %v5161_v49 = vand.u32 4294901760, %v2052_v46 }
 0x23f   : > { %v1882_v5 = vpop.f32.mrf.mxu3 }
 0x240   : > { %v1516_v40 = vpop.f32.mrf.mxu0  ;;  %v1646_v42 = vpop.f32.mrf.mxu1  ;;  %5983 = vst [vmem:[#allocation32_spill] sm:$0xff] %v5161_v49 }
 0x241   : > { %v1517_v62 = vadd.f32 %v1516_v40, %v4715_v39  ;;  %v1647_v26 = vadd.f32 %v1646_v42, %v1512_v31  ;;  %v1778_v10 = vpop.f32.mrf.mxu2  ;;  %v2060_v39 = vsub.f32 %v5155_v35, %v5164_v63  ;;  %v5177_v31 = vsub.f32 %v1979_v41, %v5166_v53 }
 0x242   : > { %2236 = vmatmul.f32.gmra.mxu2 %v5101_v36  ;;  %v1982_v40 = vsel %vm1956_vm1, %v1937_v18, 0 }
 0x243   : > { %v1779_v27 = vadd.f32 %v1778_v10, %v1647_v26  ;;  %v5187_v36 = vand.u32 4294901760, %v5177_v31 }
 0x244   : > { %2312 = vmatmul.f32.gmra.mxu3 %v5116_v28 }
 0x245   : > { %v1883_v34 = vadd.f32 %v1882_v5, %v1779_v27  ;;  %v5184_v27 = vand.u32 4294901760, %v2060_v39  ;;  %v2068_v18 = vsub.f32 %v5177_v31, %v5187_v36 }
 0x246   : > { %2054 = vmatmul.f32.gmra.mxu0 %v5161_v49  ;;  %2160 = vmatmul.f32.gmra.mxu1 %v5090_v1  ;;  %v5189_v49 = vand.u32 4294901760, %v1982_v40 }
 0x247   : > { %v5181_v42 = vmul.f32 %v1883_v34, %v4969_v19  ;;  %v1886_v10 = vpop.f32.mrf.mxu3 }
 0x248   : > { %v1521_v26 = vpop.f32.mrf.mxu0  ;;  %v1652_v46 = vpop.f32.mrf.mxu1 }
 0x249   : > { %v1653_v28 = vadd.f32 %v1652_v46, %v1517_v62  ;;  %v1782_v5 = vpop.f32.mrf.mxu2  ;;  %v5197_v62 = vsub.f32 %v1982_v40, %v5189_v49  ;;  %v1522_v34 = vadd.f32 %v1521_v26, %v4727_v0  ;;  %v1407_v0 = vadd.f32 %v4738_v17, %v4741_v48 }
 0x24a   : > { %2241 = vmatmul.f32.gmra.mxu2 %v5129_v32  ;;  %v1411_v48 = vadd.f32 %v4752_v21, %v4755_v59  ;;  %v1415_v59 = vadd.f32 %v4766_v37, %v4769_v23  ;;  %v1419_v37 = vadd.f32 %v4778_v44, %v4781_v56 }
 0x24b   : > { %v1783_v41 = vadd.f32 %v1782_v5, %v1653_v28  ;;  %v5207_v32 = vand.u32 4294901760, %v5197_v62 }
 0x24c   : > { %2318 = vmatmul.f32.gmra.mxu3 %v5142_v6 }
 0x24d   : > { %v1887_v19 = vadd.f32 %v1886_v10, %v1783_v41  ;;  %v5204_v41 = vand.u32 4294901760, %v2068_v18  ;;  %v2076_v26 = vsub.f32 %v5197_v62, %v5207_v32 }
 0x24e   : > { %2062 = vmatmul.f32.gmra.mxu0 %v5184_v27  ;;  %2164 = vmatmul.f32.gmra.mxu1 %v5118_v20 }
 0x24f   : > { %v5202_v39 = vmul.f32 %v1887_v19, %v4983_v60  ;;  %v1890_v46 = vpop.f32.mrf.mxu3 }
 0x250   : > { %v1526_v28 = vpop.f32.mrf.mxu0  ;;  %v1658_v5 = vpop.f32.mrf.mxu1 }
 0x251   : > { %v1659_v6 = vadd.f32 %v1658_v5, %v1522_v34  ;;  %v1786_v10 = vpop.f32.mrf.mxu2  ;;  %v1527_v19 = vadd.f32 %v1526_v28, %v1407_v0 }
 0x252   : > { %2246 = vmatmul.f32.gmra.mxu2 %v5155_v35  ;;  %v5220_v35 = vand.u32 4294901760, %v2076_v26 }
 0x253   : > { %v1787_v40 = vadd.f32 %v1786_v10, %v1659_v6 }
 0x254   : > { %2324 = vmatmul.f32.gmra.mxu3 %v5164_v63 }
 0x255   : > { %v1891_v60 = vadd.f32 %v1890_v46, %v1787_v40 }
 0x256   : > { %2070 = vmatmul.f32.gmra.mxu0 %v5204_v41  ;;  %2168 = vmatmul.f32.gmra.mxu1 %v5144_v54 }
 0x257   : > { %v5218_v18 = vmul.f32 %v1891_v60, %v5000_v25  ;;  %v1894_v34 = vpop.f32.mrf.mxu3 }
 0x258   : > { %v1531_v5 = vpop.f32.mrf.mxu0  ;;  %v1664_v6 = vpop.f32.mrf.mxu1 }
 0x259   : > { %v1665_v10 = vadd.f32 %v1664_v6, %v1527_v19  ;;  %v1790_v63 = vpop.f32.mrf.mxu2  ;;  %v1532_v25 = vadd.f32 %v1531_v5, %v1411_v48 }
 0x25a   : > { %2251 = vmatmul.f32.gmra.mxu2 %v5177_v31 }
 0x25b   : > { %v1791_v17 = vadd.f32 %v1790_v63, %v1665_v10 }
 0x25c   : > { %2330 = vmatmul.f32.gmra.mxu3 %v5187_v36 }
 0x25d   : > { %v1895_v46 = vadd.f32 %v1894_v34, %v1791_v17 }
 0x25e   : > { %2078 = vmatmul.f32.gmra.mxu0 %v5220_v35  ;;  %2172 = vmatmul.f32.gmra.mxu1 %v5166_v53 }
 0x25f   : > { %v5229_v28 = vmul.f32 %v1895_v46, %v5019_v30  ;;  %v1898_v19 = vpop.f32.mrf.mxu3 }
 0x260   : > { %v1536_v40 = vpop.f32.mrf.mxu0  ;;  %v1670_v0 = vpop.f32.mrf.mxu1 }
 0x261   : > { %v1671_v60 = vadd.f32 %v1670_v0, %v1532_v25  ;;  %v1794_v26 = vpop.f32.mrf.mxu2  ;;  %v1537_v34 = vadd.f32 %v1536_v40, %v1415_v59  ;;  %v5985_v25 = vld [vmem:[#allocation56_spill] sm:$0xff] }
 0x262   : > { %2256 = vmatmul.f32.gmra.mxu2 %v5197_v62  ;;  %v1497_v0 = vadd.f32 %v5053_v4, %v5985_v25 }
 0x263   : > { %v1795_v63 = vadd.f32 %v1794_v26, %v1671_v60 }
 0x264   : > { %2336 = vmatmul.f32.gmra.mxu3 %v5207_v32  ;;  %v1629_v23 = vadd.f32 %v5081_v38, %v1497_v0 }
 0x265   : > { %v1899_v21 = vadd.f32 %v1898_v19, %v1795_v63 }
 0x266   : > { %2384 = vmatmul.f32.vlgmr.msra.gmra.mxu0 %v4993_v33  ;;  %2176 = vmatmul.f32.gmra.mxu1 %v5189_v49  ;;  %v1767_v63 = vadd.f32 %v5083_v52, %v1629_v23 }
 0x267   : > { %v5238_v30 = vmul.f32 %v1899_v21, %v5042_v57 }
 0x268   : > { %v1871_v56 = vadd.f32 %v5076_v15, %v1767_v63 }
 0x269   : > { %v1541_v5 = vpop.f32.mrf.mxu0  ;;  %v1676_v6 = vpop.f32.mrf.mxu1 }
 0x26a   : > { %v1677_v10 = vadd.f32 %v1676_v6, %v1537_v34  ;;  %v1798_v17 = vpop.f32.mrf.mxu2  ;;  %v1542_v40 = vadd.f32 %v1541_v5, %v1419_v37  ;;  %v5986_v34 = vld [vmem:[#allocation7_spill] sm:$0xff] }
 0x26b   : > { %v1502_v6 = vadd.f32 %v5079_v13, %v5986_v34  ;;  %v5987_v13 = vld [vmem:[#allocation6_spill] sm:$0xff] }
 0x26c   : > { %v1799_v48 = vadd.f32 %v1798_v17, %v1677_v10 }
 0x26d   : > { %v1902_v46 = vpop.f32.mrf.mxu3  ;;  %v1635_v5 = vadd.f32 %v5109_v45, %v1502_v6 }
 0x26e   : > { %v1903_v60 = vadd.f32 %v1902_v46, %v1799_v48  ;;  %2388 = vmatmul.f32.gmra.mxu0 %v5013_v43  ;;  %2446 = vmatmul.f32.vlgmr.msra.gmra.mxu1 %v4993_v33 }
 0x26f   : > { %v1771_v46 = vadd.f32 %v5111_v55, %v1635_v5 }
 0x270   : > { %v1949_v57 = vmul.f32 %v1903_v60, %v5067_v22  ;;  %v1423_v22 = vadd.f32 %v4790_v51, %v4793_v14  ;;  %v1507_v60 = vadd.f32 %v5107_v16, %v5987_v13  ;;  %v1427_v51 = vadd.f32 %v4804_v29, %v4809_v24 }
 0x271   : > { %v1875_v14 = vadd.f32 %v5104_v58, %v1771_v46  ;;  %v5311_v46 = vand.u32 4294901760, %v5218_v18 }
 0x272   : > { %v1641_v45 = vadd.f32 %v5135_v50, %v1507_v60  ;;  %v5327_v60 = vand.u32 4294901760, %v5202_v39 }
 0x273   : > { %v1546_v26 = vpop.f32.mrf.mxu0  ;;  %v1682_v19 = vpop.f32.mrf.mxu1 }
 0x274   : > { %v1683_v21 = vadd.f32 %v1682_v19, %v1542_v40  ;;  %v1802_v59 = vpop.f32.mrf.mxu2  ;;  %v1547_v10 = vadd.f32 %v1546_v26, %v1423_v22  ;;  %v1775_v63 = vadd.f32 %v5137_v7, %v1641_v45  ;;  %v5288_v22 = vand.u32 4294901760, %v5238_v30 }
 0x275   : > { %v5343_v45 = vand.u32 4294901760, %v5181_v42 }
 0x276   : > { %v1803_v4 = vadd.f32 %v1802_v59, %v1683_v21  ;;  %2392 = vmatmul.f32.gmra.mxu0 %v5036_v3  ;;  %2450 = vmatmul.f32.gmra.mxu1 %v5013_v43  ;;  %v1879_v50 = vadd.f32 %v5132_v2, %v1775_v63  ;;  %v5363_v63 = vsub.f32 %v5202_v39, %v5327_v60 }
 0x277   : > { %v1906_v44 = vpop.f32.mrf.mxu3 }
 0x278   : > { %v1907_v38 = vadd.f32 %v1906_v44, %v1803_v4  ;;  %v5278_v44 = vand.u32 4294901760, %v1949_v57 }
 0x27a   : > { %v1951_v52 = vmul.f32 %v1907_v38, %v1871_v56 }
 0x27b   : > { %v1551_v17 = vpop.f32.mrf.mxu0  ;;  %v1688_v48 = vpop.f32.mrf.mxu1 }
 0x27c   : > { %v1689_v25 = vadd.f32 %v1688_v48, %v1547_v10  ;;  %v1552_v55 = vadd.f32 %v1551_v17, %v1427_v51  ;;  %v5274_v4 = vand.u32 4294901760, %v1951_v52  ;;  %v5300_v10 = vand.u32 4294901760, %v5229_v28 }
 0x27d   : > { %v1806_v0 = vpop.f32.mrf.mxu2  ;;  %v5304_v17 = vsub.f32 %v1949_v57, %v5278_v44 }
 0x27e   : > { %2396 = vmatmul.f32.gmra.mxu0 %v5060_v12  ;;  %v1807_v15 = vadd.f32 %v1806_v0, %v1689_v25  ;;  %2454 = vmatmul.f32.gmra.mxu1 %v5036_v3  ;;  %v5292_v2 = vsub.f32 %v1951_v52, %v5274_v4  ;;  %v5316_v25 = vsub.f32 %v5238_v30, %v5288_v22 }
 0x27f   : > { %v1910_v37 = vpop.f32.mrf.mxu3  ;;  %v2607_v51 = vand.u32 4294901760, %v5304_v17 }
 0x280   : > { %v1911_v23 = vadd.f32 %v1910_v37, %v1807_v15  ;;  %v2601_v57 = vand.u32 4294901760, %v5292_v2  ;;  %v5337_v37 = vsub.f32 %v5229_v28, %v5300_v10  ;;  %v5352_v28 = vsub.f32 %v5218_v18, %v5311_v46 }
 0x282   : > { %v1953_v40 = vmul.f32 %v1911_v23, %v1875_v14  ;;  %v2602_v23 = vsub.f32 %v5292_v2, %v2601_v57  ;;  %v2619_v18 = vand.u32 4294901760, %v5337_v37  ;;  %v2625_v39 = vand.u32 4294901760, %v5352_v28 }
 0x283   : > { %v5266_v26 = vpop.f32.mrf.mxu0  ;;  %v1694_v19 = vpop.f32.mrf.mxu1 }
 0x284   : > { %v1695_v16 = vadd.f32 %v1694_v19, %v1552_v55  ;;  %v5271_v24 = vand.u32 4294901760, %v1953_v40  ;;  %v2613_v55 = vand.u32 4294901760, %v5316_v25  ;;  %v2608_v19 = vsub.f32 %v5304_v17, %v2607_v51 }
 0x285   : > { %v1810_v21 = vpop.f32.mrf.mxu2 }
 0x286   : > { %2400 = vmatmul.f32.gmra.mxu0 %v5090_v1  ;;  %v1811_v59 = vadd.f32 %v1810_v21, %v1695_v16  ;;  %2458 = vmatmul.f32.gmra.mxu1 %v5060_v12  ;;  %v5283_v56 = vsub.f32 %v1953_v40, %v5271_v24  ;;  %v2603_v16 = vand.u32 4294901760, %v2602_v23  ;;  %v2614_v21 = vsub.f32 %v5316_v25, %v2613_v55 }
 0x287   : > { %v1914_v29 = vpop.f32.mrf.mxu3 }
 0x288   : > { %v1915_v58 = vadd.f32 %v1914_v29, %v1811_v59  ;;  %v2595_v48 = vand.u32 4294901760, %v5283_v56  ;;  %v5374_v59 = vsub.f32 %v5181_v42, %v5343_v45  ;;  %v2615_v42 = vand.u32 4294901760, %v2614_v21 }
 0x28a   : > { %v1955_v34 = vmul.f32 %v1915_v58, %v1879_v50  ;;  %v2596_v30 = vsub.f32 %v5283_v56, %v2595_v48  ;;  %v2609_v58 = vand.u32 4294901760, %v2608_v19 }
 0x28b   : > { %v5276_v6 = vpop.f32.mrf.mxu0  ;;  %v5280_v7 = vpop.f32.mrf.mxu1 }
 0x28c   : > { %v5285_v38 = vand.u32 4294901760, %v1955_v34  ;;  %v2597_v40 = vand.u32 4294901760, %v2596_v30  ;;  %v2626_v30 = vsub.f32 %v5352_v28, %v2625_v39 }
 0x28e   : > { %2404 = vmatmul.f32.gmra.mxu0 %v5118_v20  ;;  %v5295_v5 = vsub.f32 %v1955_v34, %v5285_v38  ;;  %2462 = vmatmul.f32.gmra.mxu1 %v5090_v1  ;;  %v2620_v34 = vsub.f32 %v5337_v37, %v2619_v18 }
 0x28f   : > { %2490 = vmatpush.msra.mxu2 %v5285_v38  ;;  %2766 = vmatpush.msrb.mxu1 %v5285_v38 }
 0x290   : > { %2687 = vmatpush.msrb.mxu0 %v5295_v5  ;;  %v2589_v52 = vand.u32 4294901760, %v5295_v5 }
 0x291   : > { %2492 = vmatpush.msra.mxu2 %v5271_v24  ;;  %2768 = vmatpush.msrb.mxu1 %v5271_v24 }
 0x292   : > { %2690 = vmatpush.msrb.mxu0 %v5283_v56  ;;  %v2590_v13 = vsub.f32 %v5295_v5, %v2589_v52 }
 0x293   : > { %2494 = vmatpush.msra.mxu2 %v5274_v4  ;;  %v5321_v0 = vpop.f32.mrf.mxu0  ;;  %2770 = vmatpush.msrb.mxu1 %v5274_v4  ;;  %v5330_v15 = vpop.f32.mrf.mxu1 }
 0x294   : > { %2693 = vmatpush.msrb.mxu0 %v5292_v2  ;;  %v2591_v14 = vand.u32 4294901760, %v2590_v13  ;;  %v2631_v13 = vand.u32 4294901760, %v5363_v63 }
 0x295   : > { %2496 = vmatpush.msra.mxu2 %v5278_v44  ;;  %2772 = vmatpush.msrb.mxu1 %v5278_v44 }
 0x296   : > { %2408 = vmatmul.f32.gmra.mxu0 %v5144_v54  ;;  %2466 = vmatmul.f32.gmra.mxu1 %v5118_v20  ;;  %v2632_v23 = vsub.f32 %v5363_v63, %v2631_v13 }
 0x297   : > { %2498 = vmatpush.msra.mxu2 %v5288_v22  ;;  %2592 = vmatpush.msra.mxu3 %v2591_v14  ;;  %v2637_v14 = vand.u32 4294901760, %v5374_v59 }
 0x298   : > { %2696 = vmatpush.msrb.mxu0 %v5304_v17  ;;  %2774 = vmatpush.msrb.mxu1 %v5288_v22  ;;  %v5989_v17 = vld [vmem:[#allocation21_spill] sm:$0xff] }
 0x299   : > { %2500 = vmatpush.msra.mxu2 %v5300_v10  ;;  %2598 = vmatpush.msra.mxu3 %v2597_v40  ;;  %v5397_v40 = vpop.f32.mrf.mxu2  ;;  %v2638_v19 = vsub.f32 %v5374_v59, %v2637_v14 }
 0x29a   : > { %2699 = vmatpush.msrb.mxu0 %v5316_v25  ;;  %2776 = vmatpush.msrb.mxu1 %v5300_v10 }
 0x29b   : > { %2502 = vmatpush.msra.mxu2 %v5311_v46  ;;  %v5379_v29 = vpop.f32.mrf.mxu0  ;;  %2604 = vmatpush.msra.mxu3 %v2603_v16  ;;  %v5382_v50 = vpop.f32.mrf.mxu1 }
 0x29c   : > { %2702 = vmatpush.msrb.mxu0 %v5337_v37  ;;  %2778 = vmatpush.msrb.mxu1 %v5311_v46  ;;  %v2621_v37 = vand.u32 4294901760, %v2620_v34  ;;  %v5996_v34 = vld [vmem:[#allocation24_spill] sm:$0xff] }
 0x29d   : > { %2504 = vmatpush.msra.mxu2 %v5327_v60  ;;  %2610 = vmatpush.msra.mxu3 %v2609_v58  ;;  %v2639_v58 = vand.u32 4294901760, %v2638_v19  ;;  %v5999_v19 = vld [vmem:[#allocation28_spill] sm:$0xff] }
 0x29e   : > { %2705 = vmatpush.msrb.mxu0 %v5352_v28  ;;  %2780 = vmatpush.msrb.mxu1 %v5327_v60  ;;  %v2627_v28 = vand.u32 4294901760, %v2626_v30  ;;  %v5997_v30 = vld [vmem:[#allocation27_spill] sm:$0xff] }
 0x29f   : > { %2506 = vmatpush.msra.mxu2 %v5343_v45  ;;  %2470 = vmatmul.f32.gmra.mxu1 %v5144_v54 }
 0x2a0   : > { %2616 = vmatpush.msra.mxu3 %v2615_v42  ;;  %2708 = vmatpush.msrb.mxu0 %v5363_v63  ;;  %v2633_v63 = vand.u32 4294901760, %v2632_v23 }
 0x2a1   : > { %2782 = vmatpush.msrb.mxu1 %v5343_v45  ;;  %2512 = vmatmul.f32.vlgmr.msra.gmra.mxu2 %v5031_v8  ;;  %v5409_v8 = vpop.f32.mrf.mxu3  ;;  %v5423_v5 = vpop.f32.mrf.mxu2 }
 0x2a2   : > { %2622 = vmatpush.msra.mxu3 %v2621_v37  ;;  %2848 = vmatpush.msrb.mxu2 %v2589_v52  ;;  %v5998_v37 = vld [vmem:[#allocation29_spill] sm:$0xff] }
 0x2a3   : > { %2711 = vmatpush.msrb.mxu0 %v5374_v59  ;;  %v5404_v16 = vpop.f32.mrf.mxu0  ;;  %v2145_v21 = vpop.f32.mrf.mxu1 }
 0x2a4   : > { %2628 = vmatpush.msra.mxu3 %v2627_v28  ;;  %2412 = vmatmul.f32.gmra.mxu0 %v5166_v53 }
 0x2a5   : > { %2852 = vmatpush.msrb.mxu2 %v2595_v48 }
 0x2a6   : > { %2634 = vmatpush.msra.mxu3 %v2633_v63  ;;  %v6000_v63 = vld [vmem:[#allocation30_spill] sm:$0xff] }
 0x2a7   : > { %2856 = vmatpush.msrb.mxu2 %v2601_v57  ;;  %2474 = vmatmul.f32.gmra.mxu1 %v5166_v53 }
 0x2a8   : > { %2640 = vmatpush.msra.mxu3 %v2639_v58 }
 0x2a9   : > { %2860 = vmatpush.msrb.mxu2 %v2607_v51  ;;  %2642 = vmatmul.f32.vlgmr.msra.gmra.mxu3 %v4993_v33 }
 0x2aa   : > { %2520 = vmatmul.f32.gmra.mxu2 %v5055_v61  ;;  %2926 = vmatpush.msrb.mxu3 %v5285_v38  ;;  %v5430_v61 = vpop.f32.mrf.mxu3  ;;  %v5441_v38 = vpop.f32.mrf.mxu2 }
 0x2ab   : > { %2864 = vmatpush.msrb.mxu2 %v2613_v55  ;;  %v5421_v56 = vpop.f32.mrf.mxu0  ;;  %v5426_v2 = vpop.f32.mrf.mxu1  ;;  %v5993_v55 = vld [vmem:[#allocation22_spill] sm:$0xff] }
 0x2ac   : > { %2928 = vmatpush.msrb.mxu3 %v5271_v24  ;;  %2416 = vmatmul.f32.gmra.mxu0 %v5189_v49 }
 0x2ad   : > { %2868 = vmatpush.msrb.mxu2 %v2619_v18  ;;  %v5994_v18 = vld [vmem:[#allocation32_spill] sm:$0xff] }
 0x2ae   : > { %2930 = vmatpush.msrb.mxu3 %v5274_v4 }
 0x2af   : > { %2872 = vmatpush.msrb.mxu2 %v2625_v39  ;;  %2478 = vmatmul.f32.gmra.mxu1 %v5189_v49 }
 0x2b0   : > { %2932 = vmatpush.msrb.mxu3 %v5278_v44  ;;  %v5988_v44 = vld [vmem:[#allocation26_spill] sm:$0xff] }
 0x2b1   : > { %2876 = vmatpush.msrb.mxu2 %v2631_v13  ;;  %2646 = vmatmul.f32.gmra.mxu3 %v5013_v43 }
 0x2b2   : > { %2528 = vmatmul.f32.gmra.mxu2 %v5085_v11  ;;  %2934 = vmatpush.msrb.mxu3 %v5288_v22  ;;  %v5447_v11 = vpop.f32.mrf.mxu3  ;;  %v2146_v22 = vadd.f32 %v2145_v21, %v5379_v29  ;;  %v2217_v48 = vpop.f32.mrf.mxu2  ;;  %v5995_v29 = vld [vmem:[#allocation25_spill] sm:$0xff] }
 0x2b3   : > { %2880 = vmatpush.msrb.mxu2 %v2637_v14  ;;  %v5437_v24 = vpop.f32.mrf.mxu0  ;;  %v2153_v4 = vpop.f32.mrf.mxu1 }
 0x2b4   : > { %2936 = vmatpush.msrb.mxu3 %v5300_v10  ;;  %2714 = vmatmul.f32.vlgmr.msrb.gmra.mxu0 %v5004_v9  ;;  %v2218_v52 = vadd.f32 %v2217_v48, %v2146_v22  ;;  %v6001_v22 = vld [vmem:[#allocation33_spill] sm:$0xff] }
 0x2b6   : > { %2938 = vmatpush.msrb.mxu3 %v5311_v46  ;;  %v5990_v46 = vld [vmem:[#allocation20_spill] sm:$0xff] }
 0x2b7   : > { %2786 = vmatmul.f32.vlgmr.msrb.gmra.mxu1 %v5011_v47  ;;  %v5991_v47 = vld [vmem:[#allocation31_spill] sm:$0xff] }
 0x2b8   : > { %2940 = vmatpush.msrb.mxu3 %v5327_v60 }
 0x2b9   : > { %2650 = vmatmul.f32.gmra.mxu3 %v5036_v3 }
 0x2ba   : > { %2536 = vmatmul.f32.gmra.mxu2 %v5988_v44  ;;  %2942 = vmatpush.msrb.mxu3 %v5343_v45  ;;  %v2289_v25 = vpop.f32.mrf.mxu3  ;;  %v5992_v45 = vld [vmem:[#allocation23_spill] sm:$0xff]  ;;  %v2222_v14 = vpop.f32.mrf.mxu2 }
 0x2bb   : > { %v5452_v10 = vpop.f32.mrf.mxu0  ;;  %v5454_v9 = vpop.f32.mrf.mxu1  ;;  %v2290_v60 = vadd.f32 %v2289_v25, %v2218_v52  ;;  %v2150_v52 = vadd.f32 %v5426_v2, %v5404_v16 }
 0x2bc   : > { %2719 = vmatmul.f32.gmra.mxu0 %v5989_v17  ;;  %v6002_v17 = vld [vmem:[#allocation35_spill] sm:$0xff] }
 0x2bd   : > { %v2223_v25 = vadd.f32 %v2222_v14, %v2150_v52 }
 0x2bf   : > { %2792 = vmatmul.f32.gmra.mxu1 %v5990_v46 }
 0x2c1   : > { %2654 = vmatmul.f32.gmra.mxu3 %v5060_v12 }
 0x2c2   : > { %2544 = vmatmul.f32.gmra.mxu2 %v5991_v47  ;;  %v2227_v21 = vpop.f32.mrf.mxu2 }
 0x2c3   : > { %v5460_v57 = vpop.f32.mrf.mxu0  ;;  %v5462_v51 = vpop.f32.mrf.mxu1 }
 0x2c4   : > { %2724 = vmatmul.f32.gmra.mxu0 %v5992_v45 }
 0x2c7   : > { %2798 = vmatmul.f32.gmra.mxu1 %v5993_v55 }
 0x2c9   : > { %2658 = vmatmul.f32.gmra.mxu3 %v5090_v1 }
 0x2ca   : > { %2552 = vmatmul.f32.gmra.mxu2 %v5994_v18  ;;  %v2232_v48 = vpop.f32.mrf.mxu2 }
 0x2cb   : > { %v5468_v59 = vpop.f32.mrf.mxu0  ;;  %v5470_v39 = vpop.f32.mrf.mxu1 }
 0x2cc   : > { %2729 = vmatmul.f32.gmra.mxu0 %v5995_v29 }
 0x2cf   : > { %2804 = vmatmul.f32.gmra.mxu1 %v5996_v34 }
 0x2d1   : > { %2662 = vmatmul.f32.gmra.mxu3 %v5118_v20 }
 0x2d2   : > { %2560 = vmatmul.f32.gmra.mxu2 %v5184_v27  ;;  %v2295_v27 = vpop.f32.mrf.mxu3  ;;  %v2237_v34 = vpop.f32.mrf.mxu2 }
 0x2d3   : > { %v5476_v13 = vpop.f32.mrf.mxu0  ;;  %v5478_v42 = vpop.f32.mrf.mxu1  ;;  %v2296_v18 = vadd.f32 %v2295_v27, %v2223_v25 }
 0x2d4   : > { %2734 = vmatmul.f32.gmra.mxu0 %v5997_v30 }
 0x2d7   : > { %2810 = vmatmul.f32.gmra.mxu1 %v5998_v37 }
 0x2d9   : > { %2666 = vmatmul.f32.gmra.mxu3 %v5144_v54 }
 0x2da   : > { %2568 = vmatmul.f32.gmra.mxu2 %v5204_v41  ;;  %v2301_v41 = vpop.f32.mrf.mxu3 }
 0x2db   : > { %v5484_v23 = vpop.f32.mrf.mxu0  ;;  %v5486_v28 = vpop.f32.mrf.mxu1 }
 0x2dc   : > { %2739 = vmatmul.f32.gmra.mxu0 %v5999_v19 }
 0x2df   : > { %2816 = vmatmul.f32.gmra.mxu1 %v6000_v63 }
 0x2e1   : > { %2670 = vmatmul.f32.gmra.mxu3 %v5166_v53 }
 0x2e2   : > { %2576 = vmatmul.f32.gmra.mxu2 %v5220_v35  ;;  %v2154_v35 = vadd.f32 %v2153_v4, %v5421_v56  ;;  %v2307_v45 = vpop.f32.mrf.mxu3 }
 0x2e3   : > { %v2385_v58 = vpop.f32.mrf.mxu0  ;;  %v5492_v44 = vpop.f32.mrf.mxu1 }
 0x2e4   : > { %2744 = vmatmul.f32.gmra.mxu0 %v6001_v22  ;;  %v2228_v55 = vadd.f32 %v2227_v21, %v2154_v35  ;;  %v2242_v21 = vpop.f32.mrf.mxu2  ;;  %v2166_v35 = vadd.f32 %v5470_v39, %v5460_v57  ;;  %v6010_v39 = vld [vmem:[#allocation14_spill] sm:$0xff] }
 0x2e6   : > { %v2302_v2 = vadd.f32 %v2301_v41, %v2228_v55  ;;  %v6003_v55 = vld [vmem:[#allocation49_spill] sm:$0xff] }
 0x2e7   : > { %2822 = vmatmul.f32.gmra.mxu1 %v6002_v17 }
 0x2e9   : > { %2674 = vmatmul.f32.gmra.mxu3 %v5189_v49 }
 0x2ea   : > { %2882 = vmatmul.f32.vlgmr.msrb.gmra.mxu2 %v4993_v33  ;;  %v2313_v37 = vpop.f32.mrf.mxu3 }
 0x2eb   : > { %v2389_v46 = vpop.f32.mrf.mxu0  ;;  %v2447_v47 = vpop.f32.mrf.mxu1 }
 0x2ec   : > { %2749 = vmatmul.f32.gmra.mxu0 %v5177_v31  ;;  %v2390_v16 = vadd.f32 %v2389_v46, %v2296_v18  ;;  %v2386_v31 = vadd.f32 %v2385_v58, %v2290_v60  ;;  %v2158_v46 = vadd.f32 %v5454_v9, %v5437_v24  ;;  %v5517_v25 = vpop.f32.mrf.mxu2  ;;  %v6005_v18 = vld [vmem:[#allocation50_spill] sm:$0xff] }
 0x2ed   : > { %v6007_v24 = vld [vmem:[#allocation10_spill] sm:$0xff] }
 0x2ef   : > { %2828 = vmatmul.f32.gmra.mxu1 %v5187_v36 }
 0x2f1   : > { %2944 = vmatmul.f32.vlgmr.msrb.gmra.mxu3 %v4993_v33  ;;  %v2448_v33 = vadd.f32 %v2447_v47, %v2386_v31  ;;  %v6009_v31 = vld [vmem:[#allocation15_spill] sm:$0xff] }
 0x2f2   : > { %2886 = vmatmul.f32.gmra.mxu2 %v5013_v43  ;;  %v2319_v47 = vpop.f32.mrf.mxu3 }
 0x2f3   : > { %v2393_v29 = vpop.f32.mrf.mxu0  ;;  %v2451_v30 = vpop.f32.mrf.mxu1 }
 0x2f4   : > { %2754 = vmatmul.f32.gmra.mxu0 %v5197_v62  ;;  %v2452_v56 = vadd.f32 %v2451_v30, %v2390_v16  ;;  %v2394_v36 = vadd.f32 %v2393_v29, %v2302_v2  ;;  %v6006_v29 = vld [vmem:[#allocation11_spill] sm:$0xff]  ;;  %v2233_v16 = vadd.f32 %v2232_v48, %v2158_v46 }
 0x2f5   : > { %v1027_v30 = vadd.f32 %v6006_v29, %v6005_v18  ;;  %v6008_v2 = vld [vmem:[#allocation51_spill] sm:$0xff] }
 0x2f6   : > { %v2980_v19 = vmax.f32 %v2448_v33, %v2452_v56 }
 0x2f7   : > { %2834 = vmatmul.f32.gmra.mxu1 %v5207_v32 }
 0x2f9   : > { %2948 = vmatmul.f32.gmra.mxu3 %v5013_v43  ;;  %v2162_v43 = vadd.f32 %v5462_v51, %v5452_v10  ;;  %v6004_v10 = vld [vmem:[#allocation9_spill] sm:$0xff] }
 0x2fa   : > { %2890 = vmatmul.f32.gmra.mxu2 %v5036_v3  ;;  %v1023_v51 = vadd.f32 %v6004_v10, %v6003_v55  ;;  %v2252_v55 = vpop.f32.mrf.mxu2 }
 0x2fb   : > { %v2397_v4 = vpop.f32.mrf.mxu0  ;;  %v2455_v14 = vpop.f32.mrf.mxu1 }
 0x2fc   : > { %v2456_v27 = vadd.f32 %v2455_v14, %v2394_v36  ;;  %v5525_v9 = vadd.f32 %v6007_v24, %v1023_v51 }
 0x2fe   : > { %v2982_v63 = vmax.f32 %v2980_v19, %v2456_v27  ;;  %v6011_v19 = vld [vmem:[#allocation19_spill] sm:$0xff] }
 0x300   : > { %v2984_v62 = vsub.f32 %v2448_v33, %v2982_v63  ;;  %v2990_v22 = vsub.f32 %v2452_v56, %v2982_v63  ;;  %v2996_v41 = vsub.f32 %v2456_v27, %v2982_v63  ;;  %v1031_v56 = vadd.f32 %v6009_v31, %v6008_v2 }
 0x301   : > { %2952 = vmatmul.f32.gmra.mxu3 %v5036_v3  ;;  %v2238_v3 = vadd.f32 %v2237_v34, %v2162_v43  ;;  %v5531_v34 = vadd.f32 %v6010_v39, %v1027_v30  ;;  %v2243_v33 = vadd.f32 %v2242_v21, %v2166_v35 }
 0x302   : > { %2894 = vmatmul.f32.gmra.mxu2 %v5060_v12  ;;  %v2986_v32 = vmul.f32 1.442695, %v2984_v62  ;;  %v2992_v60 = vmul.f32 1.442695, %v2990_v22  ;;  %v2998_v58 = vmul.f32 1.442695, %v2996_v41  ;;  %v5534_v27 = vadd.f32 %v6011_v19, %v1031_v56 }
 0x303   : > { %v2401_v17 = vpop.f32.mrf.mxu0  ;;  %v2459_v52 = vpop.f32.mrf.mxu1  ;;  %v2314_v36 = vadd.f32 %v2313_v37, %v2238_v3  ;;  %v2308_v62 = vadd.f32 %v2307_v45, %v2233_v16  ;;  %v2320_v46 = vadd.f32 %v2319_v47, %v2243_v33 }
 0x304   : > { %3815 = vpow2.f32 %v2986_v32  ;;  %v2325_v37 = vpop.f32.mrf.mxu3  ;;  %v2257_v33 = vpop.f32.mrf.mxu2 }
 0x305   : > { %3817 = vpow2.f32 %v2992_v60  ;;  %v2398_v35 = vadd.f32 %v2397_v4, %v2308_v62 }
 0x306   : > { %3819 = vpow2.f32 %v2998_v58  ;;  %v2402_v58 = vadd.f32 %v2401_v17, %v2314_v36  ;;  %v2174_v36 = vadd.f32 %v5486_v28, %v5476_v13 }
 0x307   : > { %v2460_v45 = vadd.f32 %v2459_v52, %v2398_v35 }
 0x309   : > { %2956 = vmatmul.f32.gmra.mxu3 %v5060_v12 }
 0x30a   : > { %2898 = vmatmul.f32.gmra.mxu2 %v5090_v1  ;;  %v3816_v57 = vpop.eup %3815 }
 0x30b   : > { %v3818_v14 = vpop.eup %3817  ;;  %v2463_v48 = vpop.f32.mrf.mxu1  ;;  %v3014_v12 = vmul.f32 %v3816_v57, %v5525_v9 }
 0x30c   : > { %v3820_v63 = vpop.eup %3819  ;;  %v3002_v22 = vadd.f32 %v3818_v14, %v3816_v57  ;;  %v2405_v41 = vpop.f32.mrf.mxu0  ;;  %v3016_v43 = vmul.f32 %v3818_v14, %v5531_v34  ;;  %v2464_v3 = vadd.f32 %v2463_v48, %v2402_v58  ;;  %v2170_v48 = vadd.f32 %v5478_v42, %v5468_v59 }
 0x30d   : > { %v3020_v32 = vmul.f32 %v3820_v63, %v5534_v27  ;;  %v2406_v51 = vadd.f32 %v2405_v41, %v2320_v46 }
 0x30e   : > { %v3004_v60 = vadd.f32 %v3820_v63, %v3002_v22  ;;  %v3018_v21 = vadd.f32 %v3016_v43, %v3014_v12  ;;  %v3028_v29 = vmax.f32 %v2460_v45, %v2464_v3  ;;  %v2253_v63 = vadd.f32 %v2252_v55, %v2174_v36 }
 0x30f   : > { %v2248_v22 = vadd.f32 %v5517_v25, %v2170_v48 }
 0x310   : > { %3821 = vrcp.f32 %v3004_v60  ;;  %v3022_v10 = vadd.f32 %v3020_v32, %v3018_v21 }
 0x311   : > { %2960 = vmatmul.f32.gmra.mxu3 %v5090_v1  ;;  %v2331_v1 = vpop.f32.mrf.mxu3 }
 0x312   : > { %2902 = vmatmul.f32.gmra.mxu2 %v5118_v20  ;;  %v2332_v42 = vadd.f32 %v2331_v1, %v2253_v63 }
 0x313   : > { %v2467_v18 = vpop.f32.mrf.mxu1 }
 0x314   : > { %v2468_v30 = vadd.f32 %v2467_v18, %v2406_v51  ;;  %v2409_v17 = vpop.f32.mrf.mxu0 }
 0x316   : > { %v3822_v16 = vpop.eup %3821  ;;  %v3030_v24 = vmax.f32 %v3028_v29, %v2468_v30 }
 0x317   : > { %v3008_v47 = vmul.f32 %v3822_v16, %v3004_v60 }
 0x318   : > { %v3032_v2 = vsub.f32 %v2460_v45, %v3030_v24  ;;  %v3038_v31 = vsub.f32 %v2464_v3, %v3030_v24  ;;  %v3044_v56 = vsub.f32 %v2468_v30, %v3030_v24 }
 0x319   : > { %2964 = vmatmul.f32.gmra.mxu3 %v5118_v20  ;;  %v3010_v4 = vsub.f32 2.0, %v3008_v47  ;;  %v2178_v20 = vadd.f32 %v5492_v44, %v5484_v23  ;;  %v2337_v43 = vpop.f32.mrf.mxu3  ;;  %v2326_v44 = vadd.f32 %v2325_v37, %v2248_v22 }
 0x31a   : > { %2906 = vmatmul.f32.gmra.mxu2 %v5144_v54  ;;  %v3034_v57 = vmul.f32 1.442695, %v3032_v2  ;;  %v3040_v39 = vmul.f32 1.442695, %v3038_v31  ;;  %v3046_v52 = vmul.f32 1.442695, %v3044_v56 }
 0x31b   : > { %v3012_v14 = vmul.f32 %v3822_v16, %v3010_v4  ;;  %v2258_v59 = vadd.f32 %v2257_v33, %v2178_v20 }
 0x31c   : > { %3823 = vpow2.f32 %v3034_v57  ;;  %v2471_v19 = vpop.f32.mrf.mxu1 }
 0x31d   : > { %3825 = vpow2.f32 %v3040_v39  ;;  %v5547_v12 = vmul.f32 %v3022_v10, %v3012_v14  ;;  %v2338_v25 = vadd.f32 %v2337_v43, %v2258_v59  ;;  %v2410_v10 = vadd.f32 %v2409_v17, %v2326_v44 }
 0x31e   : > { %3827 = vpow2.f32 %v3046_v52 }
 0x31f   : > { %v2472_v51 = vadd.f32 %v2471_v19, %v2410_v10 }
 0x321   : > { %2968 = vmatmul.f32.gmra.mxu3 %v5144_v54  ;;  %v2413_v62 = vpop.f32.mrf.mxu0 }
 0x322   : > { %2910 = vmatmul.f32.gmra.mxu2 %v5166_v53  ;;  %v3824_v13 = vpop.eup %3823  ;;  %v2414_v21 = vadd.f32 %v2413_v62, %v2332_v42 }
 0x323   : > { %v3826_v28 = vpop.eup %3825  ;;  %v3062_v41 = vmul.f32 %v3824_v13, %v5525_v9 }
 0x324   : > { %v3828_v32 = vpop.eup %3827  ;;  %v3064_v60 = vmul.f32 %v3826_v28, %v5531_v34  ;;  %v2513_v58 = vpop.f32.mrf.mxu2  ;;  %v3050_v55 = vadd.f32 %v3826_v28, %v3824_v13 }
 0x325   : > { %v2475_v23 = vpop.f32.mrf.mxu1  ;;  %v3068_v54 = vmul.f32 %v3828_v32, %v5534_v27 }
 0x326   : > { %v3066_v46 = vadd.f32 %v3064_v60, %v3062_v41  ;;  %v2476_v45 = vadd.f32 %v2475_v23, %v2414_v21  ;;  %v3052_v16 = vadd.f32 %v3828_v32, %v3050_v55 }
 0x328   : > { %v3070_v3 = vadd.f32 %v3068_v54, %v3066_v46  ;;  %v3076_v24 = vmax.f32 %v2472_v51, %v2476_v45  ;;  %3829 = vrcp.f32 %v3052_v16 }
 0x329   : > { %2972 = vmatmul.f32.gmra.mxu3 %v5166_v53  ;;  %v2417_v35 = vpop.f32.mrf.mxu0 }
 0x32a   : > { %2914 = vmatmul.f32.gmra.mxu2 %v5189_v49  ;;  %v2418_v18 = vadd.f32 %v2417_v35, %v2338_v25 }
 0x32c   : > { %v2643_v29 = vpop.f32.mrf.mxu3 }
 0x32d   : > { %v5559_v30 = vpop.f32.mrf.mxu2  ;;  %v2479_v37 = vpop.f32.mrf.mxu1  ;;  %v2644_v2 = vadd.f32 %v2643_v29, %v2513_v58 }
 0x32e   : > { %v2480_v47 = vadd.f32 %v2479_v37, %v2418_v18  ;;  %v3830_v48 = vpop.eup %3829 }
 0x330   : > { %v3078_v31 = vmax.f32 %v3076_v24, %v2480_v47 }
 0x331   : > { %2976 = vmatmul.f32.gmra.mxu3 %v5189_v49  ;;  %v2715_v53 = vpop.f32.mrf.mxu0  ;;  %v3056_v49 = vmul.f32 %v3830_v48, %v3052_v16 }
 0x332   : > { %v3080_v56 = vsub.f32 %v2472_v51, %v3078_v31  ;;  %v3086_v17 = vsub.f32 %v2476_v45, %v3078_v31  ;;  %v3092_v1 = vsub.f32 %v2480_v47, %v3078_v31  ;;  %v2716_v33 = vadd.f32 %v2715_v53, %v2644_v2 }
 0x333   : > { %v3058_v42 = vsub.f32 2.0, %v3056_v49 }
 0x334   : > { %v3082_v4 = vmul.f32 1.442695, %v3080_v56  ;;  %v3088_v57 = vmul.f32 1.442695, %v3086_v17  ;;  %v3094_v39 = vmul.f32 1.442695, %v3092_v1  ;;  %v5562_v52 = vpop.f32.mrf.mxu3 }
 0x335   : > { %v5564_v36 = vpop.f32.mrf.mxu2  ;;  %v2787_v14 = vpop.f32.mrf.mxu1  ;;  %v3060_v23 = vmul.f32 %v3830_v48, %v3058_v42 }
 0x336   : > { %3831 = vpow2.f32 %v3082_v4  ;;  %v5566_v19 = vadd.f32 %v2787_v14, %v2716_v33 }
 0x337   : > { %3833 = vpow2.f32 %v3088_v57  ;;  %v3072_v21 = vmul.f32 %v3070_v3, %v3060_v23 }
 0x338   : > { %3835 = vpow2.f32 %v3094_v39 }
 0x339   : > { %v3157_v55 = vand.u32 4294901760, %v3072_v21 }
 0x33b   : > { %v3206_v29 = vsub.f32 %v3072_v21, %v3157_v55 }
 0x33c   : > { %v3832_v20 = vpop.eup %3831  ;;  %v5568_v63 = vpop.f32.mrf.mxu3 }
 0x33d   : > { %v3834_v62 = vpop.eup %3833  ;;  %v3110_v22 = vmul.f32 %v3832_v20, %v5525_v9  ;;  %v2537_v13 = vpop.f32.mrf.mxu2  ;;  %v3207_v3 = vand.u32 4294901760, %v3206_v29  ;;  %v2652_v21 = vadd.f32 %v5568_v63, %v5564_v36  ;;  %v6014_v36 = vld [vmem:[#allocation17_spill] sm:$0xff]  ;;  %v6015_v63 = vld [vmem:[#allocation12_spill] sm:$0xff] }
 0x33e   : > { %v3836_v28 = vpop.eup %3835  ;;  %v3098_v41 = vadd.f32 %v3834_v62, %v3832_v20  ;;  %v3112_v59 = vmul.f32 %v3834_v62, %v5531_v34  ;;  %v2720_v20 = vpop.f32.mrf.mxu0 }
 0x33f   : > { %v3116_v32 = vmul.f32 %v3836_v28, %v5534_v27  ;;  %v3159_v27 = vand.u32 4294901760, %v5547_v12  ;;  %v3208_v1 = vsub.f32 %v3206_v29, %v3207_v3 }
 0x340   : > { %v3100_v43 = vadd.f32 %v3836_v28, %v3098_v41  ;;  %v3114_v60 = vadd.f32 %v3112_v59, %v3110_v22 }
 0x341   : > { %v3212_v16 = vsub.f32 %v5547_v12, %v3159_v27  ;;  %v3209_v57 = vand.u32 4294901760, %v3208_v1  ;;  %v6017_v1 = vld [vmem:[#allocation16_spill] sm:$0xff] }
 0x342   : > { %3837 = vrcp.f32 %v3100_v43  ;;  %v3118_v58 = vadd.f32 %v3116_v32, %v3114_v60 }
 0x343   : > { %v3213_v56 = vand.u32 4294901760, %v3212_v16 }
 0x344   : > { %v2655_v44 = vpop.f32.mrf.mxu3 }
 0x345   : > { %v2545_v54 = vpop.f32.mrf.mxu2  ;;  %v5573_v46 = vadd.f32 %v2655_v44, %v2537_v13  ;;  %v3214_v4 = vsub.f32 %v3212_v16, %v3213_v56  ;;  %v2793_v13 = vpop.f32.mrf.mxu1  ;;  %v2648_v44 = vadd.f32 %v5562_v52, %v5559_v30  ;;  %v6012_v30 = vld [vmem:[#allocation13_spill] sm:$0xff]  ;;  %v6013_v52 = vld [vmem:[#allocation8_spill] sm:$0xff] }
 0x347   : > { %v3215_v48 = vand.u32 4294901760, %v3214_v4 }
 0x348   : > { %v3838_v25 = vpop.eup %3837 }
 0x349   : > { %v3104_v9 = vmul.f32 %v3838_v25, %v3100_v43  ;;  %v2725_v43 = vpop.f32.mrf.mxu0 }
 0x34b   : > { %v3106_v35 = vsub.f32 2.0, %v3104_v9 }
 0x34c   : > { %v2659_v10 = vpop.f32.mrf.mxu3 }
 0x34d   : > { %v2553_v45 = vpop.f32.mrf.mxu2  ;;  %v5575_v34 = vadd.f32 %v2659_v10, %v2545_v54  ;;  %v3108_v51 = vmul.f32 %v3838_v25, %v3106_v35  ;;  %v2799_v32 = vpop.f32.mrf.mxu1  ;;  %v2721_v25 = vadd.f32 %v2720_v20, %v2648_v44 }
 0x34f   : > { %v3120_v18 = vmul.f32 %v3118_v58, %v3108_v51 }
 0x351   : > { %v3155_v37 = vand.u32 4294901760, %v3120_v18  ;;  %v2730_v54 = vpop.f32.mrf.mxu0 }
 0x353   : > { %3156 = vmatpush.msra.mxu0 %v3155_v37  ;;  %3282 = vmatpush.msra.mxu3 %v3155_v37  ;;  %v3200_v24 = vsub.f32 %v3120_v18, %v3155_v37 }
 0x354   : > { %v2663_v47 = vpop.f32.mrf.mxu3 }
 0x355   : > { %v2561_v2 = vpop.f32.mrf.mxu2  ;;  %v5579_v31 = vadd.f32 %v2663_v47, %v2553_v45  ;;  %3158 = vmatpush.msra.mxu0 %v3157_v55  ;;  %3245 = vmatpush.msra.mxu2 %v3200_v24  ;;  %v3201_v53 = vand.u32 4294901760, %v3200_v24  ;;  %v2805_v9 = vpop.f32.mrf.mxu1  ;;  %v2726_v45 = vadd.f32 %v2725_v43, %v2652_v21  ;;  %v1431_v47 = vadd.f32 %v6013_v52, %v6012_v30 }
 0x356   : > { %3284 = vmatpush.msra.mxu3 %v3157_v55 }
 0x357   : > { %3160 = vmatpush.msra.mxu0 %v3159_v27  ;;  %3248 = vmatpush.msra.mxu2 %v3206_v29  ;;  %v3202_v17 = vsub.f32 %v3200_v24, %v3201_v53  ;;  %v1557_v4 = vadd.f32 %v5266_v26, %v1431_v47 }
 0x358   : > { %3286 = vmatpush.msra.mxu3 %v3159_v27 }
 0x359   : > { %3322 = vmatpush.msrb.mxu0 %v3201_v53  ;;  %3251 = vmatpush.msra.mxu2 %v3212_v16  ;;  %v3203_v12 = vand.u32 4294901760, %v3202_v17  ;;  %v2735_v18 = vpop.f32.mrf.mxu0  ;;  %v1435_v53 = vadd.f32 %v6015_v63, %v6014_v36  ;;  %v6016_v17 = vld [vmem:[#allocation18_spill] sm:$0xff]  ;;  %v3125_v63 = vld [vmem:[%s5786_s2 + $0x8] sm:$0xff] }
 0x35b   : > { %3326 = vmatpush.msrb.mxu0 %v3207_v3  ;;  %3204 = vmatpush.msra.mxu1 %v3203_v12  ;;  %v1439_v12 = vadd.f32 %v6017_v1, %v6016_v17  ;;  %v3137_v17 = vsel %vm281_vm0, %v3125_v63, 0 }
 0x35c   : > { %v2667_v39 = vpop.f32.mrf.mxu3 }
 0x35d   : > { %3330 = vmatpush.msrb.mxu0 %v3213_v56  ;;  %v2569_v33 = vpop.f32.mrf.mxu2  ;;  %v5581_v14 = vadd.f32 %v2667_v39, %v2561_v2  ;;  %3210 = vmatpush.msra.mxu1 %v3209_v57  ;;  %v2811_v2 = vpop.f32.mrf.mxu1  ;;  %v1562_v57 = vadd.f32 %v5276_v6, %v1435_v53  ;;  %v1567_v20 = vadd.f32 %v5321_v0, %v1439_v12  ;;  %v5645_v12 = vand.u32 4294901760, %v3137_v17 }
 0x35e   : > { %v2736_v0 = vadd.f32 %v2735_v18, %v5575_v34 }
 0x35f   : > { %3216 = vmatpush.msra.mxu1 %v3215_v48 }
 0x360   : > { %v2812_v44 = vadd.f32 %v2811_v2, %v2736_v0 }
 0x361   : > { %3358 = vmatpush.msrb.mxu1 %v3155_v37 }
 0x363   : > { %3360 = vmatpush.msrb.mxu1 %v3157_v55  ;;  %v2794_v55 = vadd.f32 %v2793_v13, %v2721_v25 }
 0x364   : > { %v2671_v49 = vpop.f32.mrf.mxu3 }
 0x365   : > { %3362 = vmatpush.msrb.mxu1 %v3159_v27  ;;  %v2577_v62 = vpop.f32.mrf.mxu2  ;;  %v5583_v22 = vadd.f32 %v2671_v49, %v2569_v33  ;;  %v1701_v49 = vadd.f32 %v5280_v7, %v1557_v4 }
 0x367   : > { %v1815_v6 = vadd.f32 %v5397_v40, %v1701_v49 }
 0x36c   : > { %v2675_v28 = vpop.f32.mrf.mxu3 }
 0x36d   : > { %v5585_v41 = vadd.f32 %v2675_v28, %v2577_v62  ;;  %v2883_v59 = vpop.f32.mrf.mxu2  ;;  %v1707_v62 = vadd.f32 %v5330_v15, %v1562_v57 }
 0x36e   : > { %v2884_v42 = vadd.f32 %v2883_v59, %v5566_v19  ;;  %v2800_v19 = vadd.f32 %v2799_v32, %v2726_v45  ;;  %v2740_v32 = vpop.f32.mrf.mxu0 }
 0x36f   : > { %v1819_v7 = vadd.f32 %v5423_v5, %v1707_v62 }
 0x371   : > { %v5613_v40 = vadd.f32 %v5430_v61, %v1819_v7  ;;  %v3126_v7 = vld [vmem:[%s5786_s2 + $0x10] sm:$0xff] }
 0x372   : > { %v3140_v0 = vsel %vm281_vm0, %v3126_v7, 0 }
 0x374   : > { %v2945_v60 = vpop.f32.mrf.mxu3 }
 0x375   : > { %v2887_v58 = vpop.f32.mrf.mxu2  ;;  %v2946_v23 = vadd.f32 %v2945_v60, %v2884_v42  ;;  %v1713_v42 = vadd.f32 %v5382_v50, %v1567_v20  ;;  %v2731_v60 = vadd.f32 %v2730_v54, %v5573_v46  ;;  %v5610_v50 = vadd.f32 %v5409_v8, %v1815_v6 }
 0x376   : > { %v2888_v51 = vadd.f32 %v2887_v58, %v2794_v55  ;;  %v2745_v18 = vpop.f32.mrf.mxu0 }
 0x377   : > { %v1823_v15 = vadd.f32 %v5441_v38, %v1713_v42  ;;  %v2806_v58 = vadd.f32 %v2805_v9, %v2731_v60  ;;  %v3124_v9 = vld [vmem:[%s5786_s2] sm:$0xff] }
 0x379   : > { %v5616_v5 = vadd.f32 %v5447_v11, %v1823_v15  ;;  %v2746_v15 = vadd.f32 %v2745_v18, %v5581_v14 }
 0x37c   : > { %v2949_v35 = vpop.f32.mrf.mxu3 }
 0x37d   : > { %v2891_v10 = vpop.f32.mrf.mxu2  ;;  %v2950_v27 = vadd.f32 %v2949_v35, %v2888_v51  ;;  %v3134_v51 = vsel %vm281_vm0, %v3124_v9, 0 }
 0x37e   : > { %v2892_v29 = vadd.f32 %v2891_v10, %v2800_v19  ;;  %v5625_v11 = vand.u32 4294901760, %v3134_v51 }
 0x37f   : > { %v2981_v16 = vmax.f32 %v2946_v23, %v2950_v27 }
 0x380   : > { %3218 = vmatmul.f32.vlgmr.msra.gmra.mxu1 %v5625_v11 }
 0x384   : > { %v2953_v37 = vpop.f32.mrf.mxu3 }
 0x385   : > { %v2895_v24 = vpop.f32.mrf.mxu2  ;;  %v2954_v3 = vadd.f32 %v2953_v37, %v2892_v29 }
 0x386   : > { %v2896_v21 = vadd.f32 %v2895_v24, %v2806_v58  ;;  %v5630_v24 = vsub.f32 %v3134_v51, %v5625_v11 }
 0x387   : > { %v2983_v56 = vmax.f32 %v2981_v16, %v2954_v3 }
 0x388   : > { %v5633_v47 = vand.u32 4294901760, %v5630_v24  ;;  %3254 = vmatmul.f32.vlgmr.msra.gmra.mxu2 %v5630_v24  ;;  %3222 = vmatmul.f32.gmra.mxu1 %v5645_v12 }
 0x389   : > { %v2985_v39 = vsub.f32 %v2946_v23, %v2983_v56  ;;  %v2991_v33 = vsub.f32 %v2950_v27, %v2983_v56  ;;  %v2997_v48 = vsub.f32 %v2954_v3, %v2983_v56  ;;  %v2817_v23 = vpop.f32.mrf.mxu1  ;;  %v2741_v27 = vadd.f32 %v2740_v32, %v5579_v31 }
 0x38a   : > { %v3164_v36 = vsub.f32 %v5630_v24, %v5633_v47  ;;  %3290 = vmatmul.f32.vlgmr.msra.gmra.mxu3 %v5633_v47 }
 0x38b   : > { %v2988_v13 = vmul.f32 1.442695, %v2985_v39  ;;  %v2994_v28 = vmul.f32 1.442695, %v2991_v33  ;;  %v3000_v59 = vmul.f32 1.442695, %v2997_v48  ;;  %v2818_v3 = vadd.f32 %v2817_v23, %v2741_v27  ;;  %v2750_v48 = vpop.f32.mrf.mxu0 }
 0x38c   : > { %v2957_v43 = vpop.f32.mrf.mxu3  ;;  %v5643_v1 = vand.u32 4294901760, %v3164_v36  ;;  %v5649_v33 = vsub.f32 %v3137_v17, %v5645_v12 }
 0x38d   : > { %3839 = vpow2.f32 %v2988_v13  ;;  %v2899_v26 = vpop.f32.mrf.mxu2  ;;  %v2958_v35 = vadd.f32 %v2957_v43, %v2896_v21  ;;  %v2751_v21 = vadd.f32 %v2750_v48, %v5583_v22 }
 0x38e   : > { %3841 = vpow2.f32 %v2994_v28  ;;  %v2900_v46 = vadd.f32 %v2899_v26, %v2812_v44  ;;  %3166 = vmatmul.f32.vlgmr.msra.gmra.mxu0 %v5643_v1  ;;  %v5654_v28 = vand.u32 4294901760, %v5649_v33 }
 0x38f   : > { %3843 = vpow2.f32 %v3000_v59 }
 0x390   : > { %3259 = vmatmul.f32.gmra.mxu2 %v5649_v33  ;;  %v3172_v60 = vsub.f32 %v5649_v33, %v5654_v28 }
 0x391   : > { %v2823_v52 = vpop.f32.mrf.mxu1 }
 0x392   : > { %3296 = vmatmul.f32.gmra.mxu3 %v5654_v28  ;;  %v5666_v44 = vand.u32 4294901760, %v3172_v60 }
 0x393   : > { %v3840_v25 = vpop.eup %3839 }
 0x394   : > { %v3842_v54 = vpop.eup %3841  ;;  %v3015_v34 = vmul.f32 %v3840_v25, %v5610_v50  ;;  %v2961_v38 = vpop.f32.mrf.mxu3 }
 0x395   : > { %v3844_v8 = vpop.eup %3843  ;;  %v3003_v55 = vadd.f32 %v3842_v54, %v3840_v25  ;;  %v3017_v10 = vmul.f32 %v3842_v54, %v5613_v40  ;;  %v2903_v45 = vpop.f32.mrf.mxu2  ;;  %v2962_v61 = vadd.f32 %v2961_v38, %v2900_v46  ;;  %v5669_v25 = vand.u32 4294901760, %v3140_v0 }
 0x396   : > { %v3021_v19 = vmul.f32 %v3844_v8, %v5616_v5  ;;  %v2904_v2 = vadd.f32 %v2903_v45, %v2818_v3  ;;  %v2824_v46 = vadd.f32 %v2823_v52, %v2746_v15  ;;  %3174 = vmatmul.f32.gmra.mxu0 %v5666_v44  ;;  %v2755_v38 = vpop.f32.mrf.mxu0 }
 0x397   : > { %v3005_v29 = vadd.f32 %v3844_v8, %v3003_v55  ;;  %v3029_v37 = vmax.f32 %v2958_v35, %v2962_v61  ;;  %v3019_v16 = vadd.f32 %v3017_v10, %v3015_v34  ;;  %v5673_v34 = vsub.f32 %v3140_v0, %v5669_v25  ;;  %3226 = vmatmul.f32.gmra.mxu1 %v5669_v25 }
 0x399   : > { %3845 = vrcp.f32 %v3005_v29  ;;  %v3023_v30 = vadd.f32 %v3021_v19, %v3019_v16  ;;  %v2829_v32 = vpop.f32.mrf.mxu1  ;;  %3264 = vmatmul.f32.gmra.mxu2 %v5673_v34  ;;  %v5678_v22 = vand.u32 4294901760, %v5673_v34 }
 0x39a   : > { %v2830_v54 = vadd.f32 %v2829_v32, %v2751_v21 }
 0x39b   : > { %v3180_v18 = vsub.f32 %v5673_v34, %v5678_v22  ;;  %3302 = vmatmul.f32.gmra.mxu3 %v5678_v22 }
 0x39c   : > { %v2965_v31 = vpop.f32.mrf.mxu3 }
 0x39d   : > { %v2907_v53 = vpop.f32.mrf.mxu2  ;;  %v2966_v56 = vadd.f32 %v2965_v31, %v2904_v2  ;;  %v5687_v2 = vand.u32 4294901760, %v3180_v18 }
 0x39e   : > { %v2908_v14 = vadd.f32 %v2907_v53, %v2824_v46  ;;  %v3949_v46 = vmov 0  }
 0x39f   : > { %v3846_v4 = vpop.eup %3845  ;;  %v3031_v57 = vmax.f32 %v3029_v37, %v2966_v56  ;;  %3182 = vmatmul.f32.gmra.mxu0 %v5687_v2  ;;  %3364 = vmatmul.f32.vlgmr.msrb.gmra.mxu1 %v5625_v11 }
 0x3a0   : > { %v3009_v39 = vmul.f32 %v3846_v4, %v3005_v29  ;;  %v2756_v29 = vadd.f32 %v2755_v38, %v5585_v41  ;;  %3813 = vset.pattern.permute.xlu0 %v3949_v46  ;;  %3814 = vset.pattern.permute.xlu1 %v3949_v46 }
 0x3a1   : > { %v3033_v49 = vsub.f32 %v2958_v35, %v3031_v57  ;;  %v3039_v20 = vsub.f32 %v2962_v61, %v3031_v57  ;;  %v3045_v62 = vsub.f32 %v2966_v56, %v3031_v57  ;;  %v2835_v37 = vpop.f32.mrf.mxu1 }
 0x3a2   : > { %v3011_v13 = vsub.f32 2.0, %v3009_v39  ;;  %v2836_v36 = vadd.f32 %v2835_v37, %v2756_v29 }
 0x3a3   : > { %v3036_v59 = vmul.f32 1.442695, %v3033_v49  ;;  %v3042_v42 = vmul.f32 1.442695, %v3039_v20  ;;  %v3048_v43 = vmul.f32 1.442695, %v3045_v62 }
 0x3a4   : > { %v2969_v26 = vpop.f32.mrf.mxu3  ;;  %v3013_v6 = vmul.f32 %v3846_v4, %v3011_v13 }
 0x3a5   : > { %3847 = vpow2.f32 %v3036_v59  ;;  %v2911_v58 = vpop.f32.mrf.mxu2  ;;  %v2970_v10 = vadd.f32 %v2969_v26, %v2908_v14 }
 0x3a6   : > { %3849 = vpow2.f32 %v3042_v42  ;;  %v5664_v23 = vmul.f32 %v3023_v30, %v3013_v6  ;;  %v2912_v9 = vadd.f32 %v2911_v58, %v2830_v54  ;;  %v3616_v54 = vld [vmem:[%s5787_s3] sm:$0xff] }
 0x3a7   : > { %3851 = vpow2.f32 %v3048_v43  ;;  %3332 = vmatmul.f32.vlgmr.msrb.gmra.mxu0 %v5625_v11  ;;  %3368 = vmatmul.f32.gmra.mxu1 %v5645_v12 }
 0x3a8   : > { %3621 = vperm.xlu0 %3813, %v3616_v54  }
 0x3ab   : > { %v3848_v35 = vpop.eup %3847 }
 0x3ac   : > { %v3850_v8 = vpop.eup %3849  ;;  %v3063_v55 = vmul.f32 %v3848_v35, %v5610_v50  ;;  %v2973_v45 = vpop.f32.mrf.mxu3 }
 0x3ad   : > { %v3852_v61 = vpop.eup %3851  ;;  %v3051_v51 = vadd.f32 %v3850_v8, %v3848_v35  ;;  %v3065_v19 = vmul.f32 %v3850_v8, %v5613_v40  ;;  %v2974_v27 = vadd.f32 %v2973_v45, %v2912_v9  ;;  %v2915_v31 = vpop.f32.mrf.mxu2  ;;  %v3393_v8 = vand.u32 4294901760, %v5664_v23 }
 0x3ae   : > { %v3069_v16 = vmul.f32 %v3852_v61, %v5616_v5  ;;  %v2916_v53 = vadd.f32 %v2915_v31, %v2836_v36 }
 0x3af   : > { %v3053_v3 = vadd.f32 %v3852_v61, %v3051_v51  ;;  %v3077_v30 = vmax.f32 %v2970_v10, %v2974_v27  ;;  %v3067_v52 = vadd.f32 %v3065_v19, %v3063_v55  ;;  %3336 = vmatmul.f32.gmra.mxu0 %v5645_v12  ;;  %3372 = vmatmul.f32.gmra.mxu1 %v5669_v25  ;;  %v3618_v51 = vld [vmem:[%s5787_s3 + $0x10] sm:$0xff] }
 0x3b0   : > { %v3446_v61 = vsub.f32 %v5664_v23, %v3393_v8  ;;  %3631 = vperm.xlu1 %3814, %v3618_v51  }
 0x3b1   : > { %3853 = vrcp.f32 %v3053_v3  ;;  %v3071_v63 = vadd.f32 %v3069_v16, %v3067_v52 }
 0x3b2   : > { %v3447_v29 = vand.u32 4294901760, %v3446_v61 }
 0x3b4   : > { %v2977_v56 = vpop.f32.mrf.mxu3 }
 0x3b5   : > { %v2978_v17 = vadd.f32 %v2977_v56, %v2916_v53 }
 0x3b7   : > { %v3854_v41 = vpop.eup %3853  ;;  %v3079_v4 = vmax.f32 %v3077_v30, %v2978_v17  ;;  %3340 = vmatmul.f32.gmra.mxu0 %v5669_v25 }
 0x3b8   : > { %v3057_v57 = vmul.f32 %v3854_v41, %v3053_v3  ;;  %v3448_v3 = vsub.f32 %v3446_v61, %v3447_v29 }
 0x3b9   : > { %v3081_v39 = vsub.f32 %v2970_v10, %v3079_v4  ;;  %v3087_v48 = vsub.f32 %v2974_v27, %v3079_v4  ;;  %v3093_v49 = vsub.f32 %v2978_v17, %v3079_v4 }
 0x3ba   : > { %v3059_v20 = vsub.f32 2.0, %v3057_v57  ;;  %v3449_v52 = vand.u32 4294901760, %v3448_v3 }
 0x3bb   : > { %v3084_v62 = vmul.f32 1.442695, %v3081_v39  ;;  %v3090_v13 = vmul.f32 1.442695, %v3087_v48  ;;  %v3096_v59 = vmul.f32 1.442695, %v3093_v49 }
 0x3bc   : > { %v3061_v42 = vmul.f32 %v3854_v41, %v3059_v20  ;;  %v3863_v39 = vld [vmem:[%s4060_s17] sm:$0xff] }
 0x3bd   : > { %3855 = vpow2.f32 %v3084_v62 }
 0x3be   : > { %3857 = vpow2.f32 %v3090_v13  ;;  %v3073_v43 = vmul.f32 %v3071_v63, %v3061_v42 }
 0x3bf   : > { %3859 = vpow2.f32 %v3096_v59 }
 0x3c0   : > { %v3391_v38 = vand.u32 4294901760, %v3073_v43 }
 0x3c2   : > { %v3440_v10 = vsub.f32 %v3073_v43, %v3391_v38 }
 0x3c3   : > { %v3856_v32 = vpop.eup %3855 }
 0x3c4   : > { %v3858_v26 = vpop.eup %3857  ;;  %v3111_v6 = vmul.f32 %v3856_v32, %v5610_v50  ;;  %v3441_v27 = vand.u32 4294901760, %v3440_v10 }
 0x3c5   : > { %v3860_v60 = vpop.eup %3859  ;;  %v3099_v7 = vadd.f32 %v3858_v26, %v3856_v32  ;;  %v3113_v0 = vmul.f32 %v3858_v26, %v5613_v40  ;;  %v3617_v40 = vld [vmem:[%s5787_s3 + $0x8] sm:$0xff] }
 0x3c6   : > { %v3117_v15 = vmul.f32 %v3860_v60, %v5616_v5  ;;  %3626 = vperm.xlu0 %3813, %v3617_v40   ;;  %v3442_v16 = vsub.f32 %v3440_v10, %v3441_v27 }
 0x3c7   : > { %v3101_v58 = vadd.f32 %v3860_v60, %v3099_v7  ;;  %v3115_v21 = vadd.f32 %v3113_v0, %v3111_v6  ;;  %v3864_v7 = vld [vmem:[%s4060_s17 + $0x10] sm:$0xff] }
 0x3c8   : > { %v3443_v30 = vand.u32 4294901760, %v3442_v16 }
 0x3c9   : > { %3861 = vrcp.f32 %v3101_v58  ;;  %v3119_v14 = vadd.f32 %v3117_v15, %v3115_v21 }
 0x3cf   : > { %v3862_v50 = vpop.eup %3861 }
 0x3d0   : > { %v3105_v35 = vmul.f32 %v3862_v50, %v3101_v58 }
 0x3d2   : > { %v3107_v5 = vsub.f32 2.0, %v3105_v35 }
 0x3d4   : > { %v3109_v9 = vmul.f32 %v3862_v50, %v3107_v5  ;;  %v3865_v50 = vld [vmem:[%s4060_s17 + $0x20] sm:$0xff] }
 0x3d6   : > { %v3121_v55 = vmul.f32 %v3119_v14, %v3109_v9 }
 0x3d8   : > { %v3389_v45 = vand.u32 4294901760, %v3121_v55 }
 0x3da   : > { %3390 = vmatpush.msrb.mxu2 %v3389_v45  ;;  %3516 = vmatpush.msra.mxu1 %v3389_v45  ;;  %v3434_v19 = vsub.f32 %v3121_v55, %v3389_v45 }
 0x3dc   : > { %3392 = vmatpush.msrb.mxu2 %v3391_v38  ;;  %3479 = vmatpush.msra.mxu0 %v3434_v19  ;;  %v3435_v18 = vand.u32 4294901760, %v3434_v19 }
 0x3dd   : > { %3518 = vmatpush.msra.mxu1 %v3391_v38 }
 0x3de   : > { %3394 = vmatpush.msrb.mxu2 %v3393_v8  ;;  %3482 = vmatpush.msra.mxu0 %v3440_v10  ;;  %v3436_v37 = vsub.f32 %v3434_v19, %v3435_v18 }
 0x3df   : > { %3520 = vmatpush.msra.mxu1 %v3393_v8  ;;  %3400 = vmatmul.f32.vlgmr.msrb.gmra.mxu2 %v5643_v1 }
 0x3e0   : > { %3556 = vmatpush.msra.mxu2 %v3435_v18  ;;  %3485 = vmatpush.msra.mxu0 %v3446_v61  ;;  %v3437_v23 = vand.u32 4294901760, %v3436_v37 }
 0x3e1   : > { %3488 = vmatmul.f32.vlgmr.msra.gmra.mxu0 %v5630_v24  ;;  %3524 = vmatmul.f32.vlgmr.msra.gmra.mxu1 %v5633_v47 }
 0x3e2   : > { %3560 = vmatpush.msra.mxu2 %v3441_v27  ;;  %3438 = vmatpush.msrb.mxu3 %v3437_v23 }
 0x3e4   : > { %3564 = vmatpush.msra.mxu2 %v3447_v29  ;;  %3444 = vmatpush.msrb.mxu3 %v3443_v30 }
 0x3e6   : > { %3450 = vmatpush.msrb.mxu3 %v3449_v52 }
 0x3e7   : > { %3452 = vmatmul.f32.vlgmr.msrb.gmra.mxu3 %v5625_v11  ;;  %3408 = vmatmul.f32.gmra.mxu2 %v5666_v44 }
 0x3e8   : > { %3592 = vmatpush.msra.mxu3 %v3389_v45 }
 0x3e9   : > { %3493 = vmatmul.f32.gmra.mxu0 %v5649_v33  ;;  %3530 = vmatmul.f32.gmra.mxu1 %v5654_v28 }
 0x3ea   : > { %3594 = vmatpush.msra.mxu3 %v3391_v38 }
 0x3ec   : > { %3596 = vmatpush.msra.mxu3 %v3393_v8 }
 0x3ef   : > { %3456 = vmatmul.f32.gmra.mxu3 %v5645_v12  ;;  %3416 = vmatmul.f32.gmra.mxu2 %v5687_v2 }
 0x3f1   : > { %3498 = vmatmul.f32.gmra.mxu0 %v5673_v34  ;;  %3536 = vmatmul.f32.gmra.mxu1 %v5678_v22 }
 0x3f7   : > { %3460 = vmatmul.f32.gmra.mxu3 %v5669_v25  ;;  %3566 = vmatmul.f32.vlgmr.msra.gmra.mxu2 %v5625_v11 }
 0x3fd   : > { %v3219_v24 = vpop.f32.mrf.mxu1 }
 0x3ff   : > { %3598 = vmatmul.f32.vlgmr.msra.gmra.mxu3 %v5625_v11  ;;  %3570 = vmatmul.f32.gmra.mxu2 %v5645_v12 }
 0x405   : > { %v3223_v1 = vpop.f32.mrf.mxu1 }
 0x407   : > { %3602 = vmatmul.f32.gmra.mxu3 %v5645_v12  ;;  %3574 = vmatmul.f32.gmra.mxu2 %v5669_v25 }
 0x40b   : > { %v3167_v47 = vpop.f32.mrf.mxu0  ;;  %v3255_v28 = vpop.f32.mrf.mxu2 }
 0x40c   : > { %v3220_v44 = vadd.f32 %v3219_v24, %v3167_v47  ;;  %v3866_v47 = vld [vmem:[%s4060_s17 + $0x8] sm:$0xff] }
 0x40d   : > { %v3291_v22 = vpop.f32.mrf.mxu3 }
 0x40e   : > { %v3256_v2 = vadd.f32 %v3255_v28, %v3220_v44 }
 0x40f   : > { %3606 = vmatmul.f32.gmra.mxu3 %v5669_v25 }
 0x410   : > { %v3292_v31 = vadd.f32 %v3291_v22, %v3256_v2 }
 0x413   : > { %v3175_v33 = vpop.f32.mrf.mxu0  ;;  %v3260_v12 = vpop.f32.mrf.mxu2 }
 0x414   : > { %v3227_v34 = vpop.f32.mrf.mxu1  ;;  %v3224_v36 = vadd.f32 %v3223_v1, %v3175_v33 }
 0x415   : > { %v3297_v53 = vpop.f32.mrf.mxu3 }
 0x416   : > { %v3261_v25 = vadd.f32 %v3260_v12, %v3224_v36  ;;  %v3867_v12 = vld [vmem:[%s4060_s17 + $0x18] sm:$0xff] }
 0x418   : > { %v3298_v4 = vadd.f32 %v3297_v53, %v3261_v25 }
 0x41a   : > { %v3622_v49 = vpop.permute.xlu0 %3621 }
 0x41c   : > { %v3183_v11 = vpop.f32.mrf.mxu0  ;;  %v3365_v63 = vpop.f32.mrf.mxu1 }
 0x41d   : > { %v3228_v57 = vadd.f32 %v3227_v34, %v3183_v11  ;;  %v3265_v62 = vpop.f32.mrf.mxu2 }
 0x41e   : > { %v3303_v32 = vpop.f32.mrf.mxu3 }
 0x41f   : > { %v3266_v59 = vadd.f32 %v3265_v62, %v3228_v57  ;;  %v3868_v57 = vld [vmem:[%s4060_s17 + $0x28] sm:$0xff] }
 0x421   : > { %v3304_v6 = vadd.f32 %v3303_v32, %v3266_v59 }
 0x422   : > { %v3632_v14 = vpop.permute.xlu1 %3631 }
 0x424   : > { %v3333_v56 = vpop.f32.mrf.mxu0  ;;  %v3369_v43 = vpop.f32.mrf.mxu1 }
 0x425   : > { %v3334_v17 = vadd.f32 %v3333_v56, %v3292_v31 }
 0x427   : > { %v3366_v41 = vadd.f32 %v3365_v63, %v3334_v17 }
 0x429   : > { %v3610_v48 = vadd.f32 %v3863_v39, %v3366_v41 }
 0x42b   : > { %v3634_v20 = vadd.f32 %v3622_v49, %v3610_v48 }
 0x42c   : > { %v3337_v13 = vpop.f32.mrf.mxu0  ;;  %v3373_v46 = vpop.f32.mrf.mxu1 }
 0x42d   : > { %3640 = vst [vmem:[%s5732_s15] sm:$0xff] %v3634_v20  ;;  %v3338_v42 = vadd.f32 %v3337_v13, %v3298_v4 }
 0x42f   : > { %v3370_v26 = vadd.f32 %v3369_v43, %v3338_v42 }
 0x431   : > { %v3612_v0 = vadd.f32 %v3864_v7, %v3370_v26 }
 0x434   : > { %v3341_v58 = vpop.f32.mrf.mxu0 }
 0x435   : > { %v3342_v21 = vadd.f32 %v3341_v58, %v3304_v6 }
 0x437   : > { %v3374_v54 = vadd.f32 %v3373_v46, %v3342_v21 }
 0x438   : > { %v3627_v60 = vpop.permute.xlu0 %3626 }
 0x439   : > { %v3636_v15 = vadd.f32 %v3627_v60, %v3612_v0  ;;  %v3614_v35 = vadd.f32 %v3865_v50, %v3374_v54 }
 0x43b   : > { %3642 = vst [vmem:[%s5732_s15 + $0x10] sm:$0xff] %v3636_v15  ;;  %v3638_v40 = vadd.f32 %v3632_v14, %v3614_v35 }
 0x43d   : > { %3644 = vst [vmem:[%s5732_s15 + $0x20] sm:$0xff] %v3638_v40 }
 0x45e   : > { %v3489_v10 = vpop.f32.mrf.mxu0  ;;  %v3525_v61 = vpop.f32.mrf.mxu1 }
 0x462   : > { %v3401_v5 = vpop.f32.mrf.mxu2 }
 0x466   : > { %v3494_v18 = vpop.f32.mrf.mxu0  ;;  %v3531_v3 = vpop.f32.mrf.mxu1 }
 0x46a   : > { %v3453_v38 = vpop.f32.mrf.mxu3  ;;  %v3409_v9 = vpop.f32.mrf.mxu2 }
 0x46b   : > { %v3454_v45 = vadd.f32 %v3453_v38, %v3401_v5 }
 0x46d   : > { %v3490_v27 = vadd.f32 %v3489_v10, %v3454_v45 }
 0x46e   : > { %v3499_v34 = vpop.f32.mrf.mxu0  ;;  %v3537_v36 = vpop.f32.mrf.mxu1 }
 0x46f   : > { %v3526_v37 = vadd.f32 %v3525_v61, %v3490_v27 }
 0x472   : > { %v3457_v8 = vpop.f32.mrf.mxu3  ;;  %v3417_v55 = vpop.f32.mrf.mxu2 }
 0x473   : > { %v3458_v29 = vadd.f32 %v3457_v8, %v3409_v9 }
 0x475   : > { %v3495_v52 = vadd.f32 %v3494_v18, %v3458_v29 }
 0x477   : > { %v3532_v44 = vadd.f32 %v3531_v3, %v3495_v52 }
 0x47a   : > { %v3461_v51 = vpop.f32.mrf.mxu3  ;;  %v3567_v19 = vpop.f32.mrf.mxu2 }
 0x47b   : > { %v3568_v16 = vadd.f32 %v3567_v19, %v3526_v37  ;;  %v3462_v33 = vadd.f32 %v3461_v51, %v3417_v55 }
 0x47d   : > { %v3500_v31 = vadd.f32 %v3499_v34, %v3462_v33 }
 0x47f   : > { %v3538_v25 = vadd.f32 %v3537_v36, %v3500_v31 }
 0x482   : > { %v3599_v23 = vpop.f32.mrf.mxu3  ;;  %v3571_v24 = vpop.f32.mrf.mxu2 }
 0x483   : > { %v3600_v30 = vadd.f32 %v3599_v23, %v3568_v16  ;;  %v3572_v22 = vadd.f32 %v3571_v24, %v3532_v44 }
 0x485   : > { %v3611_v1 = vadd.f32 %v3866_v47, %v3600_v30 }
 0x487   : > { %v3635_v28 = vadd.f32 %v3622_v49, %v3611_v1 }
 0x489   : > { %3641 = vst [vmem:[%s5732_s15 + $0x8] sm:$0xff] %v3635_v28 }
 0x48a   : > { %v3603_v11 = vpop.f32.mrf.mxu3  ;;  %v3575_v53 = vpop.f32.mrf.mxu2 }
 0x48b   : > { %v3604_v2 = vadd.f32 %v3603_v11, %v3572_v22  ;;  %v3576_v17 = vadd.f32 %v3575_v53, %v3538_v25 }
 0x48d   : > { %v3613_v63 = vadd.f32 %v3867_v12, %v3604_v2 }
 0x48f   : > { %v3637_v56 = vadd.f32 %v3627_v60, %v3613_v63 }
 0x491   : > { %3643 = vst [vmem:[%s5732_s15 + $0x18] sm:$0xff] %v3637_v56 }
 0x492   : > { %v3607_v41 = vpop.f32.mrf.mxu3 }
 0x493   : > { %v3608_v4 = vadd.f32 %v3607_v41, %v3576_v17 }
 0x495   : > { %v3615_v39 = vadd.f32 %v3868_v57, %v3608_v4 }
 0x497   : > { %v3639_v48 = vadd.f32 %v3632_v14, %v3615_v39 }
 0x499   : > { %3645 = vst [vmem:[%s5732_s15 + $0x28] sm:$0xff] %v3639_v48 }
 0x49a   : > { %3896 = shalt.err (!%p3893_p5)
}
 0x49b   : > { %s3950_s13 = smov 256   ;;  %s3951_s15 = smov 16  }
 0x49c   : > { %3755 = dma.vmem_to_hbm [thread:$0]  (%p4022_p4), %s3662_s29, 768, %s3664_s7, %s3647_s21, %s3950_s13, %s3950_s13, %s3951_s15  }
 0x49d PF: > { %p3761_p6 = scmp.ge.s32.totalorder %s3947_s23, 2  ;;  %s3678_s16 = sand.u32 1, %s3927_s18  }
 0x49e   : > { %s3679_s24 = scalar_lea.sflag [#allocation4], %s3678_s16 }
 0x49f   : > { %p3758_p7 = pnand %p3761_p6, %p4029_p8 }
 0x4a1   : > { %p3759_p9 = pneg %p3758_p7 }
 0x4a3   : > { %3922 = dma.done.wait (%p3759_p9), %s3679_s24, 768  }
 0x4a4   : > { %3924 = vsyncadd (%p3759_p9), %s3679_s24, 4294966528  ;;  %s18_s23 = sadd.s32 1, %s3947_s23   ;;  %s6018_s18 = smov %s3931_s19 }
 0x4a5   : > { %p15_p10 = scmp.ge.s32.totalorder %s18_s23, 4   ;;  %s6019_s19 = smov %s3935_s20 }
 0x4a6   : > { %s6020_s20 = smov %s4035_s6  ;;  %s6021_s21 = smov %s3943_s22 }
 0x4a7   : > { %s6022_s22 = smov %s6024_s26  ;;  %17 = sbr.rel (!%p15_p10) target bundleno = 4 (0x4), region = 75 }
 0x4ac   :  { %3685 = vsyncpa [#allocation4], 1 }
 0x4ad   :  { %3687 = vsyncpa [#allocation4 + $0x1], 1 }

</bundles_post_ra>
